<compile_context>
chip_gen: v7x
topology: tpu7x:2x2x1
jax: 0.10.0
libtpu: 0.0.40
codegen_flags: <defaults>
</compile_context>

<pallas_src>
import functools

import jax
import jax.numpy as jnp
import numpy as np
from jax import lax
from jax.experimental import pallas as pl
from jax.experimental.pallas import tpu as pltpu


def _round_up(x, m):
    return ((x + m - 1) // m) * m


def _cdiv(a, b):
    return -(-a // b)


# ----------------------------------------------------------------------------
# Pallas kernel: one grid step == t_blk LSTM time steps for one batch block,
# all layers in-kernel.  The output refs (resident across the time axis) hold
# the running hidden/cell state between time blocks.
# ----------------------------------------------------------------------------
def _lstm_block_kernel(*refs, num_layers, hidden, b_blk, t_blk, seq_len,
                       has_init, unroll):
    L, Hp = num_layers, hidden
    if has_init:
        (xg_ref, w_hh_ref, w_ih_ref, b_ref, h0_ref, c0_ref,
         h_out_ref, c_out_ref) = refs
    else:
        xg_ref, w_hh_ref, w_ih_ref, b_ref, h_out_ref, c_out_ref = refs
        h0_ref = c0_ref = None

    ti = pl.program_id(1)
    mxu_dtype = w_hh_ref.dtype
    mask_tail = (seq_len % t_blk) != 0            # static python bool

    @pl.when(ti == 0)
    def _():
        if has_init:
            h_out_ref[...] = h0_ref[...].astype(jnp.float32)
            c_out_ref[...] = c0_ref[...].astype(jnp.float32)
        else:
            h_out_ref[...] = jnp.zeros_like(h_out_ref)
            c_out_ref[...] = jnp.zeros_like(c_out_ref)

    # Hoisted out of the time loop: per-layer bias broadcasts (layers >= 1;
    # layer 0's bias is folded into the precomputed xg stream).  JAX does not
    # CSE broadcast_in_dim, so keep these out of the unrolled loop.
    b_bc = [jnp.broadcast_to(b_ref[pl.ds(l - 1, 1), :].astype(jnp.float32),
                             (b_blk, 4 * Hp))
            for l in range(1, L)]

    def sigmoid(x):
        # Exact: sigmoid(x) = 0.5*(1 + tanh(x/2)) -> one EUP push instead of
        # exp + divide.
        return 0.5 * jnp.tanh(0.5 * x) + 0.5

    def activations(gates, c_prev):
        # Gate slabs packed (i, f, o, g), each 128-lane aligned: one sigmoid
        # over the contiguous 3*Hp slab, one tanh over the g slab.
        sig = sigmoid(gates[:, :3 * Hp])
        i_g = sig[:, 0 * Hp:1 * Hp]
        f_g = sig[:, 1 * Hp:2 * Hp]
        o_g = sig[:, 2 * Hp:3 * Hp]
        g_g = jnp.tanh(gates[:, 3 * Hp:4 * Hp])
        c_new = f_g * c_prev + i_g * g_g
        h_new = o_g * jnp.tanh(c_new)
        return h_new, c_new

    t0 = ti * t_blk

    def step(tt, carry):
        hs, cs = carry
        hs, cs = list(hs), list(cs)
        if mask_tail:
            valid = (t0 + tt) < seq_len

        xg_t = xg_ref[tt].astype(jnp.float32)                   # (b_blk, 4Hp)

        # ---- layer 0: x @ W_ih[0] + b[0] precomputed in wrapper (xg stream);
        # only the recurrent h @ W_hh[0] half is done here.
        gates = xg_t + jnp.dot(hs[0].astype(mxu_dtype), w_hh_ref[0],
                               preferred_element_type=jnp.float32)
        h_new, c_new = activations(gates, cs[0])
        if mask_tail:
            h_new = jnp.where(valid, h_new, hs[0])
            c_new = jnp.where(valid, c_new, cs[0])
        hs[0], cs[0] = h_new, c_new
        layer_in = h_new

        # ---- layers 1..L-1: two accumulating MXU dots (no concat copy).
        for l in range(1, L):                                    # static, small
            gates = (jnp.dot(layer_in.astype(mxu_dtype), w_ih_ref[l - 1],
                             preferred_element_type=jnp.float32)
                     + jnp.dot(hs[l].astype(mxu_dtype), w_hh_ref[l],
                               preferred_element_type=jnp.float32)
                     + b_bc[l - 1])
            h_new, c_new = activations(gates, cs[l])
            if mask_tail:
                h_new = jnp.where(valid, h_new, hs[l])
                c_new = jnp.where(valid, c_new, cs[l])
            hs[l], cs[l] = h_new, c_new
            layer_in = h_new
        return (tuple(hs), tuple(cs))

    # h/c carried across the time block in the loop carry; the resident output
    # refs are touched only at block start / end.
    hs0 = tuple(h_out_ref[l] for l in range(L))
    cs0 = tuple(c_out_ref[l] for l in range(L))
    hs, cs = lax.fori_loop(0, t_blk, step, (hs0, cs0), unroll=unroll)
    for l in range(L):
        h_out_ref[l] = hs[l]
        c_out_ref[l] = cs[l]


def rnn_parallel_forward(x, h0, c0, w_ih, w_hh, b, param_dtype=None):
    """x: (B, S, H); h0, c0: (L, B, H) or None (zero init, the torchbraid
    default); w_ih, w_hh: (L, H, 4H); b: (L, 4H) with b = b_ih + b_hh.

    Gate order i, f, g, o (torch.nn.LSTM convention).
    Returns (h_n, c_n), each (L, B, H).
    """
    f32 = jnp.float32
    B, S, H = x.shape
    L = w_ih.shape[0]
    Lm1 = max(L - 1, 1)
    has_init = (h0 is not None) or (c0 is not None)

    Hp = _round_up(H, 128)

    # Batch tiling: >1 batch block feeds the 2nd TensorCore on v7x via the
    # leading "parallel" grid axis; a single block otherwise.
    if B > 8:
        n_bb = 2
        b_blk = _round_up(_cdiv(B, n_bb), 8)
    else:
        n_bb = 1
        b_blk = _round_up(max(B, 1), 8)
    Bp = n_bb * b_blk

    # ---- hardware budget ----------------------------------------------------
    try:
        vmem_cap = int(pltpu.get_tpu_info().vmem_capacity_bytes)
    except Exception:
        vmem_cap = 64 << 20                       # conservative (v7x per-TC)

    weight_f32_bytes = (L + Lm1) * Hp * 4 * Hp * 4
    if param_dtype is None:
        # bf16 weights/xg once resident f32 weights threaten the VMEM ceiling;
        # MXU is bf16-native with f32 accumulation.  Elementwise math stays f32.
        param_dtype = jnp.bfloat16 if weight_f32_bytes > int(0.35 * vmem_cap) else f32
    param_bytes = jnp.dtype(param_dtype).itemsize

    # Time blocking: bound the streamed xg block by ~8 MiB/buffer, cap at 64
    # steps, balance so the tail block is (nearly) full; partial inner unroll.
    xg_row_bytes = b_blk * 4 * Hp * param_bytes
    t_cap = max(1, min(64, (8 << 20) // max(xg_row_bytes, 1)))
    n_tb = _cdiv(S, t_cap)
    t_blk = _cdiv(S, n_tb)
    S_pad = n_tb * t_blk
    unroll = min(t_blk, 8)

    # ---- gate-aligned weight packing, order (i, f, o, g) ---------------------
    # Each gate slab sits at a 128-aligned column offset k*Hp; padded rows/cols
    # are zero so padded hidden lanes stay exactly 0 through the recurrence.
    perm = (0, 1, 3, 2)            # new slab k  <-  torch gate perm[k] of (i,f,g,o)
    w_hh_all = jnp.zeros((L, Hp, 4 * Hp), f32)
    w_ih_rest = jnp.zeros((Lm1, Hp, 4 * Hp), f32)
    w_ih0 = jnp.zeros((Hp, 4 * Hp), f32)
    b_rest = jnp.zeros((Lm1, 4 * Hp), f32)
    b0 = jnp.zeros((4 * Hp,), f32)
    for k_new, k_old in enumerate(perm):
        src = slice(k_old * H, (k_old + 1) * H)
        dst = slice(k_new * Hp, k_new * Hp + H)
        w_hh_all = w_hh_all.at[:, :H, dst].set(w_hh[:, :, src].astype(f32))
        w_ih0 = w_ih0.at[:H, dst].set(w_ih[0, :, src].astype(f32))
        b0 = b0.at[dst].set(b[0, src].astype(f32))
        if L > 1:
            w_ih_rest = w_ih_rest.at[:, :H, dst].set(w_ih[1:, :, src].astype(f32))
            b_rest = b_rest.at[:, dst].set(b[1:, src].astype(f32))

    # Time-major padded input; layer-0 input projection (no time dependence) is
    # one big MXU-friendly matmul outside the recurrence, layer-0 bias folded in.
    x_t = jnp.transpose(x, (1, 0, 2)).astype(f32)                     # (S, B, H)
    x_p = jnp.zeros((S_pad, Bp, Hp), f32).at[:S, :B, :H].set(x_t)
    xg = jnp.einsum('sbh,hg->sbg', x_p, w_ih0,
                    preferred_element_type=f32) + b0[None, None, :]   # (S_pad, Bp, 4Hp)
    xg = xg.astype(param_dtype)
    w_hh_all = w_hh_all.astype(param_dtype)
    w_ih_rest = w_ih_rest.astype(param_dtype)

    args = [xg, w_hh_all, w_ih_rest, b_rest]
    in_specs = [
        # streamed precomputed layer-0 gates
        pl.BlockSpec((t_blk, b_blk, 4 * Hp), lambda bi, ti: (ti, bi, 0)),
        # resident, single-buffered weights / biases (constant for whole grid)
        pl.BlockSpec(memory_space=pltpu.MemorySpace.VMEM),
        pl.BlockSpec(memory_space=pltpu.MemorySpace.VMEM),
        pl.BlockSpec(memory_space=pltpu.MemorySpace.VMEM),
    ]
    if has_init:
        h0_a = jnp.zeros((L, B, H), f32) if h0 is None else h0.astype(f32)
        c0_a = jnp.zeros((L, B, H), f32) if c0 is None else c0.astype(f32)
        h0_p = jnp.zeros((L, Bp, Hp), f32).at[:, :B, :H].set(h0_a)
        c0_p = jnp.zeros((L, Bp, Hp), f32).at[:, :B, :H].set(c0_a)
        args += [h0_p, c0_p]
        in_specs += [pl.BlockSpec((L, b_blk, Hp), lambda bi, ti: (0, bi, 0)),
                     pl.BlockSpec((L, b_blk, Hp), lambda bi, ti: (0, bi, 0))]

    # ---- explicit VMEM budget -------------------------------------------------
    need = (L + Lm1) * Hp * 4 * Hp * param_bytes          # resident weights (x1)
    need += Lm1 * 4 * Hp * 4                               # biases
    need += 2 * t_blk * b_blk * 4 * Hp * param_bytes       # xg stream (x2 buffers)
    need += 2 * 2 * 2 * L * b_blk * Hp * 4                 # h/c outputs (x2 buffers)
    need += 2 * L * b_blk * Hp * 4                         # loop-carry temporaries
    if has_init:
        need += 2 * 2 * 2 * L * b_blk * Hp * 4
    cap_usable = int(vmem_cap * 0.875)
    vmem_limit = int(min(cap_usable, max(int(need * 1.3) + (4 << 20), 32 << 20)))

    kernel = functools.partial(
        _lstm_block_kernel, num_layers=L, hidden=Hp, b_blk=b_blk, t_blk=t_blk,
        seq_len=S, has_init=has_init, unroll=unroll)

    h_n, c_n = pl.pallas_call(
        kernel,
        out_shape=(
            jax.ShapeDtypeStruct((L, Bp, Hp), f32),
            jax.ShapeDtypeStruct((L, Bp, Hp), f32),
        ),
        grid_spec=pltpu.PrefetchScalarGridSpec(
            num_scalar_prefetch=0,
            grid=(n_bb, n_tb),
            in_specs=in_specs,
            out_specs=(
                pl.BlockSpec((L, b_blk, Hp), lambda bi, ti: (0, bi, 0)),
                pl.BlockSpec((L, b_blk, Hp), lambda bi, ti: (0, bi, 0)),
            ),
        ),
        compiler_params=pltpu.CompilerParams(
            # batch blocks are independent (2nd TC on v7x); time is serial.
            dimension_semantics=("parallel", "arbitrary"),
            vmem_limit_bytes=vmem_limit,
        ),
    )(*args)

    return h_n[:, :B, :H], c_n[:, :B, :H]


# ----------------------------------------------------------------------------
# Pure-JAX reference (matches torch.nn.LSTM semantics, gate order i,f,g,o)
# ----------------------------------------------------------------------------
def rnn_parallel_ref(x, h0, c0, w_ih, w_hh, b):
    B, S, H = x.shape
    L = h0.shape[0]
    h = [h0[l] for l in range(L)]
    c = [c0[l] for l in range(L)]
    for t in range(S):
        inp = x[:, t, :]
        for l in range(L):
            gates = inp @ w_ih[l] + h[l] @ w_hh[l] + b[l]
            i_g = jax.nn.sigmoid(gates[:, :H])
            f_g = jax.nn.sigmoid(gates[:, H:2 * H])
            g_g = jnp.tanh(gates[:, 2 * H:3 * H])
            o_g = jax.nn.sigmoid(gates[:, 3 * H:])
            c[l] = f_g * c[l] + i_g * g_g
            h[l] = o_g * jnp.tanh(c[l])
            inp = h[l]
    return jnp.stack(h), jnp.stack(c)


if __name__ == "__main__":
    # Small shapes consistent with the module's forward():
    #   num_steps (seq) = 8, hidden_size = 32, num_layers = 2, batch = 2
    B, S, H, L = 2, 8, 32, 2

    key = jax.random.PRNGKey(0)
    kx, kih, khh, kb1, kb2 = jax.random.split(key, 5)

    x = jax.random.normal(kx, (B, S, H), dtype=jnp.float32)

    # Deterministic parameter init mirroring nn.LSTM: U(-1/sqrt(H), 1/sqrt(H)).
    bound = 1.0 / np.sqrt(H)
    w_ih = jax.random.uniform(kih, (L, H, 4 * H), jnp.float32, -bound, bound)
    w_hh = jax.random.uniform(khh, (L, H, 4 * H), jnp.float32, -bound, bound)
    b_ih = jax.random.uniform(kb1, (L, 4 * H), jnp.float32, -bound, bound)
    b_hh = jax.random.uniform(kb2, (L, 4 * H), jnp.float32, -bound, bound)
    b = b_ih + b_hh

    # forward() with h_c=None -> zero initial hidden/cell states.
    h_n, c_n = rnn_parallel_forward(x, None, None, w_ih, w_hh, b)
    h_n, c_n = jax.block_until_ready((h_n, c_n))

    h0_ref = jnp.zeros((L, B, H), jnp.float32)
    c0_ref = jnp.zeros((L, B, H), jnp.float32)
    h_ref, c_ref = rnn_parallel_ref(x, h0_ref, c0_ref, w_ih, w_hh, b)
    np.testing.assert_allclose(np.asarray(h_n), np.asarray(h_ref), atol=1e-4, rtol=1e-4)
    np.testing.assert_allclose(np.asarray(c_n), np.asarray(c_ref), atol=1e-4, rtol=1e-4)

    print("KERNEL_OK")
</pallas_src>

<mosaic_0001>
module attributes {stable_mosaic.version = 11 : i64} {
  func.func @_lstm_block_kernel(%arg0: i32, %arg1: i32, %arg2: memref<8x8x512xf32, #tpu.memory_space<vmem>>, %arg3: memref<2x128x512xf32, #tpu.memory_space<vmem>>, %arg4: memref<1x128x512xf32, #tpu.memory_space<vmem>>, %arg5: memref<1x512xf32, #tpu.memory_space<vmem>>, %arg6: memref<2x8x128xf32, #tpu.memory_space<vmem>>, %arg7: memref<2x8x128xf32, #tpu.memory_space<vmem>>) attributes {dimension_semantics = [#tpu.dimension_semantics<parallel>, #tpu.dimension_semantics<arbitrary>], iteration_bounds = array<i64: 1, 1>, scalar_prefetch = 0 : i64, scratch_operands = 0 : i64, tpu.core_type = #tpu.core_type<tc>, window_params = [{transform_indices = @transform_0, window_bounds = array<i64: 8, 8, 512>}, {pipeline_mode = #tpu.pipeline_mode<synchronous>, transform_indices = @transform_1, window_bounds = array<i64: 2, 128, 512>}, {pipeline_mode = #tpu.pipeline_mode<synchronous>, transform_indices = @transform_2, window_bounds = array<i64: 1, 128, 512>}, {pipeline_mode = #tpu.pipeline_mode<synchronous>, transform_indices = @transform_3, window_bounds = array<i64: 1, 512>}, {transform_indices = @transform_4, window_bounds = array<i64: 2, 8, 128>}, {transform_indices = @transform_5, window_bounds = array<i64: 2, 8, 128>}]} {
    %c0_i32 = arith.constant 0 : i32
    %0 = arith.cmpi eq, %arg1, %c0_i32 : i32
    %1 = arith.extui %0 : i1 to i32
    %c0_i32_0 = arith.constant 0 : i32
    %2 = arith.cmpi ne, %1, %c0_i32_0 : i32
    scf.if %2 {
      %cst_185 = arith.constant 0.000000e+00 : f32
      %434 = vector.broadcast %cst_185 : f32 to vector<2x8x128xf32>
      %c0_186 = arith.constant 0 : index
      %c0_187 = arith.constant 0 : index
      %c0_188 = arith.constant 0 : index
      %435 = vector.load %arg6[%c0_186, %c0_187, %c0_188] : memref<2x8x128xf32, #tpu.memory_space<vmem>>, vector<2x8x128xf32>
      tpu.vector_store %arg6[%c0_186, %c0_187, %c0_188], %434 {strides = array<i32>} : memref<2x8x128xf32, #tpu.memory_space<vmem>>, vector<2x8x128xf32>,
      %cst_189 = arith.constant 0.000000e+00 : f32
      %436 = vector.broadcast %cst_189 : f32 to vector<2x8x128xf32>
      %c0_190 = arith.constant 0 : index
      %c0_191 = arith.constant 0 : index
      %c0_192 = arith.constant 0 : index
      %437 = vector.load %arg7[%c0_190, %c0_191, %c0_192] : memref<2x8x128xf32, #tpu.memory_space<vmem>>, vector<2x8x128xf32>
      tpu.vector_store %arg7[%c0_190, %c0_191, %c0_192], %436 {strides = array<i32>} : memref<2x8x128xf32, #tpu.memory_space<vmem>>, vector<2x8x128xf32>,
    } else {
    }
    %c0 = arith.constant 0 : index
    %c0_1 = arith.constant 0 : index
    %3 = vector.load %arg5[%c0, %c0_1] : memref<1x512xf32, #tpu.memory_space<vmem>>, vector<1x512xf32>
    %4 = vector.shape_cast %3 : vector<1x512xf32> to vector<1x512xf32>
    %5 = vector.broadcast %4 : vector<1x512xf32> to vector<8x512xf32>
    %c0_2 = arith.constant 0 : index
    %c0_3 = arith.constant 0 : index
    %c0_4 = arith.constant 0 : index
    %6 = vector.load %arg6[%c0_2, %c0_3, %c0_4] : memref<2x8x128xf32, #tpu.memory_space<vmem>>, vector<1x8x128xf32>
    %7 = vector.shape_cast %6 : vector<1x8x128xf32> to vector<8x128xf32>
    %c1 = arith.constant 1 : index
    %c0_5 = arith.constant 0 : index
    %c0_6 = arith.constant 0 : index
    %8 = vector.load %arg6[%c1, %c0_5, %c0_6] : memref<2x8x128xf32, #tpu.memory_space<vmem>>, vector<1x8x128xf32>
    %9 = vector.shape_cast %8 : vector<1x8x128xf32> to vector<8x128xf32>
    %c0_7 = arith.constant 0 : index
    %c0_8 = arith.constant 0 : index
    %c0_9 = arith.constant 0 : index
    %10 = vector.load %arg7[%c0_7, %c0_8, %c0_9] : memref<2x8x128xf32, #tpu.memory_space<vmem>>, vector<1x8x128xf32>
    %11 = vector.shape_cast %10 : vector<1x8x128xf32> to vector<8x128xf32>
    %c1_10 = arith.constant 1 : index
    %c0_11 = arith.constant 0 : index
    %c0_12 = arith.constant 0 : index
    %12 = vector.load %arg7[%c1_10, %c0_11, %c0_12] : memref<2x8x128xf32, #tpu.memory_space<vmem>>, vector<1x8x128xf32>
    %13 = vector.shape_cast %12 : vector<1x8x128xf32> to vector<8x128xf32>
    %c0_i32_13 = arith.constant 0 : i32
    %14 = arith.index_cast %c0_i32_13 : i32 to index
    %c0_14 = arith.constant 0 : index
    %c0_15 = arith.constant 0 : index
    %15 = vector.load %arg2[%14, %c0_14, %c0_15] : memref<8x8x512xf32, #tpu.memory_space<vmem>>, vector<1x8x512xf32>
    %16 = vector.shape_cast %15 : vector<1x8x512xf32> to vector<8x512xf32>
    %c0_16 = arith.constant 0 : index
    %c0_17 = arith.constant 0 : index
    %c0_18 = arith.constant 0 : index
    %17 = vector.load %arg3[%c0_16, %c0_17, %c0_18] : memref<2x128x512xf32, #tpu.memory_space<vmem>>, vector<1x128x512xf32>
    %18 = vector.shape_cast %17 : vector<1x128x512xf32> to vector<128x512xf32>
    %cst = arith.constant dense<0.000000e+00> : vector<8x512xf32>
    %19 = tpu.matmul %7, %18, %cst {dimension_numbers = #tpu.dot_dimension_numbers<[1], [0], [0], [1], [0, 0, 1, 1], [], []>} : vector<8x128xf32>, vector<128x512xf32>, vector<8x512xf32> -> vector<8x512xf32>
    %20 = arith.addf %16, %19 : vector<8x512xf32>
    %21 = vector.extract_strided_slice %20 {offsets = [0, 0], sizes = [8, 384], strides = [1, 1]} : vector<8x512xf32> to vector<8x384xf32>
    %cst_19 = arith.constant 5.000000e-01 : f32
    %22 = vector.broadcast %cst_19 : f32 to vector<8x384xf32>
    %23 = arith.mulf %22, %21 : vector<8x384xf32>
    %24 = math.tanh %23 : vector<8x384xf32>
    %cst_20 = arith.constant 5.000000e-01 : f32
    %25 = vector.broadcast %cst_20 : f32 to vector<8x384xf32>
    %26 = arith.mulf %25, %24 : vector<8x384xf32>
    %cst_21 = arith.constant 5.000000e-01 : f32
    %27 = vector.broadcast %cst_21 : f32 to vector<8x384xf32>
    %28 = arith.addf %26, %27 : vector<8x384xf32>
    %29 = vector.extract_strided_slice %28 {offsets = [0, 0], sizes = [8, 128], strides = [1, 1]} : vector<8x384xf32> to vector<8x128xf32>
    %30 = vector.extract_strided_slice %28 {offsets = [0, 128], sizes = [8, 128], strides = [1, 1]} : vector<8x384xf32> to vector<8x128xf32>
    %31 = vector.extract_strided_slice %28 {offsets = [0, 256], sizes = [8, 128], strides = [1, 1]} : vector<8x384xf32> to vector<8x128xf32>
    %32 = vector.extract_strided_slice %20 {offsets = [0, 384], sizes = [8, 128], strides = [1, 1]} : vector<8x512xf32> to vector<8x128xf32>
    %33 = math.tanh %32 : vector<8x128xf32>
    %34 = arith.mulf %30, %11 : vector<8x128xf32>
    %35 = arith.mulf %29, %33 : vector<8x128xf32>
    %36 = arith.addf %34, %35 : vector<8x128xf32>
    %37 = math.tanh %36 : vector<8x128xf32>
    %38 = arith.mulf %31, %37 : vector<8x128xf32>
    %c0_22 = arith.constant 0 : index
    %c0_23 = arith.constant 0 : index
    %c0_24 = arith.constant 0 : index
    %39 = vector.load %arg4[%c0_22, %c0_23, %c0_24] : memref<1x128x512xf32, #tpu.memory_space<vmem>>, vector<1x128x512xf32>
    %40 = vector.shape_cast %39 : vector<1x128x512xf32> to vector<128x512xf32>
    %cst_25 = arith.constant dense<0.000000e+00> : vector<8x512xf32>
    %41 = tpu.matmul %38, %40, %cst_25 {dimension_numbers = #tpu.dot_dimension_numbers<[1], [0], [0], [1], [0, 0, 1, 1], [], []>} : vector<8x128xf32>, vector<128x512xf32>, vector<8x512xf32> -> vector<8x512xf32>
    %c1_26 = arith.constant 1 : index
    %c0_27 = arith.constant 0 : index
    %c0_28 = arith.constant 0 : index
    %42 = vector.load %arg3[%c1_26, %c0_27, %c0_28] : memref<2x128x512xf32, #tpu.memory_space<vmem>>, vector<1x128x512xf32>
    %43 = vector.shape_cast %42 : vector<1x128x512xf32> to vector<128x512xf32>
    %cst_29 = arith.constant dense<0.000000e+00> : vector<8x512xf32>
    %44 = tpu.matmul %9, %43, %cst_29 {dimension_numbers = #tpu.dot_dimension_numbers<[1], [0], [0], [1], [0, 0, 1, 1], [], []>} : vector<8x128xf32>, vector<128x512xf32>, vector<8x512xf32> -> vector<8x512xf32>
    %45 = arith.addf %41, %44 : vector<8x512xf32>
    %46 = arith.addf %45, %5 : vector<8x512xf32>
    %47 = vector.extract_strided_slice %46 {offsets = [0, 0], sizes = [8, 384], strides = [1, 1]} : vector<8x512xf32> to vector<8x384xf32>
    %cst_30 = arith.constant 5.000000e-01 : f32
    %48 = vector.broadcast %cst_30 : f32 to vector<8x384xf32>
    %49 = arith.mulf %48, %47 : vector<8x384xf32>
    %50 = math.tanh %49 : vector<8x384xf32>
    %cst_31 = arith.constant 5.000000e-01 : f32
    %51 = vector.broadcast %cst_31 : f32 to vector<8x384xf32>
    %52 = arith.mulf %51, %50 : vector<8x384xf32>
    %cst_32 = arith.constant 5.000000e-01 : f32
    %53 = vector.broadcast %cst_32 : f32 to vector<8x384xf32>
    %54 = arith.addf %52, %53 : vector<8x384xf32>
    %55 = vector.extract_strided_slice %54 {offsets = [0, 0], sizes = [8, 128], strides = [1, 1]} : vector<8x384xf32> to vector<8x128xf32>
    %56 = vector.extract_strided_slice %54 {offsets = [0, 128], sizes = [8, 128], strides = [1, 1]} : vector<8x384xf32> to vector<8x128xf32>
    %57 = vector.extract_strided_slice %54 {offsets = [0, 256], sizes = [8, 128], strides = [1, 1]} : vector<8x384xf32> to vector<8x128xf32>
    %58 = vector.extract_strided_slice %46 {offsets = [0, 384], sizes = [8, 128], strides = [1, 1]} : vector<8x512xf32> to vector<8x128xf32>
    %59 = math.tanh %58 : vector<8x128xf32>
    %60 = arith.mulf %56, %13 : vector<8x128xf32>
    %61 = arith.mulf %55, %59 : vector<8x128xf32>
    %62 = arith.addf %60, %61 : vector<8x128xf32>
    %63 = math.tanh %62 : vector<8x128xf32>
    %64 = arith.mulf %57, %63 : vector<8x128xf32>
    %c1_i32 = arith.constant 1 : i32
    %65 = arith.index_cast %c1_i32 : i32 to index
    %c0_33 = arith.constant 0 : index
    %c0_34 = arith.constant 0 : index
    %66 = vector.load %arg2[%65, %c0_33, %c0_34] : memref<8x8x512xf32, #tpu.memory_space<vmem>>, vector<1x8x512xf32>
    %67 = vector.shape_cast %66 : vector<1x8x512xf32> to vector<8x512xf32>
    %c0_35 = arith.constant 0 : index
    %c0_36 = arith.constant 0 : index
    %c0_37 = arith.constant 0 : index
    %68 = vector.load %arg3[%c0_35, %c0_36, %c0_37] : memref<2x128x512xf32, #tpu.memory_space<vmem>>, vector<1x128x512xf32>
    %69 = vector.shape_cast %68 : vector<1x128x512xf32> to vector<128x512xf32>
    %cst_38 = arith.constant dense<0.000000e+00> : vector<8x512xf32>
    %70 = tpu.matmul %38, %69, %cst_38 {dimension_numbers = #tpu.dot_dimension_numbers<[1], [0], [0], [1], [0, 0, 1, 1], [], []>} : vector<8x128xf32>, vector<128x512xf32>, vector<8x512xf32> -> vector<8x512xf32>
    %71 = arith.addf %67, %70 : vector<8x512xf32>
    %72 = vector.extract_strided_slice %71 {offsets = [0, 0], sizes = [8, 384], strides = [1, 1]} : vector<8x512xf32> to vector<8x384xf32>
    %cst_39 = arith.constant 5.000000e-01 : f32
    %73 = vector.broadcast %cst_39 : f32 to vector<8x384xf32>
    %74 = arith.mulf %73, %72 : vector<8x384xf32>
    %75 = math.tanh %74 : vector<8x384xf32>
    %cst_40 = arith.constant 5.000000e-01 : f32
    %76 = vector.broadcast %cst_40 : f32 to vector<8x384xf32>
    %77 = arith.mulf %76, %75 : vector<8x384xf32>
    %cst_41 = arith.constant 5.000000e-01 : f32
    %78 = vector.broadcast %cst_41 : f32 to vector<8x384xf32>
    %79 = arith.addf %77, %78 : vector<8x384xf32>
    %80 = vector.extract_strided_slice %79 {offsets = [0, 0], sizes = [8, 128], strides = [1, 1]} : vector<8x384xf32> to vector<8x128xf32>
    %81 = vector.extract_strided_slice %79 {offsets = [0, 128], sizes = [8, 128], strides = [1, 1]} : vector<8x384xf32> to vector<8x128xf32>
    %82 = vector.extract_strided_slice %79 {offsets = [0, 256], sizes = [8, 128], strides = [1, 1]} : vector<8x384xf32> to vector<8x128xf32>
    %83 = vector.extract_strided_slice %71 {offsets = [0, 384], sizes = [8, 128], strides = [1, 1]} : vector<8x512xf32> to vector<8x128xf32>
    %84 = math.tanh %83 : vector<8x128xf32>
    %85 = arith.mulf %81, %36 : vector<8x128xf32>
    %86 = arith.mulf %80, %84 : vector<8x128xf32>
    %87 = arith.addf %85, %86 : vector<8x128xf32>
    %88 = math.tanh %87 : vector<8x128xf32>
    %89 = arith.mulf %82, %88 : vector<8x128xf32>
    %c0_42 = arith.constant 0 : index
    %c0_43 = arith.constant 0 : index
    %c0_44 = arith.constant 0 : index
    %90 = vector.load %arg4[%c0_42, %c0_43, %c0_44] : memref<1x128x512xf32, #tpu.memory_space<vmem>>, vector<1x128x512xf32>
    %91 = vector.shape_cast %90 : vector<1x128x512xf32> to vector<128x512xf32>
    %cst_45 = arith.constant dense<0.000000e+00> : vector<8x512xf32>
    %92 = tpu.matmul %89, %91, %cst_45 {dimension_numbers = #tpu.dot_dimension_numbers<[1], [0], [0], [1], [0, 0, 1, 1], [], []>} : vector<8x128xf32>, vector<128x512xf32>, vector<8x512xf32> -> vector<8x512xf32>
    %c1_46 = arith.constant 1 : index
    %c0_47 = arith.constant 0 : index
    %c0_48 = arith.constant 0 : index
    %93 = vector.load %arg3[%c1_46, %c0_47, %c0_48] : memref<2x128x512xf32, #tpu.memory_space<vmem>>, vector<1x128x512xf32>
    %94 = vector.shape_cast %93 : vector<1x128x512xf32> to vector<128x512xf32>
    %cst_49 = arith.constant dense<0.000000e+00> : vector<8x512xf32>
    %95 = tpu.matmul %64, %94, %cst_49 {dimension_numbers = #tpu.dot_dimension_numbers<[1], [0], [0], [1], [0, 0, 1, 1], [], []>} : vector<8x128xf32>, vector<128x512xf32>, vector<8x512xf32> -> vector<8x512xf32>
    %96 = arith.addf %92, %95 : vector<8x512xf32>
    %97 = arith.addf %96, %5 : vector<8x512xf32>
    %98 = vector.extract_strided_slice %97 {offsets = [0, 0], sizes = [8, 384], strides = [1, 1]} : vector<8x512xf32> to vector<8x384xf32>
    %cst_50 = arith.constant 5.000000e-01 : f32
    %99 = vector.broadcast %cst_50 : f32 to vector<8x384xf32>
    %100 = arith.mulf %99, %98 : vector<8x384xf32>
    %101 = math.tanh %100 : vector<8x384xf32>
    %cst_51 = arith.constant 5.000000e-01 : f32
    %102 = vector.broadcast %cst_51 : f32 to vector<8x384xf32>
    %103 = arith.mulf %102, %101 : vector<8x384xf32>
    %cst_52 = arith.constant 5.000000e-01 : f32
    %104 = vector.broadcast %cst_52 : f32 to vector<8x384xf32>
    %105 = arith.addf %103, %104 : vector<8x384xf32>
    %106 = vector.extract_strided_slice %105 {offsets = [0, 0], sizes = [8, 128], strides = [1, 1]} : vector<8x384xf32> to vector<8x128xf32>
    %107 = vector.extract_strided_slice %105 {offsets = [0, 128], sizes = [8, 128], strides = [1, 1]} : vector<8x384xf32> to vector<8x128xf32>
    %108 = vector.extract_strided_slice %105 {offsets = [0, 256], sizes = [8, 128], strides = [1, 1]} : vector<8x384xf32> to vector<8x128xf32>
    %109 = vector.extract_strided_slice %97 {offsets = [0, 384], sizes = [8, 128], strides = [1, 1]} : vector<8x512xf32> to vector<8x128xf32>
    %110 = math.tanh %109 : vector<8x128xf32>
    %111 = arith.mulf %107, %62 : vector<8x128xf32>
    %112 = arith.mulf %106, %110 : vector<8x128xf32>
    %113 = arith.addf %111, %112 : vector<8x128xf32>
    %114 = math.tanh %113 : vector<8x128xf32>
    %115 = arith.mulf %108, %114 : vector<8x128xf32>
    %c2_i32 = arith.constant 2 : i32
    %116 = arith.index_cast %c2_i32 : i32 to index
    %c0_53 = arith.constant 0 : index
    %c0_54 = arith.constant 0 : index
    %117 = vector.load %arg2[%116, %c0_53, %c0_54] : memref<8x8x512xf32, #tpu.memory_space<vmem>>, vector<1x8x512xf32>
    %118 = vector.shape_cast %117 : vector<1x8x512xf32> to vector<8x512xf32>
    %c0_55 = arith.constant 0 : index
    %c0_56 = arith.constant 0 : index
    %c0_57 = arith.constant 0 : index
    %119 = vector.load %arg3[%c0_55, %c0_56, %c0_57] : memref<2x128x512xf32, #tpu.memory_space<vmem>>, vector<1x128x512xf32>
    %120 = vector.shape_cast %119 : vector<1x128x512xf32> to vector<128x512xf32>
    %cst_58 = arith.constant dense<0.000000e+00> : vector<8x512xf32>
    %121 = tpu.matmul %89, %120, %cst_58 {dimension_numbers = #tpu.dot_dimension_numbers<[1], [0], [0], [1], [0, 0, 1, 1], [], []>} : vector<8x128xf32>, vector<128x512xf32>, vector<8x512xf32> -> vector<8x512xf32>
    %122 = arith.addf %118, %121 : vector<8x512xf32>
    %123 = vector.extract_strided_slice %122 {offsets = [0, 0], sizes = [8, 384], strides = [1, 1]} : vector<8x512xf32> to vector<8x384xf32>
    %cst_59 = arith.constant 5.000000e-01 : f32
    %124 = vector.broadcast %cst_59 : f32 to vector<8x384xf32>
    %125 = arith.mulf %124, %123 : vector<8x384xf32>
    %126 = math.tanh %125 : vector<8x384xf32>
    %cst_60 = arith.constant 5.000000e-01 : f32
    %127 = vector.broadcast %cst_60 : f32 to vector<8x384xf32>
    %128 = arith.mulf %127, %126 : vector<8x384xf32>
    %cst_61 = arith.constant 5.000000e-01 : f32
    %129 = vector.broadcast %cst_61 : f32 to vector<8x384xf32>
    %130 = arith.addf %128, %129 : vector<8x384xf32>
    %131 = vector.extract_strided_slice %130 {offsets = [0, 0], sizes = [8, 128], strides = [1, 1]} : vector<8x384xf32> to vector<8x128xf32>
    %132 = vector.extract_strided_slice %130 {offsets = [0, 128], sizes = [8, 128], strides = [1, 1]} : vector<8x384xf32> to vector<8x128xf32>
    %133 = vector.extract_strided_slice %130 {offsets = [0, 256], sizes = [8, 128], strides = [1, 1]} : vector<8x384xf32> to vector<8x128xf32>
    %134 = vector.extract_strided_slice %122 {offsets = [0, 384], sizes = [8, 128], strides = [1, 1]} : vector<8x512xf32> to vector<8x128xf32>
    %135 = math.tanh %134 : vector<8x128xf32>
    %136 = arith.mulf %132, %87 : vector<8x128xf32>
    %137 = arith.mulf %131, %135 : vector<8x128xf32>
    %138 = arith.addf %136, %137 : vector<8x128xf32>
    %139 = math.tanh %138 : vector<8x128xf32>
    %140 = arith.mulf %133, %139 : vector<8x128xf32>
    %c0_62 = arith.constant 0 : index
    %c0_63 = arith.constant 0 : index
    %c0_64 = arith.constant 0 : index
    %141 = vector.load %arg4[%c0_62, %c0_63, %c0_64] : memref<1x128x512xf32, #tpu.memory_space<vmem>>, vector<1x128x512xf32>
    %142 = vector.shape_cast %141 : vector<1x128x512xf32> to vector<128x512xf32>
    %cst_65 = arith.constant dense<0.000000e+00> : vector<8x512xf32>
    %143 = tpu.matmul %140, %142, %cst_65 {dimension_numbers = #tpu.dot_dimension_numbers<[1], [0], [0], [1], [0, 0, 1, 1], [], []>} : vector<8x128xf32>, vector<128x512xf32>, vector<8x512xf32> -> vector<8x512xf32>
    %c1_66 = arith.constant 1 : index
    %c0_67 = arith.constant 0 : index
    %c0_68 = arith.constant 0 : index
    %144 = vector.load %arg3[%c1_66, %c0_67, %c0_68] : memref<2x128x512xf32, #tpu.memory_space<vmem>>, vector<1x128x512xf32>
    %145 = vector.shape_cast %144 : vector<1x128x512xf32> to vector<128x512xf32>
    %cst_69 = arith.constant dense<0.000000e+00> : vector<8x512xf32>
    %146 = tpu.matmul %115, %145, %cst_69 {dimension_numbers = #tpu.dot_dimension_numbers<[1], [0], [0], [1], [0, 0, 1, 1], [], []>} : vector<8x128xf32>, vector<128x512xf32>, vector<8x512xf32> -> vector<8x512xf32>
    %147 = arith.addf %143, %146 : vector<8x512xf32>
    %148 = arith.addf %147, %5 : vector<8x512xf32>
    %149 = vector.extract_strided_slice %148 {offsets = [0, 0], sizes = [8, 384], strides = [1, 1]} : vector<8x512xf32> to vector<8x384xf32>
    %cst_70 = arith.constant 5.000000e-01 : f32
    %150 = vector.broadcast %cst_70 : f32 to vector<8x384xf32>
    %151 = arith.mulf %150, %149 : vector<8x384xf32>
    %152 = math.tanh %151 : vector<8x384xf32>
    %cst_71 = arith.constant 5.000000e-01 : f32
    %153 = vector.broadcast %cst_71 : f32 to vector<8x384xf32>
    %154 = arith.mulf %153, %152 : vector<8x384xf32>
    %cst_72 = arith.constant 5.000000e-01 : f32
    %155 = vector.broadcast %cst_72 : f32 to vector<8x384xf32>
    %156 = arith.addf %154, %155 : vector<8x384xf32>
    %157 = vector.extract_strided_slice %156 {offsets = [0, 0], sizes = [8, 128], strides = [1, 1]} : vector<8x384xf32> to vector<8x128xf32>
    %158 = vector.extract_strided_slice %156 {offsets = [0, 128], sizes = [8, 128], strides = [1, 1]} : vector<8x384xf32> to vector<8x128xf32>
    %159 = vector.extract_strided_slice %156 {offsets = [0, 256], sizes = [8, 128], strides = [1, 1]} : vector<8x384xf32> to vector<8x128xf32>
    %160 = vector.extract_strided_slice %148 {offsets = [0, 384], sizes = [8, 128], strides = [1, 1]} : vector<8x512xf32> to vector<8x128xf32>
    %161 = math.tanh %160 : vector<8x128xf32>
    %162 = arith.mulf %158, %113 : vector<8x128xf32>
    %163 = arith.mulf %157, %161 : vector<8x128xf32>
    %164 = arith.addf %162, %163 : vector<8x128xf32>
    %165 = math.tanh %164 : vector<8x128xf32>
    %166 = arith.mulf %159, %165 : vector<8x128xf32>
    %c3_i32 = arith.constant 3 : i32
    %167 = arith.index_cast %c3_i32 : i32 to index
    %c0_73 = arith.constant 0 : index
    %c0_74 = arith.constant 0 : index
    %168 = vector.load %arg2[%167, %c0_73, %c0_74] : memref<8x8x512xf32, #tpu.memory_space<vmem>>, vector<1x8x512xf32>
    %169 = vector.shape_cast %168 : vector<1x8x512xf32> to vector<8x512xf32>
    %c0_75 = arith.constant 0 : index
    %c0_76 = arith.constant 0 : index
    %c0_77 = arith.constant 0 : index
    %170 = vector.load %arg3[%c0_75, %c0_76, %c0_77] : memref<2x128x512xf32, #tpu.memory_space<vmem>>, vector<1x128x512xf32>
    %171 = vector.shape_cast %170 : vector<1x128x512xf32> to vector<128x512xf32>
    %cst_78 = arith.constant dense<0.000000e+00> : vector<8x512xf32>
    %172 = tpu.matmul %140, %171, %cst_78 {dimension_numbers = #tpu.dot_dimension_numbers<[1], [0], [0], [1], [0, 0, 1, 1], [], []>} : vector<8x128xf32>, vector<128x512xf32>, vector<8x512xf32> -> vector<8x512xf32>
    %173 = arith.addf %169, %172 : vector<8x512xf32>
    %174 = vector.extract_strided_slice %173 {offsets = [0, 0], sizes = [8, 384], strides = [1, 1]} : vector<8x512xf32> to vector<8x384xf32>
    %cst_79 = arith.constant 5.000000e-01 : f32
    %175 = vector.broadcast %cst_79 : f32 to vector<8x384xf32>
    %176 = arith.mulf %175, %174 : vector<8x384xf32>
    %177 = math.tanh %176 : vector<8x384xf32>
    %cst_80 = arith.constant 5.000000e-01 : f32
    %178 = vector.broadcast %cst_80 : f32 to vector<8x384xf32>
    %179 = arith.mulf %178, %177 : vector<8x384xf32>
    %cst_81 = arith.constant 5.000000e-01 : f32
    %180 = vector.broadcast %cst_81 : f32 to vector<8x384xf32>
    %181 = arith.addf %179, %180 : vector<8x384xf32>
    %182 = vector.extract_strided_slice %181 {offsets = [0, 0], sizes = [8, 128], strides = [1, 1]} : vector<8x384xf32> to vector<8x128xf32>
    %183 = vector.extract_strided_slice %181 {offsets = [0, 128], sizes = [8, 128], strides = [1, 1]} : vector<8x384xf32> to vector<8x128xf32>
    %184 = vector.extract_strided_slice %181 {offsets = [0, 256], sizes = [8, 128], strides = [1, 1]} : vector<8x384xf32> to vector<8x128xf32>
    %185 = vector.extract_strided_slice %173 {offsets = [0, 384], sizes = [8, 128], strides = [1, 1]} : vector<8x512xf32> to vector<8x128xf32>
    %186 = math.tanh %185 : vector<8x128xf32>
    %187 = arith.mulf %183, %138 : vector<8x128xf32>
    %188 = arith.mulf %182, %186 : vector<8x128xf32>
    %189 = arith.addf %187, %188 : vector<8x128xf32>
    %190 = math.tanh %189 : vector<8x128xf32>
    %191 = arith.mulf %184, %190 : vector<8x128xf32>
    %c0_82 = arith.constant 0 : index
    %c0_83 = arith.constant 0 : index
    %c0_84 = arith.constant 0 : index
    %192 = vector.load %arg4[%c0_82, %c0_83, %c0_84] : memref<1x128x512xf32, #tpu.memory_space<vmem>>, vector<1x128x512xf32>
    %193 = vector.shape_cast %192 : vector<1x128x512xf32> to vector<128x512xf32>
    %cst_85 = arith.constant dense<0.000000e+00> : vector<8x512xf32>
    %194 = tpu.matmul %191, %193, %cst_85 {dimension_numbers = #tpu.dot_dimension_numbers<[1], [0], [0], [1], [0, 0, 1, 1], [], []>} : vector<8x128xf32>, vector<128x512xf32>, vector<8x512xf32> -> vector<8x512xf32>
    %c1_86 = arith.constant 1 : index
    %c0_87 = arith.constant 0 : index
    %c0_88 = arith.constant 0 : index
    %195 = vector.load %arg3[%c1_86, %c0_87, %c0_88] : memref<2x128x512xf32, #tpu.memory_space<vmem>>, vector<1x128x512xf32>
    %196 = vector.shape_cast %195 : vector<1x128x512xf32> to vector<128x512xf32>
    %cst_89 = arith.constant dense<0.000000e+00> : vector<8x512xf32>
    %197 = tpu.matmul %166, %196, %cst_89 {dimension_numbers = #tpu.dot_dimension_numbers<[1], [0], [0], [1], [0, 0, 1, 1], [], []>} : vector<8x128xf32>, vector<128x512xf32>, vector<8x512xf32> -> vector<8x512xf32>
    %198 = arith.addf %194, %197 : vector<8x512xf32>
    %199 = arith.addf %198, %5 : vector<8x512xf32>
    %200 = vector.extract_strided_slice %199 {offsets = [0, 0], sizes = [8, 384], strides = [1, 1]} : vector<8x512xf32> to vector<8x384xf32>
    %cst_90 = arith.constant 5.000000e-01 : f32
    %201 = vector.broadcast %cst_90 : f32 to vector<8x384xf32>
    %202 = arith.mulf %201, %200 : vector<8x384xf32>
    %203 = math.tanh %202 : vector<8x384xf32>
    %cst_91 = arith.constant 5.000000e-01 : f32
    %204 = vector.broadcast %cst_91 : f32 to vector<8x384xf32>
    %205 = arith.mulf %204, %203 : vector<8x384xf32>
    %cst_92 = arith.constant 5.000000e-01 : f32
    %206 = vector.broadcast %cst_92 : f32 to vector<8x384xf32>
    %207 = arith.addf %205, %206 : vector<8x384xf32>
    %208 = vector.extract_strided_slice %207 {offsets = [0, 0], sizes = [8, 128], strides = [1, 1]} : vector<8x384xf32> to vector<8x128xf32>
    %209 = vector.extract_strided_slice %207 {offsets = [0, 128], sizes = [8, 128], strides = [1, 1]} : vector<8x384xf32> to vector<8x128xf32>
    %210 = vector.extract_strided_slice %207 {offsets = [0, 256], sizes = [8, 128], strides = [1, 1]} : vector<8x384xf32> to vector<8x128xf32>
    %211 = vector.extract_strided_slice %199 {offsets = [0, 384], sizes = [8, 128], strides = [1, 1]} : vector<8x512xf32> to vector<8x128xf32>
    %212 = math.tanh %211 : vector<8x128xf32>
    %213 = arith.mulf %209, %164 : vector<8x128xf32>
    %214 = arith.mulf %208, %212 : vector<8x128xf32>
    %215 = arith.addf %213, %214 : vector<8x128xf32>
    %216 = math.tanh %215 : vector<8x128xf32>
    %217 = arith.mulf %210, %216 : vector<8x128xf32>
    %c4_i32 = arith.constant 4 : i32
    %218 = arith.index_cast %c4_i32 : i32 to index
    %c0_93 = arith.constant 0 : index
    %c0_94 = arith.constant 0 : index
    %219 = vector.load %arg2[%218, %c0_93, %c0_94] : memref<8x8x512xf32, #tpu.memory_space<vmem>>, vector<1x8x512xf32>
    %220 = vector.shape_cast %219 : vector<1x8x512xf32> to vector<8x512xf32>
    %c0_95 = arith.constant 0 : index
    %c0_96 = arith.constant 0 : index
    %c0_97 = arith.constant 0 : index
    %221 = vector.load %arg3[%c0_95, %c0_96, %c0_97] : memref<2x128x512xf32, #tpu.memory_space<vmem>>, vector<1x128x512xf32>
    %222 = vector.shape_cast %221 : vector<1x128x512xf32> to vector<128x512xf32>
    %cst_98 = arith.constant dense<0.000000e+00> : vector<8x512xf32>
    %223 = tpu.matmul %191, %222, %cst_98 {dimension_numbers = #tpu.dot_dimension_numbers<[1], [0], [0], [1], [0, 0, 1, 1], [], []>} : vector<8x128xf32>, vector<128x512xf32>, vector<8x512xf32> -> vector<8x512xf32>
    %224 = arith.addf %220, %223 : vector<8x512xf32>
    %225 = vector.extract_strided_slice %224 {offsets = [0, 0], sizes = [8, 384], strides = [1, 1]} : vector<8x512xf32> to vector<8x384xf32>
    %cst_99 = arith.constant 5.000000e-01 : f32
    %226 = vector.broadcast %cst_99 : f32 to vector<8x384xf32>
    %227 = arith.mulf %226, %225 : vector<8x384xf32>
    %228 = math.tanh %227 : vector<8x384xf32>
    %cst_100 = arith.constant 5.000000e-01 : f32
    %229 = vector.broadcast %cst_100 : f32 to vector<8x384xf32>
    %230 = arith.mulf %229, %228 : vector<8x384xf32>
    %cst_101 = arith.constant 5.000000e-01 : f32
    %231 = vector.broadcast %cst_101 : f32 to vector<8x384xf32>
    %232 = arith.addf %230, %231 : vector<8x384xf32>
    %233 = vector.extract_strided_slice %232 {offsets = [0, 0], sizes = [8, 128], strides = [1, 1]} : vector<8x384xf32> to vector<8x128xf32>
    %234 = vector.extract_strided_slice %232 {offsets = [0, 128], sizes = [8, 128], strides = [1, 1]} : vector<8x384xf32> to vector<8x128xf32>
    %235 = vector.extract_strided_slice %232 {offsets = [0, 256], sizes = [8, 128], strides = [1, 1]} : vector<8x384xf32> to vector<8x128xf32>
    %236 = vector.extract_strided_slice %224 {offsets = [0, 384], sizes = [8, 128], strides = [1, 1]} : vector<8x512xf32> to vector<8x128xf32>
    %237 = math.tanh %236 : vector<8x128xf32>
    %238 = arith.mulf %234, %189 : vector<8x128xf32>
    %239 = arith.mulf %233, %237 : vector<8x128xf32>
    %240 = arith.addf %238, %239 : vector<8x128xf32>
    %241 = math.tanh %240 : vector<8x128xf32>
    %242 = arith.mulf %235, %241 : vector<8x128xf32>
    %c0_102 = arith.constant 0 : index
    %c0_103 = arith.constant 0 : index
    %c0_104 = arith.constant 0 : index
    %243 = vector.load %arg4[%c0_102, %c0_103, %c0_104] : memref<1x128x512xf32, #tpu.memory_space<vmem>>, vector<1x128x512xf32>
    %244 = vector.shape_cast %243 : vector<1x128x512xf32> to vector<128x512xf32>
    %cst_105 = arith.constant dense<0.000000e+00> : vector<8x512xf32>
    %245 = tpu.matmul %242, %244, %cst_105 {dimension_numbers = #tpu.dot_dimension_numbers<[1], [0], [0], [1], [0, 0, 1, 1], [], []>} : vector<8x128xf32>, vector<128x512xf32>, vector<8x512xf32> -> vector<8x512xf32>
    %c1_106 = arith.constant 1 : index
    %c0_107 = arith.constant 0 : index
    %c0_108 = arith.constant 0 : index
    %246 = vector.load %arg3[%c1_106, %c0_107, %c0_108] : memref<2x128x512xf32, #tpu.memory_space<vmem>>, vector<1x128x512xf32>
    %247 = vector.shape_cast %246 : vector<1x128x512xf32> to vector<128x512xf32>
    %cst_109 = arith.constant dense<0.000000e+00> : vector<8x512xf32>
    %248 = tpu.matmul %217, %247, %cst_109 {dimension_numbers = #tpu.dot_dimension_numbers<[1], [0], [0], [1], [0, 0, 1, 1], [], []>} : vector<8x128xf32>, vector<128x512xf32>, vector<8x512xf32> -> vector<8x512xf32>
    %249 = arith.addf %245, %248 : vector<8x512xf32>
    %250 = arith.addf %249, %5 : vector<8x512xf32>
    %251 = vector.extract_strided_slice %250 {offsets = [0, 0], sizes = [8, 384], strides = [1, 1]} : vector<8x512xf32> to vector<8x384xf32>
    %cst_110 = arith.constant 5.000000e-01 : f32
    %252 = vector.broadcast %cst_110 : f32 to vector<8x384xf32>
    %253 = arith.mulf %252, %251 : vector<8x384xf32>
    %254 = math.tanh %253 : vector<8x384xf32>
    %cst_111 = arith.constant 5.000000e-01 : f32
    %255 = vector.broadcast %cst_111 : f32 to vector<8x384xf32>
    %256 = arith.mulf %255, %254 : vector<8x384xf32>
    %cst_112 = arith.constant 5.000000e-01 : f32
    %257 = vector.broadcast %cst_112 : f32 to vector<8x384xf32>
    %258 = arith.addf %256, %257 : vector<8x384xf32>
    %259 = vector.extract_strided_slice %258 {offsets = [0, 0], sizes = [8, 128], strides = [1, 1]} : vector<8x384xf32> to vector<8x128xf32>
    %260 = vector.extract_strided_slice %258 {offsets = [0, 128], sizes = [8, 128], strides = [1, 1]} : vector<8x384xf32> to vector<8x128xf32>
    %261 = vector.extract_strided_slice %258 {offsets = [0, 256], sizes = [8, 128], strides = [1, 1]} : vector<8x384xf32> to vector<8x128xf32>
    %262 = vector.extract_strided_slice %250 {offsets = [0, 384], sizes = [8, 128], strides = [1, 1]} : vector<8x512xf32> to vector<8x128xf32>
    %263 = math.tanh %262 : vector<8x128xf32>
    %264 = arith.mulf %260, %215 : vector<8x128xf32>
    %265 = arith.mulf %259, %263 : vector<8x128xf32>
    %266 = arith.addf %264, %265 : vector<8x128xf32>
    %267 = math.tanh %266 : vector<8x128xf32>
    %268 = arith.mulf %261, %267 : vector<8x128xf32>
    %c5_i32 = arith.constant 5 : i32
    %269 = arith.index_cast %c5_i32 : i32 to index
    %c0_113 = arith.constant 0 : index
    %c0_114 = arith.constant 0 : index
    %270 = vector.load %arg2[%269, %c0_113, %c0_114] : memref<8x8x512xf32, #tpu.memory_space<vmem>>, vector<1x8x512xf32>
    %271 = vector.shape_cast %270 : vector<1x8x512xf32> to vector<8x512xf32>
    %c0_115 = arith.constant 0 : index
    %c0_116 = arith.constant 0 : index
    %c0_117 = arith.constant 0 : index
    %272 = vector.load %arg3[%c0_115, %c0_116, %c0_117] : memref<2x128x512xf32, #tpu.memory_space<vmem>>, vector<1x128x512xf32>
    %273 = vector.shape_cast %272 : vector<1x128x512xf32> to vector<128x512xf32>
    %cst_118 = arith.constant dense<0.000000e+00> : vector<8x512xf32>
    %274 = tpu.matmul %242, %273, %cst_118 {dimension_numbers = #tpu.dot_dimension_numbers<[1], [0], [0], [1], [0, 0, 1, 1], [], []>} : vector<8x128xf32>, vector<128x512xf32>, vector<8x512xf32> -> vector<8x512xf32>
    %275 = arith.addf %271, %274 : vector<8x512xf32>
    %276 = vector.extract_strided_slice %275 {offsets = [0, 0], sizes = [8, 384], strides = [1, 1]} : vector<8x512xf32> to vector<8x384xf32>
    %cst_119 = arith.constant 5.000000e-01 : f32
    %277 = vector.broadcast %cst_119 : f32 to vector<8x384xf32>
    %278 = arith.mulf %277, %276 : vector<8x384xf32>
    %279 = math.tanh %278 : vector<8x384xf32>
    %cst_120 = arith.constant 5.000000e-01 : f32
    %280 = vector.broadcast %cst_120 : f32 to vector<8x384xf32>
    %281 = arith.mulf %280, %279 : vector<8x384xf32>
    %cst_121 = arith.constant 5.000000e-01 : f32
    %282 = vector.broadcast %cst_121 : f32 to vector<8x384xf32>
    %283 = arith.addf %281, %282 : vector<8x384xf32>
    %284 = vector.extract_strided_slice %283 {offsets = [0, 0], sizes = [8, 128], strides = [1, 1]} : vector<8x384xf32> to vector<8x128xf32>
    %285 = vector.extract_strided_slice %283 {offsets = [0, 128], sizes = [8, 128], strides = [1, 1]} : vector<8x384xf32> to vector<8x128xf32>
    %286 = vector.extract_strided_slice %283 {offsets = [0, 256], sizes = [8, 128], strides = [1, 1]} : vector<8x384xf32> to vector<8x128xf32>
    %287 = vector.extract_strided_slice %275 {offsets = [0, 384], sizes = [8, 128], strides = [1, 1]} : vector<8x512xf32> to vector<8x128xf32>
    %288 = math.tanh %287 : vector<8x128xf32>
    %289 = arith.mulf %285, %240 : vector<8x128xf32>
    %290 = arith.mulf %284, %288 : vector<8x128xf32>
    %291 = arith.addf %289, %290 : vector<8x128xf32>
    %292 = math.tanh %291 : vector<8x128xf32>
    %293 = arith.mulf %286, %292 : vector<8x128xf32>
    %c0_122 = arith.constant 0 : index
    %c0_123 = arith.constant 0 : index
    %c0_124 = arith.constant 0 : index
    %294 = vector.load %arg4[%c0_122, %c0_123, %c0_124] : memref<1x128x512xf32, #tpu.memory_space<vmem>>, vector<1x128x512xf32>
    %295 = vector.shape_cast %294 : vector<1x128x512xf32> to vector<128x512xf32>
    %cst_125 = arith.constant dense<0.000000e+00> : vector<8x512xf32>
    %296 = tpu.matmul %293, %295, %cst_125 {dimension_numbers = #tpu.dot_dimension_numbers<[1], [0], [0], [1], [0, 0, 1, 1], [], []>} : vector<8x128xf32>, vector<128x512xf32>, vector<8x512xf32> -> vector<8x512xf32>
    %c1_126 = arith.constant 1 : index
    %c0_127 = arith.constant 0 : index
    %c0_128 = arith.constant 0 : index
    %297 = vector.load %arg3[%c1_126, %c0_127, %c0_128] : memref<2x128x512xf32, #tpu.memory_space<vmem>>, vector<1x128x512xf32>
    %298 = vector.shape_cast %297 : vector<1x128x512xf32> to vector<128x512xf32>
    %cst_129 = arith.constant dense<0.000000e+00> : vector<8x512xf32>
    %299 = tpu.matmul %268, %298, %cst_129 {dimension_numbers = #tpu.dot_dimension_numbers<[1], [0], [0], [1], [0, 0, 1, 1], [], []>} : vector<8x128xf32>, vector<128x512xf32>, vector<8x512xf32> -> vector<8x512xf32>
    %300 = arith.addf %296, %299 : vector<8x512xf32>
    %301 = arith.addf %300, %5 : vector<8x512xf32>
    %302 = vector.extract_strided_slice %301 {offsets = [0, 0], sizes = [8, 384], strides = [1, 1]} : vector<8x512xf32> to vector<8x384xf32>
    %cst_130 = arith.constant 5.000000e-01 : f32
    %303 = vector.broadcast %cst_130 : f32 to vector<8x384xf32>
    %304 = arith.mulf %303, %302 : vector<8x384xf32>
    %305 = math.tanh %304 : vector<8x384xf32>
    %cst_131 = arith.constant 5.000000e-01 : f32
    %306 = vector.broadcast %cst_131 : f32 to vector<8x384xf32>
    %307 = arith.mulf %306, %305 : vector<8x384xf32>
    %cst_132 = arith.constant 5.000000e-01 : f32
    %308 = vector.broadcast %cst_132 : f32 to vector<8x384xf32>
    %309 = arith.addf %307, %308 : vector<8x384xf32>
    %310 = vector.extract_strided_slice %309 {offsets = [0, 0], sizes = [8, 128], strides = [1, 1]} : vector<8x384xf32> to vector<8x128xf32>
    %311 = vector.extract_strided_slice %309 {offsets = [0, 128], sizes = [8, 128], strides = [1, 1]} : vector<8x384xf32> to vector<8x128xf32>
    %312 = vector.extract_strided_slice %309 {offsets = [0, 256], sizes = [8, 128], strides = [1, 1]} : vector<8x384xf32> to vector<8x128xf32>
    %313 = vector.extract_strided_slice %301 {offsets = [0, 384], sizes = [8, 128], strides = [1, 1]} : vector<8x512xf32> to vector<8x128xf32>
    %314 = math.tanh %313 : vector<8x128xf32>
    %315 = arith.mulf %311, %266 : vector<8x128xf32>
    %316 = arith.mulf %310, %314 : vector<8x128xf32>
    %317 = arith.addf %315, %316 : vector<8x128xf32>
    %318 = math.tanh %317 : vector<8x128xf32>
    %319 = arith.mulf %312, %318 : vector<8x128xf32>
    %c6_i32 = arith.constant 6 : i32
    %320 = arith.index_cast %c6_i32 : i32 to index
    %c0_133 = arith.constant 0 : index
    %c0_134 = arith.constant 0 : index
    %321 = vector.load %arg2[%320, %c0_133, %c0_134] : memref<8x8x512xf32, #tpu.memory_space<vmem>>, vector<1x8x512xf32>
    %322 = vector.shape_cast %321 : vector<1x8x512xf32> to vector<8x512xf32>
    %c0_135 = arith.constant 0 : index
    %c0_136 = arith.constant 0 : index
    %c0_137 = arith.constant 0 : index
    %323 = vector.load %arg3[%c0_135, %c0_136, %c0_137] : memref<2x128x512xf32, #tpu.memory_space<vmem>>, vector<1x128x512xf32>
    %324 = vector.shape_cast %323 : vector<1x128x512xf32> to vector<128x512xf32>
    %cst_138 = arith.constant dense<0.000000e+00> : vector<8x512xf32>
    %325 = tpu.matmul %293, %324, %cst_138 {dimension_numbers = #tpu.dot_dimension_numbers<[1], [0], [0], [1], [0, 0, 1, 1], [], []>} : vector<8x128xf32>, vector<128x512xf32>, vector<8x512xf32> -> vector<8x512xf32>
    %326 = arith.addf %322, %325 : vector<8x512xf32>
    %327 = vector.extract_strided_slice %326 {offsets = [0, 0], sizes = [8, 384], strides = [1, 1]} : vector<8x512xf32> to vector<8x384xf32>
    %cst_139 = arith.constant 5.000000e-01 : f32
    %328 = vector.broadcast %cst_139 : f32 to vector<8x384xf32>
    %329 = arith.mulf %328, %327 : vector<8x384xf32>
    %330 = math.tanh %329 : vector<8x384xf32>
    %cst_140 = arith.constant 5.000000e-01 : f32
    %331 = vector.broadcast %cst_140 : f32 to vector<8x384xf32>
    %332 = arith.mulf %331, %330 : vector<8x384xf32>
    %cst_141 = arith.constant 5.000000e-01 : f32
    %333 = vector.broadcast %cst_141 : f32 to vector<8x384xf32>
    %334 = arith.addf %332, %333 : vector<8x384xf32>
    %335 = vector.extract_strided_slice %334 {offsets = [0, 0], sizes = [8, 128], strides = [1, 1]} : vector<8x384xf32> to vector<8x128xf32>
    %336 = vector.extract_strided_slice %334 {offsets = [0, 128], sizes = [8, 128], strides = [1, 1]} : vector<8x384xf32> to vector<8x128xf32>
    %337 = vector.extract_strided_slice %334 {offsets = [0, 256], sizes = [8, 128], strides = [1, 1]} : vector<8x384xf32> to vector<8x128xf32>
    %338 = vector.extract_strided_slice %326 {offsets = [0, 384], sizes = [8, 128], strides = [1, 1]} : vector<8x512xf32> to vector<8x128xf32>
    %339 = math.tanh %338 : vector<8x128xf32>
    %340 = arith.mulf %336, %291 : vector<8x128xf32>
    %341 = arith.mulf %335, %339 : vector<8x128xf32>
    %342 = arith.addf %340, %341 : vector<8x128xf32>
    %343 = math.tanh %342 : vector<8x128xf32>
    %344 = arith.mulf %337, %343 : vector<8x128xf32>
    %c0_142 = arith.constant 0 : index
    %c0_143 = arith.constant 0 : index
    %c0_144 = arith.constant 0 : index
    %345 = vector.load %arg4[%c0_142, %c0_143, %c0_144] : memref<1x128x512xf32, #tpu.memory_space<vmem>>, vector<1x128x512xf32>
    %346 = vector.shape_cast %345 : vector<1x128x512xf32> to vector<128x512xf32>
    %cst_145 = arith.constant dense<0.000000e+00> : vector<8x512xf32>
    %347 = tpu.matmul %344, %346, %cst_145 {dimension_numbers = #tpu.dot_dimension_numbers<[1], [0], [0], [1], [0, 0, 1, 1], [], []>} : vector<8x128xf32>, vector<128x512xf32>, vector<8x512xf32> -> vector<8x512xf32>
    %c1_146 = arith.constant 1 : index
    %c0_147 = arith.constant 0 : index
    %c0_148 = arith.constant 0 : index
    %348 = vector.load %arg3[%c1_146, %c0_147, %c0_148] : memref<2x128x512xf32, #tpu.memory_space<vmem>>, vector<1x128x512xf32>
    %349 = vector.shape_cast %348 : vector<1x128x512xf32> to vector<128x512xf32>
    %cst_149 = arith.constant dense<0.000000e+00> : vector<8x512xf32>
    %350 = tpu.matmul %319, %349, %cst_149 {dimension_numbers = #tpu.dot_dimension_numbers<[1], [0], [0], [1], [0, 0, 1, 1], [], []>} : vector<8x128xf32>, vector<128x512xf32>, vector<8x512xf32> -> vector<8x512xf32>
    %351 = arith.addf %347, %350 : vector<8x512xf32>
    %352 = arith.addf %351, %5 : vector<8x512xf32>
    %353 = vector.extract_strided_slice %352 {offsets = [0, 0], sizes = [8, 384], strides = [1, 1]} : vector<8x512xf32> to vector<8x384xf32>
    %cst_150 = arith.constant 5.000000e-01 : f32
    %354 = vector.broadcast %cst_150 : f32 to vector<8x384xf32>
    %355 = arith.mulf %354, %353 : vector<8x384xf32>
    %356 = math.tanh %355 : vector<8x384xf32>
    %cst_151 = arith.constant 5.000000e-01 : f32
    %357 = vector.broadcast %cst_151 : f32 to vector<8x384xf32>
    %358 = arith.mulf %357, %356 : vector<8x384xf32>
    %cst_152 = arith.constant 5.000000e-01 : f32
    %359 = vector.broadcast %cst_152 : f32 to vector<8x384xf32>
    %360 = arith.addf %358, %359 : vector<8x384xf32>
    %361 = vector.extract_strided_slice %360 {offsets = [0, 0], sizes = [8, 128], strides = [1, 1]} : vector<8x384xf32> to vector<8x128xf32>
    %362 = vector.extract_strided_slice %360 {offsets = [0, 128], sizes = [8, 128], strides = [1, 1]} : vector<8x384xf32> to vector<8x128xf32>
    %363 = vector.extract_strided_slice %360 {offsets = [0, 256], sizes = [8, 128], strides = [1, 1]} : vector<8x384xf32> to vector<8x128xf32>
    %364 = vector.extract_strided_slice %352 {offsets = [0, 384], sizes = [8, 128], strides = [1, 1]} : vector<8x512xf32> to vector<8x128xf32>
    %365 = math.tanh %364 : vector<8x128xf32>
    %366 = arith.mulf %362, %317 : vector<8x128xf32>
    %367 = arith.mulf %361, %365 : vector<8x128xf32>
    %368 = arith.addf %366, %367 : vector<8x128xf32>
    %369 = math.tanh %368 : vector<8x128xf32>
    %370 = arith.mulf %363, %369 : vector<8x128xf32>
    %c7_i32 = arith.constant 7 : i32
    %371 = arith.index_cast %c7_i32 : i32 to index
    %c0_153 = arith.constant 0 : index
    %c0_154 = arith.constant 0 : index
    %372 = vector.load %arg2[%371, %c0_153, %c0_154] : memref<8x8x512xf32, #tpu.memory_space<vmem>>, vector<1x8x512xf32>
    %373 = vector.shape_cast %372 : vector<1x8x512xf32> to vector<8x512xf32>
    %c0_155 = arith.constant 0 : index
    %c0_156 = arith.constant 0 : index
    %c0_157 = arith.constant 0 : index
    %374 = vector.load %arg3[%c0_155, %c0_156, %c0_157] : memref<2x128x512xf32, #tpu.memory_space<vmem>>, vector<1x128x512xf32>
    %375 = vector.shape_cast %374 : vector<1x128x512xf32> to vector<128x512xf32>
    %cst_158 = arith.constant dense<0.000000e+00> : vector<8x512xf32>
    %376 = tpu.matmul %344, %375, %cst_158 {dimension_numbers = #tpu.dot_dimension_numbers<[1], [0], [0], [1], [0, 0, 1, 1], [], []>} : vector<8x128xf32>, vector<128x512xf32>, vector<8x512xf32> -> vector<8x512xf32>
    %377 = arith.addf %373, %376 : vector<8x512xf32>
    %378 = vector.extract_strided_slice %377 {offsets = [0, 0], sizes = [8, 384], strides = [1, 1]} : vector<8x512xf32> to vector<8x384xf32>
    %cst_159 = arith.constant 5.000000e-01 : f32
    %379 = vector.broadcast %cst_159 : f32 to vector<8x384xf32>
    %380 = arith.mulf %379, %378 : vector<8x384xf32>
    %381 = math.tanh %380 : vector<8x384xf32>
    %cst_160 = arith.constant 5.000000e-01 : f32
    %382 = vector.broadcast %cst_160 : f32 to vector<8x384xf32>
    %383 = arith.mulf %382, %381 : vector<8x384xf32>
    %cst_161 = arith.constant 5.000000e-01 : f32
    %384 = vector.broadcast %cst_161 : f32 to vector<8x384xf32>
    %385 = arith.addf %383, %384 : vector<8x384xf32>
    %386 = vector.extract_strided_slice %385 {offsets = [0, 0], sizes = [8, 128], strides = [1, 1]} : vector<8x384xf32> to vector<8x128xf32>
    %387 = vector.extract_strided_slice %385 {offsets = [0, 128], sizes = [8, 128], strides = [1, 1]} : vector<8x384xf32> to vector<8x128xf32>
    %388 = vector.extract_strided_slice %385 {offsets = [0, 256], sizes = [8, 128], strides = [1, 1]} : vector<8x384xf32> to vector<8x128xf32>
    %389 = vector.extract_strided_slice %377 {offsets = [0, 384], sizes = [8, 128], strides = [1, 1]} : vector<8x512xf32> to vector<8x128xf32>
    %390 = math.tanh %389 : vector<8x128xf32>
    %391 = arith.mulf %387, %342 : vector<8x128xf32>
    %392 = arith.mulf %386, %390 : vector<8x128xf32>
    %393 = arith.addf %391, %392 : vector<8x128xf32>
    %394 = math.tanh %393 : vector<8x128xf32>
    %395 = arith.mulf %388, %394 : vector<8x128xf32>
    %c0_162 = arith.constant 0 : index
    %c0_163 = arith.constant 0 : index
    %c0_164 = arith.constant 0 : index
    %396 = vector.load %arg4[%c0_162, %c0_163, %c0_164] : memref<1x128x512xf32, #tpu.memory_space<vmem>>, vector<1x128x512xf32>
    %397 = vector.shape_cast %396 : vector<1x128x512xf32> to vector<128x512xf32>
    %cst_165 = arith.constant dense<0.000000e+00> : vector<8x512xf32>
    %398 = tpu.matmul %395, %397, %cst_165 {dimension_numbers = #tpu.dot_dimension_numbers<[1], [0], [0], [1], [0, 0, 1, 1], [], []>} : vector<8x128xf32>, vector<128x512xf32>, vector<8x512xf32> -> vector<8x512xf32>
    %c1_166 = arith.constant 1 : index
    %c0_167 = arith.constant 0 : index
    %c0_168 = arith.constant 0 : index
    %399 = vector.load %arg3[%c1_166, %c0_167, %c0_168] : memref<2x128x512xf32, #tpu.memory_space<vmem>>, vector<1x128x512xf32>
    %400 = vector.shape_cast %399 : vector<1x128x512xf32> to vector<128x512xf32>
    %cst_169 = arith.constant dense<0.000000e+00> : vector<8x512xf32>
    %401 = tpu.matmul %370, %400, %cst_169 {dimension_numbers = #tpu.dot_dimension_numbers<[1], [0], [0], [1], [0, 0, 1, 1], [], []>} : vector<8x128xf32>, vector<128x512xf32>, vector<8x512xf32> -> vector<8x512xf32>
    %402 = arith.addf %398, %401 : vector<8x512xf32>
    %403 = arith.addf %402, %5 : vector<8x512xf32>
    %404 = vector.extract_strided_slice %403 {offsets = [0, 0], sizes = [8, 384], strides = [1, 1]} : vector<8x512xf32> to vector<8x384xf32>
    %cst_170 = arith.constant 5.000000e-01 : f32
    %405 = vector.broadcast %cst_170 : f32 to vector<8x384xf32>
    %406 = arith.mulf %405, %404 : vector<8x384xf32>
    %407 = math.tanh %406 : vector<8x384xf32>
    %cst_171 = arith.constant 5.000000e-01 : f32
    %408 = vector.broadcast %cst_171 : f32 to vector<8x384xf32>
    %409 = arith.mulf %408, %407 : vector<8x384xf32>
    %cst_172 = arith.constant 5.000000e-01 : f32
    %410 = vector.broadcast %cst_172 : f32 to vector<8x384xf32>
    %411 = arith.addf %409, %410 : vector<8x384xf32>
    %412 = vector.extract_strided_slice %411 {offsets = [0, 0], sizes = [8, 128], strides = [1, 1]} : vector<8x384xf32> to vector<8x128xf32>
    %413 = vector.extract_strided_slice %411 {offsets = [0, 128], sizes = [8, 128], strides = [1, 1]} : vector<8x384xf32> to vector<8x128xf32>
    %414 = vector.extract_strided_slice %411 {offsets = [0, 256], sizes = [8, 128], strides = [1, 1]} : vector<8x384xf32> to vector<8x128xf32>
    %415 = vector.extract_strided_slice %403 {offsets = [0, 384], sizes = [8, 128], strides = [1, 1]} : vector<8x512xf32> to vector<8x128xf32>
    %416 = math.tanh %415 : vector<8x128xf32>
    %417 = arith.mulf %413, %368 : vector<8x128xf32>
    %418 = arith.mulf %412, %416 : vector<8x128xf32>
    %419 = arith.addf %417, %418 : vector<8x128xf32>
    %420 = math.tanh %419 : vector<8x128xf32>
    %421 = arith.mulf %414, %420 : vector<8x128xf32>
    %c8_i32 = arith.constant 8 : i32
    %c0_173 = arith.constant 0 : index
    %c0_174 = arith.constant 0 : index
    %c0_175 = arith.constant 0 : index
    %422 = vector.load %arg6[%c0_173, %c0_174, %c0_175] : memref<2x8x128xf32, #tpu.memory_space<vmem>>, vector<1x8x128xf32>
    %423 = vector.shape_cast %422 : vector<1x8x128xf32> to vector<8x128xf32>
    %424 = vector.shape_cast %395 : vector<8x128xf32> to vector<1x8x128xf32>
    tpu.vector_store %arg6[%c0_173, %c0_174, %c0_175], %424 {strides = array<i32>} : memref<2x8x128xf32, #tpu.memory_space<vmem>>, vector<1x8x128xf32>,
    %c0_176 = arith.constant 0 : index
    %c0_177 = arith.constant 0 : index
    %c0_178 = arith.constant 0 : index
    %425 = vector.load %arg7[%c0_176, %c0_177, %c0_178] : memref<2x8x128xf32, #tpu.memory_space<vmem>>, vector<1x8x128xf32>
    %426 = vector.shape_cast %425 : vector<1x8x128xf32> to vector<8x128xf32>
    %427 = vector.shape_cast %393 : vector<8x128xf32> to vector<1x8x128xf32>
    tpu.vector_store %arg7[%c0_176, %c0_177, %c0_178], %427 {strides = array<i32>} : memref<2x8x128xf32, #tpu.memory_space<vmem>>, vector<1x8x128xf32>,
    %c1_179 = arith.constant 1 : index
    %c0_180 = arith.constant 0 : index
    %c0_181 = arith.constant 0 : index
    %428 = vector.load %arg6[%c1_179, %c0_180, %c0_181] : memref<2x8x128xf32, #tpu.memory_space<vmem>>, vector<1x8x128xf32>
    %429 = vector.shape_cast %428 : vector<1x8x128xf32> to vector<8x128xf32>
    %430 = vector.shape_cast %421 : vector<8x128xf32> to vector<1x8x128xf32>
    tpu.vector_store %arg6[%c1_179, %c0_180, %c0_181], %430 {strides = array<i32>} : memref<2x8x128xf32, #tpu.memory_space<vmem>>, vector<1x8x128xf32>,
    %c1_182 = arith.constant 1 : index
    %c0_183 = arith.constant 0 : index
    %c0_184 = arith.constant 0 : index
    %431 = vector.load %arg7[%c1_182, %c0_183, %c0_184] : memref<2x8x128xf32, #tpu.memory_space<vmem>>, vector<1x8x128xf32>
    %432 = vector.shape_cast %431 : vector<1x8x128xf32> to vector<8x128xf32>
    %433 = vector.shape_cast %419 : vector<8x128xf32> to vector<1x8x128xf32>
    tpu.vector_store %arg7[%c1_182, %c0_183, %c0_184], %433 {strides = array<i32>} : memref<2x8x128xf32, #tpu.memory_space<vmem>>, vector<1x8x128xf32>,
    return
  }
  func.func @transform_0(%arg0: i32, %arg1: i32) -> (i32, i32, i32) {
    %c0_i32 = arith.constant 0 : i32
    %c0_i32_0 = arith.constant 0 : i32
    return %arg1, %arg0, %c0_i32 : i32, i32, i32
  }
  func.func @transform_1(%arg0: i32, %arg1: i32) -> (i32, i32, i32) {
    %c0_i32 = arith.constant 0 : i32
    %c0_i32_0 = arith.constant 0 : i32
    %c0_i32_1 = arith.constant 0 : i32
    %c0_i32_2 = arith.constant 0 : i32
    return %c0_i32, %c0_i32_0, %c0_i32_1 : i32, i32, i32
  }
  func.func @transform_2(%arg0: i32, %arg1: i32) -> (i32, i32, i32) {
    %c0_i32 = arith.constant 0 : i32
    %c0_i32_0 = arith.constant 0 : i32
    %c0_i32_1 = arith.constant 0 : i32
    %c0_i32_2 = arith.constant 0 : i32
    return %c0_i32, %c0_i32_0, %c0_i32_1 : i32, i32, i32
  }
  func.func @transform_3(%arg0: i32, %arg1: i32) -> (i32, i32) {
    %c0_i32 = arith.constant 0 : i32
    %c0_i32_0 = arith.constant 0 : i32
    %c0_i32_1 = arith.constant 0 : i32
    return %c0_i32, %c0_i32_0 : i32, i32
  }
  func.func @transform_4(%arg0: i32, %arg1: i32) -> (i32, i32, i32) {
    %c0_i32 = arith.constant 0 : i32
    %c0_i32_0 = arith.constant 0 : i32
    %c0_i32_1 = arith.constant 0 : i32
    return %c0_i32, %arg0, %c0_i32_0 : i32, i32, i32
  }
  func.func @transform_5(%arg0: i32, %arg1: i32) -> (i32, i32, i32) {
    %c0_i32 = arith.constant 0 : i32
    %c0_i32_0 = arith.constant 0 : i32
    %c0_i32_1 = arith.constant 0 : i32
    return %c0_i32, %arg0, %c0_i32_0 : i32, i32, i32
  }
}

</mosaic_0001>

<bundles_post_ra>
// kernel: tpu_custom_call.1
= control target key start
LH: loop header
LB: loop body
LE: loop exit
PB: predicated region body
PF: predicated region fallthrough
CT: control target
= control target key end

     0   :  { %11 = vsyncpa [#allocation3], 0  ;;  %s7211_s0 = inlined_call_operand.hbm [shape: f32[8,8,512], index: 0, kind: input, shape index: {}]   ;;  %s7212_s1 = inlined_call_operand.hbm [shape: f32[2,128,512], index: 1, kind: input, shape index: {}]   ;;  %s7213_s2 = inlined_call_operand.hbm [shape: f32[1,128,512], index: 2, kind: input, shape index: {}]   ;;  %s7214_s3 = inlined_call_operand.vmem [shape: f32[1,512], index: 3, kind: input, shape index: {}]   ;;  %s7215_s4 = inlined_call_operand.hbm [shape: f32[2,8,128], index: 4, kind: output, shape index: {0}]   ;;  %s7216_s5 = inlined_call_operand.hbm [shape: f32[2,8,128], index: 5, kind: output, shape index: {1}]  }
   0x1   :  { %12 = vsyncpa [#allocation6], 0 }
   0x2   :  { %13 = vsyncpa [#allocation4], 0 }
   0x3   :  { %14 = vsyncpa [#allocation10], 0  ;;  %s5984_s18 = smov [#allocation5]   ;;  %s5985_s20 = smov [#allocation2]  }
   0x4   :  { %s32_s19 = sshll.u32 %s5984_s18, 4  ;;  %s20_s21 = sshll.u32 %s5985_s20, 4  ;;  %s33_s19 = int_to_ptr.vmem [resolvable:$true] %s32_s19  ;;  %s6024_s21 = int_to_ptr.vmem [resolvable:$true] %s20_s21 }
   0x5   :  { %s5866_s24 = scalar_lea.hbm %s7212_s1, 16384 }
   0x6   :  { %p5867_p0 = scmp.ne.s32.totalorder %s7212_s1, %s5866_s24  ;;  %p5870_p1 = scmp.lt.u32.totalorder %s5866_s24, %s7212_s1 }
   0x8   :  { %p5872_p2 = pnand %p5870_p1, %p5867_p0 }
   0xa   :  { %5875 = shalt.err (!%p5872_p2)
}
   0xb   :  { %s5876_s29 = scalar_lea.vmem %s33_s19, 16384  ;;  %p5881_p4 = scmp.lt.s32.totalorder %s33_s19, %s33_s19 }
   0xc   :  { %p5877_p3 = scmp.ne.s32.totalorder %s33_s19, %s5876_s29  ;;  %p5882_p5 = scmp.lt.s32.totalorder %s5876_s29, %s5876_s29 }
   0xe   :  { %p5883_p6 = por %p5882_p5, %p5881_p4 }
  0x10   :  { %p5884_p7 = pnand %p5883_p6, %p5877_p3 }
  0x12   :  { %5887 = shalt.err (!%p5884_p7)
}
  0x13   :  { %s5986_s30 = smov 512   ;;  %s5987_s6 = smov 32  }
  0x14   :  { %38 = dma.hbm_to_vmem [thread:$0]  %s7212_s1, 16384, %s33_s19, [#allocation6], %s5986_s30, %s5986_s30, %s5987_s6  }
  0x15   :  { %s5888_s11 = scalar_lea.hbm %s7211_s0, 4096 }
  0x16   :  { %p5889_p8 = scmp.ne.s32.totalorder %s7211_s0, %s5888_s11  ;;  %p5892_p9 = scmp.lt.u32.totalorder %s5888_s11, %s7211_s0 }
  0x18   :  { %p5894_p10 = pnand %p5892_p9, %p5889_p8 }
  0x1a   :  { %5897 = shalt.err (!%p5894_p10)
}
  0x1b   :  { %s5898_s16 = scalar_lea.vmem %s6024_s21, 4096  ;;  %p5903_p12 = scmp.lt.s32.totalorder %s6024_s21, %s6024_s21 }
  0x1c   :  { %p5899_p11 = scmp.ne.s32.totalorder %s6024_s21, %s5898_s16  ;;  %p5904_p13 = scmp.lt.s32.totalorder %s5898_s16, %s5898_s16 }
  0x1e   :  { %p5905_p0 = por %p5904_p13, %p5903_p12 }
  0x20   :  { %p5906_p1 = pnand %p5905_p0, %p5899_p11 }
  0x22   :  { %5909 = shalt.err (!%p5906_p1)
}
  0x23   :  { %26 = dma.hbm_to_vmem [thread:$0]  %s7211_s0, 4096, %s6024_s21, [#allocation3], %s5986_s30, %s5986_s30, %s5987_s6  }
  0x24   :  { %s5988_s18 = smov [#allocation7]   ;;  %s5910_s23 = scalar_lea.hbm %s7213_s2, 8192 }
  0x25   :  { %s44_s19 = sshll.u32 %s5988_s18, 4  ;;  %p5911_p2 = scmp.ne.s32.totalorder %s7213_s2, %s5910_s23  ;;  %s45_s19 = int_to_ptr.vmem [resolvable:$true] %s44_s19 }
  0x26   :  { %p5914_p3 = scmp.lt.u32.totalorder %s5910_s23, %s7213_s2 }
  0x28   :  { %p5916_p4 = pnand %p5914_p3, %p5911_p2 }
  0x2a   :  { %5919 = shalt.err (!%p5916_p4)
}
  0x2b   :  { %s5920_s28 = scalar_lea.vmem %s45_s19, 8192  ;;  %p5925_p6 = scmp.lt.s32.totalorder %s45_s19, %s45_s19 }
  0x2c   :  { %p5921_p5 = scmp.ne.s32.totalorder %s45_s19, %s5920_s28  ;;  %p5926_p7 = scmp.lt.s32.totalorder %s5920_s28, %s5920_s28 }
  0x2e   :  { %p5927_p8 = por %p5926_p7, %p5925_p6 }
  0x30   :  { %p5928_p9 = pnand %p5927_p8, %p5921_p5 }
  0x32   :  { %5931 = shalt.err (!%p5928_p9)
}
  0x33   :  { %50 = dma.hbm_to_vmem [thread:$0]  %s7213_s2, 8192, %s45_s19, [#allocation6], %s5986_s30, %s5986_s30, %s5987_s6  }
  0x34   :  { %5976 = dma.done.wait [#allocation3], 4096  }
  0x35   :  { %5977 = vsyncadd [#allocation3], 4294963200 }
  0x36   :  { %5978 = dma.done.wait [#allocation6], 24576  }
  0x37   :  { %5979 = vsyncadd [#allocation6], 4294942720  ;;  %v7217_v0 = vmov 0.0   ;;  %v103_v1 = vld [vmem:[#allocation5 + $0x8] sm:$0xff]  ;;  %v102_v3 = vld [vmem:[#allocation5] sm:$0xff] }
  0x38   :  { %230 = vmatprep.mubr.f32.mxu0 %v7217_v0  ;;  %301 = vmatprep.mubr.f32.mxu1 %v7217_v0  ;;  %v107_v2 = vld [vmem:[#allocation5 + $0x28] sm:$0xff]  ;;  %v106_v5 = vld [vmem:[#allocation5 + $0x20] sm:$0xff]  ;;  %v105_v12 = vld [vmem:[#allocation5 + $0x18] sm:$0xff] }
  0x39   :  { %v6078_v4 = vpack.c.bf16 %v107_v2, %v103_v1  ;;  %v111_v6 = vld [vmem:[#allocation5 + $0x48] sm:$0xff]  ;;  %v6080_v8 = vpack.c.bf16 %v106_v5, %v102_v3  ;;  %v110_v10 = vld [vmem:[#allocation5 + $0x40] sm:$0xff]  ;;  %v109_v13 = vld [vmem:[#allocation5 + $0x38] sm:$0xff] }
  0x3a   :  { %v115_v7 = vld [vmem:[#allocation5 + $0x68] sm:$0xff]  ;;  %v114_v11 = vld [vmem:[#allocation5 + $0x60] sm:$0xff]  ;;  %v104_v14 = vld [vmem:[#allocation5 + $0x10] sm:$0xff]  ;;  %v6088_v17 = vpack.c.bf16 %v109_v13, %v105_v12 }
  0x3b   :  { %7402 = vst [vmem:[#allocation15_spill] sm:$0xff] %v6078_v4  ;;  %v6082_v9 = vpack.c.bf16 %v115_v7, %v111_v6  ;;  %4129 = vmatprep.subr.bf16.mxu0 %v6078_v4  ;;  %v108_v15 = vld [vmem:[#allocation5 + $0x30] sm:$0xff]  ;;  %v6086_v16 = vpack.c.bf16 %v114_v11, %v110_v10  ;;  %v119_v19 = vld [vmem:[#allocation5 + $0x88] sm:$0xff]  ;;  %v118_v21 = vld [vmem:[#allocation5 + $0x80] sm:$0xff] }
  0x3c   :  { %4131 = vmatpush1.bf16.msra.mxu0 %v6080_v8  ;;  %7403 = vst [vmem:[#allocation16_spill] sm:$0xff] %v6088_v17  ;;  %v6090_v18 = vpack.c.bf16 %v108_v15, %v104_v14  ;;  %v123_v20 = vld [vmem:[#allocation5 + $0xa8] sm:$0xff]  ;;  %v122_v23 = vld [vmem:[#allocation5 + $0xa0] sm:$0xff]  ;;  %v113_v24 = vld [vmem:[#allocation5 + $0x58] sm:$0xff]  ;;  %4161 = vmatprep.subr.bf16.mxu1 %v6088_v17 }
  0x3d   :  { %4133 = vmatprep.subr.bf16.mxu0 %v6082_v9  ;;  %v6093_v22 = vpack.c.bf16 %v123_v20, %v119_v19  ;;  %v117_v25 = vld [vmem:[#allocation5 + $0x78] sm:$0xff]  ;;  %v112_v27 = vld [vmem:[#allocation5 + $0x50] sm:$0xff]  ;;  %v127_v29 = vld [vmem:[#allocation5 + $0xc8] sm:$0xff]  ;;  %v6102_v32 = vpack.c.bf16 %v122_v23, %v118_v21 }
  0x3e   :  { %v6096_v26 = vpack.c.bf16 %v117_v25, %v113_v24  ;;  %v116_v28 = vld [vmem:[#allocation5 + $0x70] sm:$0xff]  ;;  %4163 = vmatpush1.bf16.msra.mxu1 %v6090_v18  ;;  %v131_v31 = vld [vmem:[#allocation5 + $0xe8] sm:$0xff]  ;;  %v121_v33 = vld [vmem:[#allocation5 + $0x98] sm:$0xff] }
  0x3f   :  { %v6099_v30 = vpack.c.bf16 %v116_v28, %v112_v27  ;;  %7404 = vst [vmem:[#allocation17_spill] sm:$0xff] %v6102_v32  ;;  %v125_v34 = vld [vmem:[#allocation5 + $0xb8] sm:$0xff]  ;;  %v120_v35 = vld [vmem:[#allocation5 + $0x90] sm:$0xff]  ;;  %v6106_v36 = vpack.c.bf16 %v131_v31, %v127_v29  ;;  %v126_v37 = vld [vmem:[#allocation5 + $0xc0] sm:$0xff] }
  0x40   :  { %4135 = vmatpush1.bf16.msra.mxu0 %v6086_v16  ;;  %4165 = vmatprep.subr.bf16.mxu1 %v6096_v26  ;;  %v130_v38 = vld [vmem:[#allocation5 + $0xe0] sm:$0xff]  ;;  %v6108_v39 = vpack.c.bf16 %v125_v34, %v121_v33  ;;  %v124_v40 = vld [vmem:[#allocation5 + $0xb0] sm:$0xff]  ;;  %v135_v41 = vld [vmem:[#allocation5 + $0x108] sm:$0xff] }
  0x41   :  { %4137 = vmatprep.subr.bf16.mxu0 %v6093_v22  ;;  %7405 = vst [vmem:[#allocation18_spill] sm:$0xff] %v6106_v36  ;;  %v139_v42 = vld [vmem:[#allocation5 + $0x128] sm:$0xff]  ;;  %v129_v43 = vld [vmem:[#allocation5 + $0xd8] sm:$0xff]  ;;  %v6111_v44 = vpack.c.bf16 %v124_v40, %v120_v35  ;;  %v6114_v46 = vpack.c.bf16 %v130_v38, %v126_v37  ;;  %v134_v47 = vld [vmem:[#allocation5 + $0x100] sm:$0xff] }
  0x42   :  { %4167 = vmatpush1.bf16.msra.mxu1 %v6099_v30  ;;  %v133_v45 = vld [vmem:[#allocation5 + $0xf8] sm:$0xff]  ;;  %v128_v49 = vld [vmem:[#allocation5 + $0xd0] sm:$0xff]  ;;  %v6120_v51 = vpack.c.bf16 %v139_v42, %v135_v41  ;;  %v138_v52 = vld [vmem:[#allocation5 + $0x120] sm:$0xff] }
  0x43   :  { %7406 = vst [vmem:[#allocation19_spill] sm:$0xff] %v6111_v44  ;;  %7407 = vst [vmem:[#allocation20_spill] sm:$0xff] %v6114_v46  ;;  %4169 = vmatprep.subr.bf16.mxu1 %v6108_v39  ;;  %v6117_v48 = vpack.c.bf16 %v133_v45, %v129_v43  ;;  %v132_v50 = vld [vmem:[#allocation5 + $0xf0] sm:$0xff]  ;;  %v137_v53 = vld [vmem:[#allocation5 + $0x118] sm:$0xff]  ;;  %v6126_v58 = vpack.c.bf16 %v138_v52, %v134_v47 }
  0x44   :  { %4139 = vmatpush1.bf16.msra.mxu0 %v6102_v32  ;;  %7409 = vst [vmem:[#allocation22_spill] sm:$0xff] %v6120_v51  ;;  %v141_v54 = vld [vmem:[#allocation5 + $0x138] sm:$0xff]  ;;  %v143_v55 = vld [vmem:[#allocation5 + $0x148] sm:$0xff]  ;;  %v6123_v57 = vpack.c.bf16 %v132_v50, %v128_v49  ;;  %v142_v59 = vld [vmem:[#allocation5 + $0x140] sm:$0xff] }
  0x45   :  { %7408 = vst [vmem:[#allocation21_spill] sm:$0xff] %v6117_v48  ;;  %4141 = vmatprep.subr.bf16.mxu0 %v6106_v36  ;;  %v147_v56 = vld [vmem:[#allocation5 + $0x168] sm:$0xff]  ;;  %7411 = vst [vmem:[#allocation24_spill] sm:$0xff] %v6126_v58  ;;  %v6129_v60 = vpack.c.bf16 %v141_v54, %v137_v53  ;;  %v136_v61 = vld [vmem:[#allocation5 + $0x110] sm:$0xff] }
  0x46   :  { %4171 = vmatpush1.bf16.msra.mxu1 %v6111_v44  ;;  %7410 = vst [vmem:[#allocation23_spill] sm:$0xff] %v6123_v57  ;;  %v140_v62 = vld [vmem:[#allocation5 + $0x130] sm:$0xff]  ;;  %v6132_v63 = vpack.c.bf16 %v147_v56, %v143_v55  ;;  %v146_v1 = vld [vmem:[#allocation5 + $0x160] sm:$0xff]  ;;  %v145_v2 = vld [vmem:[#allocation5 + $0x158] sm:$0xff] }
  0x47   :  { %4173 = vmatprep.subr.bf16.mxu1 %v6117_v48  ;;  %7412 = vst [vmem:[#allocation25_spill] sm:$0xff] %v6129_v60  ;;  %v149_v3 = vld [vmem:[#allocation5 + $0x178] sm:$0xff]  ;;  %v151_v5 = vld [vmem:[#allocation5 + $0x188] sm:$0xff]  ;;  %v6135_v7 = vpack.c.bf16 %v140_v62, %v136_v61  ;;  %v6138_v10 = vpack.c.bf16 %v146_v1, %v142_v59  ;;  %v150_v11 = vld [vmem:[#allocation5 + $0x180] sm:$0xff] }
  0x48   :  { %4143 = vmatpush1.bf16.msra.mxu0 %v6114_v46  ;;  %7413 = vst [vmem:[#allocation26_spill] sm:$0xff] %v6132_v63  ;;  %v155_v6 = vld [vmem:[#allocation5 + $0x1a8] sm:$0xff]  ;;  %v6141_v12 = vpack.c.bf16 %v149_v3, %v145_v2  ;;  %v144_v13 = vld [vmem:[#allocation5 + $0x150] sm:$0xff]  ;;  %v154_v19 = vld [vmem:[#allocation5 + $0x1a0] sm:$0xff] }
  0x49   :  { %4145 = vmatprep.subr.bf16.mxu0 %v6120_v51  ;;  %7414 = vst [vmem:[#allocation27_spill] sm:$0xff] %v6135_v7  ;;  %7415 = vst [vmem:[#allocation28_spill] sm:$0xff] %v6138_v10  ;;  %v148_v14 = vld [vmem:[#allocation5 + $0x170] sm:$0xff]  ;;  %v6144_v15 = vpack.c.bf16 %v155_v6, %v151_v5  ;;  %v153_v20 = vld [vmem:[#allocation5 + $0x198] sm:$0xff]  ;;  %v6150_v27 = vpack.c.bf16 %v154_v19, %v150_v11 }
  0x4a   :  { %4175 = vmatpush1.bf16.msra.mxu1 %v6123_v57  ;;  %7416 = vst [vmem:[#allocation29_spill] sm:$0xff] %v6141_v12  ;;  %v157_v21 = vld [vmem:[#allocation5 + $0x1b8] sm:$0xff]  ;;  %v159_v23 = vld [vmem:[#allocation5 + $0x1c8] sm:$0xff]  ;;  %v6147_v25 = vpack.c.bf16 %v148_v14, %v144_v13  ;;  %v158_v28 = vld [vmem:[#allocation5 + $0x1c0] sm:$0xff] }
  0x4b   :  { %4177 = vmatprep.subr.bf16.mxu1 %v6129_v60  ;;  %7417 = vst [vmem:[#allocation30_spill] sm:$0xff] %v6144_v15  ;;  %v163_v24 = vld [vmem:[#allocation5 + $0x1e8] sm:$0xff]  ;;  %7419 = vst [vmem:[#allocation32_spill] sm:$0xff] %v6150_v27  ;;  %v6153_v29 = vpack.c.bf16 %v157_v21, %v153_v20  ;;  %v152_v31 = vld [vmem:[#allocation5 + $0x190] sm:$0xff] }
  0x4c   :  { %4147 = vmatpush1.bf16.msra.mxu0 %v6126_v58  ;;  %7418 = vst [vmem:[#allocation31_spill] sm:$0xff] %v6147_v25  ;;  %v156_v33 = vld [vmem:[#allocation5 + $0x1b0] sm:$0xff]  ;;  %v6156_v34 = vpack.c.bf16 %v163_v24, %v159_v23  ;;  %v162_v35 = vld [vmem:[#allocation5 + $0x1e0] sm:$0xff]  ;;  %v161_v37 = vld [vmem:[#allocation5 + $0x1d8] sm:$0xff] }
  0x4d   :  { %4149 = vmatprep.subr.bf16.mxu0 %v6132_v63  ;;  %7420 = vst [vmem:[#allocation33_spill] sm:$0xff] %v6153_v29  ;;  %v165_v38 = vld [vmem:[#allocation5 + $0x1f8] sm:$0xff]  ;;  %v396_v40 = vld [vmem:[#allocation5 + $0x208] sm:$0xff]  ;;  %v6159_v42 = vpack.c.bf16 %v156_v33, %v152_v31  ;;  %v6162_v43 = vpack.c.bf16 %v162_v35, %v158_v28  ;;  %v160_v47 = vld [vmem:[#allocation5 + $0x1d0] sm:$0xff] }
  0x4e   :  { %4179 = vmatpush1.bf16.msra.mxu1 %v6135_v7  ;;  %7421 = vst [vmem:[#allocation34_spill] sm:$0xff] %v6156_v34  ;;  %v400_v41 = vld [vmem:[#allocation5 + $0x228] sm:$0xff]  ;;  %v6165_v45 = vpack.c.bf16 %v165_v38, %v161_v37  ;;  %v164_v49 = vld [vmem:[#allocation5 + $0x1f0] sm:$0xff]  ;;  %v398_v50 = vld [vmem:[#allocation5 + $0x218] sm:$0xff] }
  0x4f   :  { %4181 = vmatprep.subr.bf16.mxu1 %v6141_v12  ;;  %7422 = vst [vmem:[#allocation35_spill] sm:$0xff] %v6159_v42  ;;  %7423 = vst [vmem:[#allocation36_spill] sm:$0xff] %v6162_v43  ;;  %v6168_v52 = vpack.c.bf16 %v400_v41, %v396_v40  ;;  %v402_v53 = vld [vmem:[#allocation5 + $0x238] sm:$0xff]  ;;  %v395_v54 = vld [vmem:[#allocation5 + $0x200] sm:$0xff]  ;;  %v6171_v61 = vpack.c.bf16 %v164_v49, %v160_v47 }
  0x50   :  { %4151 = vmatpush1.bf16.msra.mxu0 %v6138_v10  ;;  %7424 = vst [vmem:[#allocation37_spill] sm:$0xff] %v6165_v45  ;;  %v399_v55 = vld [vmem:[#allocation5 + $0x220] sm:$0xff]  ;;  %v404_v56 = vld [vmem:[#allocation5 + $0x248] sm:$0xff]  ;;  %v6175_v62 = vpack.c.bf16 %v402_v53, %v398_v50  ;;  %v397_v2 = vld [vmem:[#allocation5 + $0x210] sm:$0xff] }
  0x51   :  { %4153 = vmatprep.subr.bf16.mxu0 %v6144_v15  ;;  %7425 = vst [vmem:[#allocation38_spill] sm:$0xff] %v6168_v52  ;;  %v408_v59 = vld [vmem:[#allocation5 + $0x268] sm:$0xff]  ;;  %7426 = vst [vmem:[#allocation39_spill] sm:$0xff] %v6171_v61  ;;  %v6177_v1 = vpack.c.bf16 %v399_v55, %v395_v54  ;;  %v401_v3 = vld [vmem:[#allocation5 + $0x230] sm:$0xff] }
  0x52   :  { %4183 = vmatpush1.bf16.msra.mxu1 %v6147_v25  ;;  %7427 = vst [vmem:[#allocation40_spill] sm:$0xff] %v6175_v62  ;;  %v406_v5 = vld [vmem:[#allocation5 + $0x258] sm:$0xff]  ;;  %v6180_v6 = vpack.c.bf16 %v408_v59, %v404_v56  ;;  %v403_v13 = vld [vmem:[#allocation5 + $0x240] sm:$0xff]  ;;  %v412_v19 = vld [vmem:[#allocation5 + $0x288] sm:$0xff]  ;;  %v6184_v21 = vpack.c.bf16 %v401_v3, %v397_v2 }
  0x53   :  { %4185 = vmatprep.subr.bf16.mxu1 %v6153_v29  ;;  %7428 = vst [vmem:[#allocation41_spill] sm:$0xff] %v6177_v1  ;;  %v410_v11 = vld [vmem:[#allocation5 + $0x278] sm:$0xff]  ;;  %v407_v14 = vld [vmem:[#allocation5 + $0x260] sm:$0xff]  ;;  %v416_v20 = vld [vmem:[#allocation5 + $0x2a8] sm:$0xff] }
  0x54   :  { %4155 = vmatpush1.bf16.msra.mxu0 %v6150_v27  ;;  %7429 = vst [vmem:[#allocation42_spill] sm:$0xff] %v6180_v6  ;;  %7430 = vst [vmem:[#allocation43_spill] sm:$0xff] %v6184_v21  ;;  %v6188_v23 = vpack.c.bf16 %v410_v11, %v406_v5  ;;  %v6190_v24 = vpack.c.bf16 %v407_v14, %v403_v13  ;;  %v405_v28 = vld [vmem:[#allocation5 + $0x250] sm:$0xff]  ;;  %v414_v33 = vld [vmem:[#allocation5 + $0x298] sm:$0xff]  ;;  %v6193_v35 = vpack.c.bf16 %v416_v20, %v412_v19 }
  0x55   :  { %4157 = vmatprep.subr.bf16.mxu0 %v6156_v34  ;;  %v409_v31 = vld [vmem:[#allocation5 + $0x270] sm:$0xff]  ;;  %v418_v37 = vld [vmem:[#allocation5 + $0x2b8] sm:$0xff]  ;;  %v411_v38 = vld [vmem:[#allocation5 + $0x280] sm:$0xff] }
  0x56   :  { %4187 = vmatpush1.bf16.msra.mxu1 %v6159_v42  ;;  %7431 = vst [vmem:[#allocation44_spill] sm:$0xff] %v6188_v23  ;;  %7432 = vst [vmem:[#allocation45_spill] sm:$0xff] %v6190_v24  ;;  %v415_v40 = vld [vmem:[#allocation5 + $0x2a0] sm:$0xff]  ;;  %v420_v41 = vld [vmem:[#allocation5 + $0x2c8] sm:$0xff]  ;;  %v6198_v49 = vpack.c.bf16 %v409_v31, %v405_v28  ;;  %v6203_v50 = vpack.c.bf16 %v418_v37, %v414_v33 }
  0x57   :  { %4189 = vmatprep.subr.bf16.mxu1 %v6165_v45  ;;  %7433 = vst [vmem:[#allocation46_spill] sm:$0xff] %v6193_v35  ;;  %v424_v47 = vld [vmem:[#allocation5 + $0x2e8] sm:$0xff]  ;;  %v6205_v53 = vpack.c.bf16 %v415_v40, %v411_v38  ;;  %v413_v54 = vld [vmem:[#allocation5 + $0x290] sm:$0xff]  ;;  %v422_v56 = vld [vmem:[#allocation5 + $0x2d8] sm:$0xff] }
  0x58   :  { %4159 = vmatpush1.bf16.msra.mxu0 %v6162_v43  ;;  %7434 = vst [vmem:[#allocation47_spill] sm:$0xff] %v6198_v49  ;;  %7435 = vst [vmem:[#allocation48_spill] sm:$0xff] %v6203_v50  ;;  %v417_v55 = vld [vmem:[#allocation5 + $0x2b0] sm:$0xff]  ;;  %v6208_v59 = vpack.c.bf16 %v424_v47, %v420_v41  ;;  %v426_v2 = vld [vmem:[#allocation5 + $0x2f8] sm:$0xff] }
  0x59   :  { %4193 = vmatprep.subr.bf16.mxu0 %v6168_v52  ;;  %7436 = vst [vmem:[#allocation49_spill] sm:$0xff] %v6205_v53  ;;  %v419_v3 = vld [vmem:[#allocation5 + $0x2c0] sm:$0xff]  ;;  %v428_v11 = vld [vmem:[#allocation5 + $0x308] sm:$0xff]  ;;  %v6211_v14 = vpack.c.bf16 %v417_v55, %v413_v54  ;;  %v6215_v19 = vpack.c.bf16 %v426_v2, %v422_v56  ;;  %v421_v28 = vld [vmem:[#allocation5 + $0x2d0] sm:$0xff] }
  0x5a   :  { %4191 = vmatpush1.bf16.msra.mxu1 %v6171_v61  ;;  %7437 = vst [vmem:[#allocation50_spill] sm:$0xff] %v6208_v59  ;;  %v423_v5 = vld [vmem:[#allocation5 + $0x2e0] sm:$0xff]  ;;  %v432_v13 = vld [vmem:[#allocation5 + $0x328] sm:$0xff]  ;;  %v425_v31 = vld [vmem:[#allocation5 + $0x2f0] sm:$0xff] }
  0x5b   :  { %231 = vmatmul.mubr.f32.vlgmr.msra.gmra.mrb[0].mxu0 %v7217_v0  ;;  %4225 = vmatprep.subr.bf16.mxu1 %v6175_v62  ;;  %7438 = vst [vmem:[#allocation51_spill] sm:$0xff] %v6211_v14  ;;  %7439 = vst [vmem:[#allocation52_spill] sm:$0xff] %v6215_v19  ;;  %v6217_v20 = vpack.c.bf16 %v423_v5, %v419_v3  ;;  %v430_v33 = vld [vmem:[#allocation5 + $0x318] sm:$0xff]  ;;  %v6220_v37 = vpack.c.bf16 %v432_v13, %v428_v11  ;;  %v427_v40 = vld [vmem:[#allocation5 + $0x300] sm:$0xff] }
  0x5c   :  { %4195 = vmatpush1.bf16.msra.mxu0 %v6177_v1  ;;  %523 = vmatprep.mubr.f32.mxu0 %v7217_v0  ;;  %v434_v38 = vld [vmem:[#allocation5 + $0x338] sm:$0xff]  ;;  %v431_v41 = vld [vmem:[#allocation5 + $0x320] sm:$0xff]  ;;  %v436_v47 = vld [vmem:[#allocation5 + $0x348] sm:$0xff]  ;;  %v6223_v55 = vpack.c.bf16 %v425_v31, %v421_v28 }
  0x5d   :  { %4197 = vmatprep.subr.bf16.mxu0 %v6180_v6  ;;  %302 = vmatmul.mubr.f32.vlgmr.msra.gmra.mrb[0].mxu1 %v7217_v0  ;;  %7440 = vst [vmem:[#allocation53_spill] sm:$0xff] %v6217_v20  ;;  %7441 = vst [vmem:[#allocation54_spill] sm:$0xff] %v6220_v37  ;;  %v440_v54 = vld [vmem:[#allocation5 + $0x368] sm:$0xff]  ;;  %v6227_v56 = vpack.c.bf16 %v434_v38, %v430_v33  ;;  %v6229_v2 = vpack.c.bf16 %v431_v41, %v427_v40  ;;  %v429_v3 = vld [vmem:[#allocation5 + $0x310] sm:$0xff] }
  0x5e   :  { %4227 = vmatpush1.bf16.msra.mxu1 %v6184_v21  ;;  %594 = vmatprep.mubr.f32.mxu1 %v7217_v0  ;;  %7442 = vst [vmem:[#allocation55_spill] sm:$0xff] %v6223_v55  ;;  %v433_v5 = vld [vmem:[#allocation5 + $0x330] sm:$0xff]  ;;  %v438_v11 = vld [vmem:[#allocation5 + $0x358] sm:$0xff]  ;;  %v6232_v13 = vpack.c.bf16 %v440_v54, %v436_v47  ;;  %v444_v28 = vld [vmem:[#allocation5 + $0x388] sm:$0xff] }
  0x5f   :  { %4229 = vmatprep.subr.bf16.mxu1 %v6188_v23  ;;  %7443 = vst [vmem:[#allocation56_spill] sm:$0xff] %v6227_v56  ;;  %7444 = vst [vmem:[#allocation57_spill] sm:$0xff] %v6229_v2  ;;  %v442_v0 = vld [vmem:[#allocation5 + $0x378] sm:$0xff]  ;;  %v448_v31 = vld [vmem:[#allocation5 + $0x3a8] sm:$0xff] }
  0x60   :  { %4199 = vmatpush1.bf16.msra.mxu0 %v6190_v24  ;;  %7445 = vst [vmem:[#allocation58_spill] sm:$0xff] %v6232_v13  ;;  %v6239_v33 = vpack.c.bf16 %v442_v0, %v438_v11  ;;  %v437_v40 = vld [vmem:[#allocation5 + $0x350] sm:$0xff]  ;;  %v446_v47 = vld [vmem:[#allocation5 + $0x398] sm:$0xff]  ;;  %v6244_v54 = vpack.c.bf16 %v448_v31, %v444_v28  ;;  %v452_v28 = vld [vmem:[#allocation5 + $0x3c8] sm:$0xff] }
  0x61   :  { %4201 = vmatprep.subr.bf16.mxu0 %v6193_v35  ;;  %v441_v41 = vld [vmem:[#allocation5 + $0x370] sm:$0xff]  ;;  %v456_v31 = vld [vmem:[#allocation5 + $0x3e8] sm:$0xff] }
  0x62   :  { %4231 = vmatpush1.bf16.msra.mxu1 %v6198_v49  ;;  %7447 = vst [vmem:[#allocation60_spill] sm:$0xff] %v6239_v33  ;;  %7449 = vst [vmem:[#allocation62_spill] sm:$0xff] %v6244_v54 }
  0x63   :  { %4233 = vmatprep.subr.bf16.mxu1 %v6203_v50 }
  0x64   :  { %4203 = vmatpush1.bf16.msra.mxu0 %v6205_v53 }
  0x65   :  { %4205 = vmatprep.subr.bf16.mxu0 %v6208_v59  ;;  %v435_v59 = vld [vmem:[#allocation5 + $0x340] sm:$0xff] }
  0x66   :  { %4235 = vmatpush1.bf16.msra.mxu1 %v6211_v14  ;;  %v439_v14 = vld [vmem:[#allocation5 + $0x360] sm:$0xff] }
  0x67   :  { %4237 = vmatprep.subr.bf16.mxu1 %v6215_v19  ;;  %v6235_v19 = vpack.c.bf16 %v433_v5, %v429_v3  ;;  %v6241_v38 = vpack.c.bf16 %v439_v14, %v435_v59  ;;  %v6247_v3 = vpack.c.bf16 %v441_v41, %v437_v40  ;;  %v445_v14 = vld [vmem:[#allocation5 + $0x390] sm:$0xff]  ;;  %v6262_v40 = vpack.c.bf16 %v456_v31, %v452_v28  ;;  %v455_v41 = vld [vmem:[#allocation5 + $0x3e0] sm:$0xff]  ;;  %v335_v28 = vld [vmem:[#allocation7 + $0x28] sm:$0xff] }
  0x68   :  { %4207 = vmatpush1.bf16.msra.mxu0 %v6217_v20  ;;  %v443_v20 = vld [vmem:[#allocation5 + $0x380] sm:$0xff]  ;;  %v449_v5 = vld [vmem:[#allocation5 + $0x3b0] sm:$0xff]  ;;  %v333_v31 = vld [vmem:[#allocation7 + $0x18] sm:$0xff] }
  0x69   :  { %4209 = vmatprep.subr.bf16.mxu0 %v6220_v37  ;;  %7446 = vst [vmem:[#allocation59_spill] sm:$0xff] %v6235_v19  ;;  %7448 = vst [vmem:[#allocation61_spill] sm:$0xff] %v6241_v38  ;;  %v450_v37 = vld [vmem:[#allocation5 + $0x3b8] sm:$0xff]  ;;  %v6257_v11 = vpack.c.bf16 %v449_v5, %v445_v14  ;;  %v453_v14 = vld [vmem:[#allocation5 + $0x3d0] sm:$0xff] }
  0x6a   :  { %4239 = vmatpush1.bf16.msra.mxu1 %v6223_v55  ;;  %v447_v55 = vld [vmem:[#allocation5 + $0x3a0] sm:$0xff]  ;;  %7450 = vst [vmem:[#allocation63_spill] sm:$0xff] %v6247_v3  ;;  %v6251_v0 = vpack.c.bf16 %v450_v37, %v446_v47  ;;  %v454_v37 = vld [vmem:[#allocation5 + $0x3d8] sm:$0xff]  ;;  %7454 = vst [vmem:[#allocation67_spill] sm:$0xff] %v6262_v40 }
  0x6b   :  { %4241 = vmatprep.subr.bf16.mxu1 %v6227_v56  ;;  %v6253_v59 = vpack.c.bf16 %v447_v55, %v443_v20  ;;  %7453 = vst [vmem:[#allocation66_spill] sm:$0xff] %v6257_v11  ;;  %v458_v20 = vld [vmem:[#allocation5 + $0x3f8] sm:$0xff]  ;;  %v451_v55 = vld [vmem:[#allocation5 + $0x3c0] sm:$0xff]  ;;  %v457_v5 = vld [vmem:[#allocation5 + $0x3f0] sm:$0xff] }
  0x6c   :  { %4211 = vmatpush1.bf16.msra.mxu0 %v6229_v2  ;;  %7451 = vst [vmem:[#allocation64_spill] sm:$0xff] %v6251_v0  ;;  %v6264_v47 = vpack.c.bf16 %v458_v20, %v454_v37  ;;  %v337_v37 = vld [vmem:[#allocation7 + $0x38] sm:$0xff]  ;;  %v330_v20 = vld [vmem:[#allocation7] sm:$0xff] }
  0x6d   :  { %4213 = vmatprep.subr.bf16.mxu0 %v6232_v13  ;;  %7452 = vst [vmem:[#allocation65_spill] sm:$0xff] %v6253_v59  ;;  %v378_v13 = vld [vmem:[#allocation7 + $0x180] sm:$0xff] }
  0x6e   :  { %4243 = vmatpush1.bf16.msra.mxu1 %v6235_v19  ;;  %7455 = vst [vmem:[#allocation68_spill] sm:$0xff] %v6264_v47 }
  0x6f   :  { %4245 = vmatprep.subr.bf16.mxu1 %v6239_v33  ;;  %v383_v33 = vld [vmem:[#allocation7 + $0x1a8] sm:$0xff] }
  0x70   :  { %4215 = vmatpush1.bf16.msra.mxu0 %v6241_v38  ;;  %v350_v38 = vld [vmem:[#allocation7 + $0xa0] sm:$0xff] }
  0x71   :  { %4217 = vmatprep.subr.bf16.mxu0 %v6244_v54  ;;  %v6266_v54 = vpack.c.bf16 %v455_v41, %v451_v55  ;;  %v334_v55 = vld [vmem:[#allocation7 + $0x20] sm:$0xff]  ;;  %v6276_v41 = vpack.c.bf16 %v337_v37, %v333_v31  ;;  %v341_v31 = vld [vmem:[#allocation7 + $0x58] sm:$0xff] }
  0x72   :  { %4247 = vmatpush1.bf16.msra.mxu1 %v6247_v3  ;;  %v6278_v3 = vpack.c.bf16 %v334_v55, %v330_v20  ;;  %v345_v37 = vld [vmem:[#allocation7 + $0x78] sm:$0xff] }
  0x73   :  { %4249 = vmatprep.subr.bf16.mxu1 %v6251_v0  ;;  %7456 = vst [vmem:[#allocation69_spill] sm:$0xff] %v6266_v54  ;;  %v6269_v0 = vpack.c.bf16 %v457_v5, %v453_v14  ;;  %7459 = vst [vmem:[#allocation72_spill] sm:$0xff] %v6276_v41  ;;  %v332_v14 = vld [vmem:[#allocation7 + $0x10] sm:$0xff]  ;;  %v6290_v55 = vpack.c.bf16 %v345_v37, %v341_v31  ;;  %v349_v31 = vld [vmem:[#allocation7 + $0x98] sm:$0xff] }
  0x74   :  { %4219 = vmatpush1.bf16.msra.mxu0 %v6253_v59  ;;  %7460 = vst [vmem:[#allocation73_spill] sm:$0xff] %v6278_v3  ;;  %v336_v5 = vld [vmem:[#allocation7 + $0x30] sm:$0xff] }
  0x75   :  { %4221 = vmatprep.subr.bf16.mxu0 %v6262_v40  ;;  %7457 = vst [vmem:[#allocation70_spill] sm:$0xff] %v6269_v0  ;;  %7464 = vst [vmem:[#allocation76_spill] sm:$0xff] %v6290_v55  ;;  %v346_v40 = vld [vmem:[#allocation7 + $0x80] sm:$0xff] }
  0x76   :  { %4251 = vmatpush1.bf16.msra.mxu1 %v6257_v11  ;;  %v331_v11 = vld [vmem:[#allocation7 + $0x8] sm:$0xff] }
  0x77   :  { %4253 = vmatprep.subr.bf16.mxu1 %v6264_v47  ;;  %v6274_v59 = vpack.c.bf16 %v335_v28, %v331_v11  ;;  %v7461_v47 = vmov 0.0   ;;  %v339_v11 = vld [vmem:[#allocation7 + $0x48] sm:$0xff] }
  0x78   :  { %4223 = vmatpush1.bf16.msra.mxu0 %v6266_v54  ;;  %v6282_v54 = vpack.c.bf16 %v336_v5, %v332_v14  ;;  %v343_v28 = vld [vmem:[#allocation7 + $0x68] sm:$0xff]  ;;  %v340_v14 = vld [vmem:[#allocation7 + $0x50] sm:$0xff] }
  0x79   :  { %7458 = vst [vmem:[#allocation71_spill] sm:$0xff] %v6274_v59  ;;  %4257 = vmatprep.subr.bf16.mxu0 %v6274_v59  ;;  %v6288_v20 = vpack.c.bf16 %v343_v28, %v339_v11  ;;  %v338_v59 = vld [vmem:[#allocation7 + $0x40] sm:$0xff]  ;;  %v347_v11 = vld [vmem:[#allocation7 + $0x88] sm:$0xff] }
  0x7a   :  { %4255 = vmatpush1.bf16.msra.mxu1 %v6269_v0  ;;  %7462 = vst [vmem:[#allocation74_spill] sm:$0xff] %v6282_v54  ;;  %v342_v0 = vld [vmem:[#allocation7 + $0x60] sm:$0xff]  ;;  %v351_v28 = vld [vmem:[#allocation7 + $0xa8] sm:$0xff] }
  0x7b   :  { %524 = vmatmul.mubr.f32.vlgmr.msra.gmra.mrb[2].mxu0 %v7461_v47  ;;  %4289 = vmatprep.subr.bf16.mxu1 %v6276_v41  ;;  %7463 = vst [vmem:[#allocation75_spill] sm:$0xff] %v6288_v20  ;;  %v6294_v5 = vpack.c.bf16 %v342_v0, %v338_v59  ;;  %v344_v41 = vld [vmem:[#allocation7 + $0x70] sm:$0xff]  ;;  %v6301_v37 = vpack.c.bf16 %v351_v28, %v347_v11  ;;  %v359_v11 = vld [vmem:[#allocation7 + $0xe8] sm:$0xff]  ;;  %v357_v28 = vld [vmem:[#allocation7 + $0xd8] sm:$0xff] }
  0x7c   :  { %4259 = vmatpush1.bf16.msra.mxu0 %v6278_v3  ;;  %665 = vmatprep.mubr.f32.mxu0 %v7461_v47  ;;  %v353_v3 = vld [vmem:[#allocation7 + $0xb8] sm:$0xff]  ;;  %v6306_v59 = vpack.c.bf16 %v350_v38, %v346_v40 }
  0x7d   :  { %595 = vmatmul.mubr.f32.vlgmr.msra.gmra.mrb[2].mxu1 %v7461_v47  ;;  %7465 = vst [vmem:[#allocation77_spill] sm:$0xff] %v6294_v5  ;;  %4261 = vmatprep.subr.bf16.mxu0 %v6288_v20  ;;  %7467 = vst [vmem:[#allocation79_spill] sm:$0xff] %v6301_v37  ;;  %v6304_v0 = vpack.c.bf16 %v353_v3, %v349_v31  ;;  %v348_v20 = vld [vmem:[#allocation7 + $0x90] sm:$0xff]  ;;  %v354_v3 = vld [vmem:[#allocation7 + $0xc0] sm:$0xff] }
  0x7e   :  { %4291 = vmatpush1.bf16.msra.mxu1 %v6282_v54  ;;  %736 = vmatprep.mubr.f32.mxu1 %v7461_v47  ;;  %v6298_v54 = vpack.c.bf16 %v344_v41, %v340_v14  ;;  %7469 = vst [vmem:[#allocation81_spill] sm:$0xff] %v6306_v59  ;;  %v355_v14 = vld [vmem:[#allocation7 + $0xc8] sm:$0xff]  ;;  %v358_v31 = vld [vmem:[#allocation7 + $0xe0] sm:$0xff] }
  0x7f   :  { %4293 = vmatprep.subr.bf16.mxu1 %v6290_v55  ;;  %7468 = vst [vmem:[#allocation80_spill] sm:$0xff] %v6304_v0  ;;  %v352_v55 = vld [vmem:[#allocation7 + $0xb0] sm:$0xff]  ;;  %v6318_v40 = vpack.c.bf16 %v358_v31, %v354_v3 }
  0x80   :  { %7466 = vst [vmem:[#allocation78_spill] sm:$0xff] %v6298_v54  ;;  %4263 = vmatpush1.bf16.msra.mxu0 %v6294_v5  ;;  %v6309_v41 = vpack.c.bf16 %v352_v55, %v348_v20  ;;  %v6313_v5 = vpack.c.bf16 %v359_v11, %v355_v14  ;;  %v356_v20 = vld [vmem:[#allocation7 + $0xd0] sm:$0xff]  ;;  %v367_v14 = vld [vmem:[#allocation7 + $0x128] sm:$0xff]  ;;  %v365_v11 = vld [vmem:[#allocation7 + $0x118] sm:$0xff] }
  0x81   :  { %4265 = vmatprep.subr.bf16.mxu0 %v6301_v37  ;;  %7473 = vst [vmem:[#allocation85_spill] sm:$0xff] %v6318_v40  ;;  %v360_v55 = vld [vmem:[#allocation7 + $0xf0] sm:$0xff] }
  0x82   :  { %4295 = vmatpush1.bf16.msra.mxu1 %v6298_v54  ;;  %7470 = vst [vmem:[#allocation82_spill] sm:$0xff] %v6309_v41  ;;  %7471 = vst [vmem:[#allocation83_spill] sm:$0xff] %v6313_v5  ;;  %v361_v54 = vld [vmem:[#allocation7 + $0xf8] sm:$0xff] }
  0x83   :  { %4297 = vmatprep.subr.bf16.mxu1 %v6304_v0  ;;  %v6316_v38 = vpack.c.bf16 %v361_v54, %v357_v28  ;;  %v6321_v0 = vpack.c.bf16 %v360_v55, %v356_v20  ;;  %v362_v54 = vld [vmem:[#allocation7 + $0x100] sm:$0xff]  ;;  %v364_v20 = vld [vmem:[#allocation7 + $0x110] sm:$0xff] }
  0x84   :  { %4267 = vmatpush1.bf16.msra.mxu0 %v6306_v59  ;;  %v363_v59 = vld [vmem:[#allocation7 + $0x108] sm:$0xff]  ;;  %v366_v28 = vld [vmem:[#allocation7 + $0x120] sm:$0xff]  ;;  %v368_v55 = vld [vmem:[#allocation7 + $0x130] sm:$0xff] }
  0x85   :  { %7472 = vst [vmem:[#allocation84_spill] sm:$0xff] %v6316_v38  ;;  %4269 = vmatprep.subr.bf16.mxu0 %v6313_v5  ;;  %7474 = vst [vmem:[#allocation86_spill] sm:$0xff] %v6321_v0  ;;  %v6325_v37 = vpack.c.bf16 %v367_v14, %v363_v59  ;;  %v6330_v31 = vpack.c.bf16 %v366_v28, %v362_v54  ;;  %v375_v59 = vld [vmem:[#allocation7 + $0x168] sm:$0xff]  ;;  %v373_v14 = vld [vmem:[#allocation7 + $0x158] sm:$0xff] }
  0x86   :  { %4299 = vmatpush1.bf16.msra.mxu1 %v6309_v41  ;;  %v369_v41 = vld [vmem:[#allocation7 + $0x138] sm:$0xff] }
  0x87   :  { %4301 = vmatprep.subr.bf16.mxu1 %v6316_v38  ;;  %7475 = vst [vmem:[#allocation87_spill] sm:$0xff] %v6325_v37  ;;  %v6328_v3 = vpack.c.bf16 %v369_v41, %v365_v11  ;;  %7477 = vst [vmem:[#allocation89_spill] sm:$0xff] %v6330_v31  ;;  %v6333_v38 = vpack.c.bf16 %v368_v55, %v364_v20  ;;  %v370_v41 = vld [vmem:[#allocation7 + $0x140] sm:$0xff]  ;;  %v372_v20 = vld [vmem:[#allocation7 + $0x150] sm:$0xff] }
  0x88   :  { %4271 = vmatpush1.bf16.msra.mxu0 %v6318_v40  ;;  %v371_v40 = vld [vmem:[#allocation7 + $0x148] sm:$0xff]  ;;  %v374_v11 = vld [vmem:[#allocation7 + $0x160] sm:$0xff]  ;;  %v376_v55 = vld [vmem:[#allocation7 + $0x170] sm:$0xff] }
  0x89   :  { %7476 = vst [vmem:[#allocation88_spill] sm:$0xff] %v6328_v3  ;;  %4273 = vmatprep.subr.bf16.mxu0 %v6325_v37  ;;  %7478 = vst [vmem:[#allocation90_spill] sm:$0xff] %v6333_v38  ;;  %v6337_v5 = vpack.c.bf16 %v375_v59, %v371_v40  ;;  %v6342_v28 = vpack.c.bf16 %v374_v11, %v370_v41  ;;  %v379_v37 = vld [vmem:[#allocation7 + $0x188] sm:$0xff]  ;;  %v385_v59 = vld [vmem:[#allocation7 + $0x1b8] sm:$0xff] }
  0x8a   :  { %4303 = vmatpush1.bf16.msra.mxu1 %v6321_v0  ;;  %v377_v0 = vld [vmem:[#allocation7 + $0x178] sm:$0xff]  ;;  %v6348_v40 = vpack.c.bf16 %v383_v33, %v379_v37  ;;  %v380_v41 = vld [vmem:[#allocation7 + $0x190] sm:$0xff]  ;;  %v391_v33 = vld [vmem:[#allocation7 + $0x1e8] sm:$0xff] }
  0x8b   :  { %4305 = vmatprep.subr.bf16.mxu1 %v6328_v3  ;;  %7479 = vst [vmem:[#allocation91_spill] sm:$0xff] %v6337_v5  ;;  %v6340_v54 = vpack.c.bf16 %v377_v0, %v373_v14  ;;  %7481 = vst [vmem:[#allocation93_spill] sm:$0xff] %v6342_v28  ;;  %v6345_v3 = vpack.c.bf16 %v376_v55, %v372_v20  ;;  %v384_v11 = vld [vmem:[#allocation7 + $0x1b0] sm:$0xff]  ;;  %v387_v20 = vld [vmem:[#allocation7 + $0x1c8] sm:$0xff] }
  0x8c   :  { %4275 = vmatpush1.bf16.msra.mxu0 %v6330_v31  ;;  %v381_v31 = vld [vmem:[#allocation7 + $0x198] sm:$0xff]  ;;  %7483 = vst [vmem:[#allocation95_spill] sm:$0xff] %v6348_v40  ;;  %v6357_v55 = vpack.c.bf16 %v384_v11, %v380_v41  ;;  %v99_v11 = vld [vmem:[#allocation2 + $0x8] sm:$0xff] }
  0x8d   :  { %7480 = vst [vmem:[#allocation92_spill] sm:$0xff] %v6340_v54  ;;  %4277 = vmatprep.subr.bf16.mxu0 %v6337_v5  ;;  %7482 = vst [vmem:[#allocation94_spill] sm:$0xff] %v6345_v3  ;;  %v6351_v0 = vpack.c.bf16 %v385_v59, %v381_v31  ;;  %v389_v37 = vld [vmem:[#allocation7 + $0x1d8] sm:$0xff]  ;;  %v6360_v5 = vpack.c.bf16 %v391_v33, %v387_v20  ;;  %v388_v59 = vld [vmem:[#allocation7 + $0x1d0] sm:$0xff] }
  0x8e   :  { %4307 = vmatpush1.bf16.msra.mxu1 %v6333_v38  ;;  %v382_v38 = vld [vmem:[#allocation7 + $0x1a0] sm:$0xff]  ;;  %7486 = vst [vmem:[#allocation98_spill] sm:$0xff] %v6357_v55 }
  0x8f   :  { %4309 = vmatprep.subr.bf16.mxu1 %v6340_v54  ;;  %7484 = vst [vmem:[#allocation96_spill] sm:$0xff] %v6351_v0  ;;  %v6353_v14 = vpack.c.bf16 %v382_v38, %v378_v13  ;;  %v393_v54 = vld [vmem:[#allocation7 + $0x1f8] sm:$0xff]  ;;  %7487 = vst [vmem:[#allocation99_spill] sm:$0xff] %v6360_v5  ;;  %v386_v13 = vld [vmem:[#allocation7 + $0x1c0] sm:$0xff] }
  0x90   :  { %4279 = vmatpush1.bf16.msra.mxu0 %v6342_v28  ;;  %v6362_v31 = vpack.c.bf16 %v393_v54, %v389_v37  ;;  %v390_v38 = vld [vmem:[#allocation7 + $0x1e0] sm:$0xff]  ;;  %v392_v28 = vld [vmem:[#allocation7 + $0x1f0] sm:$0xff] }
  0x91   :  { %7485 = vst [vmem:[#allocation97_spill] sm:$0xff] %v6353_v14  ;;  %4281 = vmatprep.subr.bf16.mxu0 %v6348_v40  ;;  %v6369_v41 = vpack.c.bf16 %v392_v28, %v388_v59  ;;  %v98_v54 = vld [vmem:[#allocation2] sm:$0xff] }
  0x92   :  { %4311 = vmatpush1.bf16.msra.mxu1 %v6345_v3  ;;  %7488 = vst [vmem:[#allocation100_spill] sm:$0xff] %v6362_v31  ;;  %v6365_v3 = vpack.c.bf16 %v390_v38, %v386_v13  ;;  %v101_v38 = vld [vmem:[#allocation2 + $0x18] sm:$0xff] }
  0x93   :  { %4313 = vmatprep.subr.bf16.mxu1 %v6351_v0  ;;  %7490 = vst [vmem:[#allocation102_spill] sm:$0xff] %v6369_v41 }
  0x94   :  { %4283 = vmatpush1.bf16.msra.mxu0 %v6353_v14  ;;  %7489 = vst [vmem:[#allocation101_spill] sm:$0xff] %v6365_v3 }
  0x95   :  { %4285 = vmatprep.subr.bf16.mxu0 %v6360_v5 }
  0x96   :  { %4315 = vmatpush1.bf16.msra.mxu1 %v6357_v55 }
  0x97   :  { %4317 = vmatprep.subr.bf16.mxu1 %v6362_v31 }
  0x98   :  { %4287 = vmatpush1.bf16.msra.mxu0 %v6365_v3  ;;  %v100_v3 = vld [vmem:[#allocation2 + $0x10] sm:$0xff] }
  0x99   :  { %4321 = vmatprep.subr.bf16.mxu0 %v6078_v4 }
  0x9a   :  { %4319 = vmatpush1.bf16.msra.mxu1 %v6369_v41 }
  0x9b   :  { %4353 = vmatprep.subr.bf16.mxu1 %v6088_v17 }
 0x12e   :  { %v232_v20 = vpop.f32.mrb[0].mxu0 }
 0x12f   :  { %v308_v33 = vadd.f32 %v232_v20, %v98_v54  ;;  %v234_v37 = vpop.f32.mrb[1].mxu0 }
 0x130   :  { %v309_v13 = vadd.f32 %v234_v37, %v99_v11  ;;  %v303_v28 = vpop.f32.mrb[0].mxu1 }
 0x131   :  { %v312_v5 = vmul.f32 0.5, %v308_v33  ;;  %v305_v55 = vpop.f32.mrb[1].mxu1  ;;  %v310_v41 = vadd.f32 %v303_v28, %v100_v3  ;;  %v7499_v28 = vld [vmem:[#allocation60_spill] sm:$0xff] }
 0x132   :  { %v313_v59 = vmul.f32 0.5, %v309_v13  ;;  %v311_v31 = vadd.f32 %v305_v55, %v101_v38  ;;  %v7498_v38 = vld [vmem:[#allocation58_spill] sm:$0xff] }
 0x133   :  { %5706 = vtanh.f32 %v312_v5  ;;  %v314_v4 = vmul.f32 0.5, %v310_v41  ;;  %v7497_v41 = vld [vmem:[#allocation59_spill] sm:$0xff] }
 0x134   :  { %5708 = vtanh.f32 %v313_v59  ;;  %v7500_v59 = vld [vmem:[#allocation61_spill] sm:$0xff] }
 0x135   :  { %5710 = vtanh.f32 %v311_v31 }
 0x136   :  { %5712 = vtanh.f32 %v314_v4  ;;  %v7491_v4 = vld [vmem:[#allocation51_spill] sm:$0xff] }
 0x13d   :  { %v5707_v14 = vpop.eup %5706 }
 0x13e   :  { %v5709_v17 = vpop.eup %5708  ;;  %v318_v0 = vmul.f32 0.5, %v5707_v14  ;;  %v7496_v14 = vld [vmem:[#allocation54_spill] sm:$0xff] }
 0x13f   :  { %v5711_v40 = vpop.eup %5710  ;;  %v319_v19 = vmul.f32 0.5, %v5709_v17  ;;  %v7492_v17 = vld [vmem:[#allocation50_spill] sm:$0xff] }
 0x140   :  { %v321_v54 = vadd.f32 0.5, %v318_v0  ;;  %v5713_v5 = vpop.eup %5712  ;;  %v7495_v0 = vld [vmem:[#allocation55_spill] sm:$0xff] }
 0x141   :  { %v322_v11 = vadd.f32 0.5, %v319_v19  ;;  %v320_v55 = vmul.f32 0.5, %v5713_v5  ;;  %v7493_v19 = vld [vmem:[#allocation52_spill] sm:$0xff]  ;;  %v7505_v5 = vld [vmem:[#allocation66_spill] sm:$0xff] }
 0x142   :  { %v326_v20 = vmul.f32 %v5711_v40, %v321_v54  ;;  %v7494_v40 = vld [vmem:[#allocation53_spill] sm:$0xff]  ;;  %v7501_v54 = vld [vmem:[#allocation63_spill] sm:$0xff] }
 0x143   :  { %v325_v33 = vmul.f32 0.0, %v322_v11  ;;  %v323_v13 = vadd.f32 0.5, %v320_v55  ;;  %v7502_v11 = vld [vmem:[#allocation62_spill] sm:$0xff]  ;;  %v7506_v55 = vld [vmem:[#allocation67_spill] sm:$0xff] }
 0x145   :  { %v6376_v37 = vadd.f32 %v326_v20, %v325_v33  ;;  %v7503_v20 = vld [vmem:[#allocation64_spill] sm:$0xff]  ;;  %v7504_v33 = vld [vmem:[#allocation65_spill] sm:$0xff] }
 0x147   :  { %5714 = vtanh.f32 %v6376_v37 }
 0x151   :  { %v5715_v31 = vpop.eup %5714 }
 0x152   :  { %v329_v3 = vmul.f32 %v5715_v31, %v323_v13  ;;  %v7507_v13 = vld [vmem:[#allocation68_spill] sm:$0xff]  ;;  %v7508_v31 = vld [vmem:[#allocation69_spill] sm:$0xff] }
 0x154   :  { %666 = vmatmul.mubr.f32.vlgmr.msra.gmra.mrb[2].mxu0 %v329_v3  ;;  %737 = vmatmul.mubr.f32.vlgmr.msra.gmra.mrb[2].mxu1 %v329_v3 }
 0x155   :  { %4323 = vmatpush1.bf16.msra.mxu0 %v6080_v8  ;;  %4355 = vmatpush1.bf16.msra.mxu1 %v6090_v18 }
 0x156   :  { %4325 = vmatprep.subr.bf16.mxu0 %v6082_v9  ;;  %4357 = vmatprep.subr.bf16.mxu1 %v6096_v26 }
 0x157   :  { %834 = vmatprep.mubr.f32.mxu0 %v7461_v47  ;;  %905 = vmatprep.mubr.f32.mxu1 %v7461_v47 }
 0x159   :  { %4327 = vmatpush1.bf16.msra.mxu0 %v6086_v16  ;;  %4359 = vmatpush1.bf16.msra.mxu1 %v6099_v30 }
 0x15a   :  { %4329 = vmatprep.subr.bf16.mxu0 %v6093_v22  ;;  %4361 = vmatprep.subr.bf16.mxu1 %v6108_v39 }
 0x15d   :  { %4331 = vmatpush1.bf16.msra.mxu0 %v6102_v32  ;;  %4363 = vmatpush1.bf16.msra.mxu1 %v6111_v44 }
 0x15e   :  { %4333 = vmatprep.subr.bf16.mxu0 %v6106_v36  ;;  %4365 = vmatprep.subr.bf16.mxu1 %v6117_v48 }
 0x161   :  { %4335 = vmatpush1.bf16.msra.mxu0 %v6114_v46  ;;  %4367 = vmatpush1.bf16.msra.mxu1 %v6123_v57 }
 0x162   :  { %4337 = vmatprep.subr.bf16.mxu0 %v6120_v51  ;;  %4369 = vmatprep.subr.bf16.mxu1 %v6129_v60 }
 0x165   :  { %4339 = vmatpush1.bf16.msra.mxu0 %v6126_v58  ;;  %4371 = vmatpush1.bf16.msra.mxu1 %v6135_v7 }
 0x166   :  { %4341 = vmatprep.subr.bf16.mxu0 %v6132_v63  ;;  %4373 = vmatprep.subr.bf16.mxu1 %v6141_v12 }
 0x169   :  { %4343 = vmatpush1.bf16.msra.mxu0 %v6138_v10  ;;  %4375 = vmatpush1.bf16.msra.mxu1 %v6147_v25 }
 0x16a   :  { %4345 = vmatprep.subr.bf16.mxu0 %v6144_v15  ;;  %4377 = vmatprep.subr.bf16.mxu1 %v6153_v29 }
 0x16d   :  { %4347 = vmatpush1.bf16.msra.mxu0 %v6150_v27  ;;  %4379 = vmatpush1.bf16.msra.mxu1 %v6159_v42 }
 0x16e   :  { %4349 = vmatprep.subr.bf16.mxu0 %v6156_v34  ;;  %4381 = vmatprep.subr.bf16.mxu1 %v6165_v45 }
 0x171   :  { %4351 = vmatpush1.bf16.msra.mxu0 %v6162_v43  ;;  %4383 = vmatpush1.bf16.msra.mxu1 %v6171_v61 }
 0x172   :  { %4385 = vmatprep.subr.bf16.mxu0 %v6168_v52  ;;  %4417 = vmatprep.subr.bf16.mxu1 %v6175_v62 }
 0x174   :  { %835 = vmatmul.mubr.f32.vlgmr.msra.gmra.mrb[4].mxu0 %v329_v3  ;;  %906 = vmatmul.mubr.f32.vlgmr.msra.gmra.mrb[4].mxu1 %v329_v3  ;;  %v7509_v3 = vld [vmem:[#allocation70_spill] sm:$0xff] }
 0x175   :  { %4387 = vmatpush1.bf16.msra.mxu0 %v6177_v1  ;;  %4419 = vmatpush1.bf16.msra.mxu1 %v6184_v21 }
 0x176   :  { %4389 = vmatprep.subr.bf16.mxu0 %v6180_v6  ;;  %4421 = vmatprep.subr.bf16.mxu1 %v6188_v23 }
 0x177   :  { %998 = vmatprep.mubr.f32.mxu0 %v7461_v47  ;;  %1069 = vmatprep.mubr.f32.mxu1 %v7461_v47 }
 0x179   :  { %4391 = vmatpush1.bf16.msra.mxu0 %v6190_v24  ;;  %4423 = vmatpush1.bf16.msra.mxu1 %v6198_v49 }
 0x17a   :  { %4393 = vmatprep.subr.bf16.mxu0 %v6193_v35  ;;  %4425 = vmatprep.subr.bf16.mxu1 %v6203_v50 }
 0x17d   :  { %4395 = vmatpush1.bf16.msra.mxu0 %v6205_v53  ;;  %4427 = vmatpush1.bf16.msra.mxu1 %v7491_v4 }
 0x17e   :  { %4397 = vmatprep.subr.bf16.mxu0 %v7492_v17  ;;  %4429 = vmatprep.subr.bf16.mxu1 %v7493_v19 }
 0x181   :  { %4399 = vmatpush1.bf16.msra.mxu0 %v7494_v40  ;;  %4431 = vmatpush1.bf16.msra.mxu1 %v7495_v0 }
 0x182   :  { %4401 = vmatprep.subr.bf16.mxu0 %v7496_v14  ;;  %4433 = vmatprep.subr.bf16.mxu1 %v6227_v56 }
 0x185   :  { %4403 = vmatpush1.bf16.msra.mxu0 %v6229_v2  ;;  %4435 = vmatpush1.bf16.msra.mxu1 %v7497_v41 }
 0x186   :  { %4405 = vmatprep.subr.bf16.mxu0 %v7498_v38  ;;  %4437 = vmatprep.subr.bf16.mxu1 %v7499_v28  ;;  %v7510_v28 = vld [vmem:[#allocation71_spill] sm:$0xff] }
 0x189   :  { %4407 = vmatpush1.bf16.msra.mxu0 %v7500_v59  ;;  %4439 = vmatpush1.bf16.msra.mxu1 %v7501_v54  ;;  %v7511_v59 = vld [vmem:[#allocation72_spill] sm:$0xff]  ;;  %v72_v54 = vlaneseq }
 0x18a   :  { %4409 = vmatprep.subr.bf16.mxu0 %v7502_v11  ;;  %4441 = vmatprep.subr.bf16.mxu1 %v7503_v20 }
 0x18b   :  { %v73_v11 = vshrl.u32 %v72_v54, 7 }
 0x18d   :  { %4411 = vmatpush1.bf16.msra.mxu0 %v7504_v33  ;;  %4443 = vmatpush1.bf16.msra.mxu1 %v7505_v5  ;;  %v74_v38 = vsub.s32 0, %v73_v11  ;;  %v70_v33 = vld [vmem:[%s7214_s3] sm:$0xf]  ;;  %v78_v5 = vsub.s32 1, %v73_v11  ;;  %v82_v54 = vsub.s32 2, %v73_v11  ;;  %s5990_s3 = smov [#allocation9]  }
 0x18e   :  { %4413 = vmatprep.subr.bf16.mxu0 %v7506_v55  ;;  %4445 = vmatprep.subr.bf16.mxu1 %v7507_v13  ;;  %v86_v55 = vsub.s32 3, %v73_v11  ;;  %s4111_s30 = sshll.u32 %s5990_s3, 4  ;;  %s4112_s30 = int_to_ptr.vmem [resolvable:$true] %s4111_s30 }
 0x18f   :  { %v6450_v20 = vrot.slane %v70_v33, %v74_v38  ;;  %v6452_v13 = vrot.slane %v70_v33, %v78_v5  ;;  %v6459_v40 = vrot.slane %v70_v33, %v82_v54  ;;  %v767_v54 = vld [vmem:[#allocation2 + $0x28] sm:$0xff]  ;;  %s5932_s6 = scalar_lea.vmem %s4112_s30, 256  ;;  %p5937_p11 = scmp.lt.s32.totalorder %s4112_s30, %s4112_s30 }
 0x190   :  { %v6455_v2 = vrot.slane %v70_v33, %v86_v55  ;;  %p5933_p10 = scmp.ne.s32.totalorder %s4112_s30, %s5932_s6  ;;  %p5938_p12 = scmp.lt.s32.totalorder %s5932_s6, %s5932_s6 }
 0x191   :  { %4415 = vmatpush1.bf16.msra.mxu0 %v7508_v31  ;;  %4447 = vmatpush1.bf16.msra.mxu1 %v7509_v3  ;;  %7512 = vst [vmem:[#allocation103_spill] sm:$0xff] %v6450_v20  ;;  %7514 = vst [vmem:[#allocation105_spill] sm:$0xff] %v6459_v40 }
 0x192   :  { %4449 = vmatprep.subr.bf16.mxu0 %v7510_v28  ;;  %4481 = vmatprep.subr.bf16.mxu1 %v7511_v59  ;;  %7513 = vst [vmem:[#allocation104_spill] sm:$0xff] %v6455_v2  ;;  %p5939_p13 = por %p5938_p12, %p5937_p11 }
 0x194   :  { %p5940_p0 = pnand %p5939_p13, %p5933_p10 }
 0x227   :  { %v667_v31 = vpop.f32.mrb[2].mxu0  ;;  %v738_v41 = vpop.f32.mrb[2].mxu1 }
 0x228   :  { %v743_v3 = vadd.f32 %v667_v31, %v6450_v20  ;;  %v669_v28 = vpop.f32.mrb[3].mxu0  ;;  %v740_v59 = vpop.f32.mrb[3].mxu1  ;;  %v745_v5 = vadd.f32 %v738_v41, %v6459_v40 }
 0x229   :  { %v744_v56 = vadd.f32 %v669_v28, %v6452_v13  ;;  %v746_v38 = vadd.f32 %v740_v59, %v6455_v2 }
 0x22a   :  { %v747_v14 = vmul.f32 0.5, %v743_v3  ;;  %v749_v19 = vmul.f32 0.5, %v745_v5 }
 0x22b   :  { %v748_v0 = vmul.f32 0.5, %v744_v56 }
 0x22c   :  { %5716 = vtanh.f32 %v747_v14 }
 0x22d   :  { %5718 = vtanh.f32 %v748_v0  ;;  %v766_v0 = vld [vmem:[#allocation2 + $0x20] sm:$0xff] }
 0x22e   :  { %5720 = vtanh.f32 %v746_v38 }
 0x22f   :  { %5722 = vtanh.f32 %v749_v19  ;;  %v769_v19 = vld [vmem:[#allocation2 + $0x38] sm:$0xff] }
 0x236   :  { %v5717_v31 = vpop.eup %5716 }
 0x237   :  { %v753_v20 = vmul.f32 0.5, %v5717_v31  ;;  %v5719_v55 = vpop.eup %5718 }
 0x238   :  { %v754_v11 = vmul.f32 0.5, %v5719_v55  ;;  %v5721_v4 = vpop.eup %5720 }
 0x239   :  { %v756_v17 = vadd.f32 0.5, %v753_v20  ;;  %v5723_v59 = vpop.eup %5722 }
 0x23a   :  { %v757_v28 = vadd.f32 0.5, %v754_v11  ;;  %v755_v33 = vmul.f32 0.5, %v5723_v59  ;;  %v7516_v59 = vld [vmem:[#allocation74_spill] sm:$0xff] }
 0x23b   :  { %v761_v3 = vmul.f32 %v5721_v4, %v756_v17 }
 0x23c   :  { %v760_v56 = vmul.f32 0.0, %v757_v28  ;;  %v758_v55 = vadd.f32 0.5, %v755_v33 }
 0x23e   :  { %v6462_v14 = vadd.f32 %v761_v3, %v760_v56  ;;  %v768_v3 = vld [vmem:[#allocation2 + $0x30] sm:$0xff] }
 0x23f   :  { %v7515_v56 = vld [vmem:[#allocation73_spill] sm:$0xff] }
 0x240   :  { %5724 = vtanh.f32 %v6462_v14 }
 0x247   :  { %v836_v41 = vpop.f32.mrb[4].mxu0  ;;  %v907_v38 = vpop.f32.mrb[4].mxu1 }
 0x248   :  { %v912_v5 = vadd.f32 %v836_v41, %v766_v0  ;;  %v838_v31 = vpop.f32.mrb[5].mxu0  ;;  %v909_v40 = vpop.f32.mrb[5].mxu1  ;;  %v7517_v0 = vld [vmem:[#allocation75_spill] sm:$0xff]  ;;  %v914_v33 = vadd.f32 %v907_v38, %v768_v3 }
 0x249   :  { %v913_v20 = vadd.f32 %v838_v31, %v767_v54  ;;  %v915_v17 = vadd.f32 %v909_v40, %v769_v19  ;;  %v7518_v54 = vld [vmem:[#allocation76_spill] sm:$0xff]  ;;  %v7520_v40 = vld [vmem:[#allocation78_spill] sm:$0xff]  ;;  %v7521_v41 = vld [vmem:[#allocation79_spill] sm:$0xff] }
 0x24a   :  { %v916_v2 = vmul.f32 0.5, %v912_v5  ;;  %v5725_v11 = vpop.eup %5724  ;;  %v7522_v5 = vld [vmem:[#allocation80_spill] sm:$0xff]  ;;  %v918_v31 = vmul.f32 0.5, %v914_v33  ;;  %v7528_v33 = vld [vmem:[#allocation86_spill] sm:$0xff] }
 0x24b   :  { %v917_v4 = vmul.f32 0.5, %v913_v20  ;;  %v764_v28 = vmul.f32 %v5725_v11, %v758_v55  ;;  %v7523_v55 = vld [vmem:[#allocation81_spill] sm:$0xff]  ;;  %v7524_v11 = vld [vmem:[#allocation82_spill] sm:$0xff] }
 0x24c   :  { %5726 = vtanh.f32 %v916_v2  ;;  %v7519_v2 = vld [vmem:[#allocation77_spill] sm:$0xff] }
 0x24d   :  { %5728 = vtanh.f32 %v917_v4  ;;  %999 = vmatmul.mubr.f32.vlgmr.msra.gmra.mrb[6].mxu0 %v764_v28  ;;  %1070 = vmatmul.mubr.f32.vlgmr.msra.gmra.mrb[6].mxu1 %v764_v28  ;;  %v7525_v4 = vld [vmem:[#allocation83_spill] sm:$0xff] }
 0x24e   :  { %4451 = vmatpush1.bf16.msra.mxu0 %v7515_v56  ;;  %4483 = vmatpush1.bf16.msra.mxu1 %v7516_v59  ;;  %5730 = vtanh.f32 %v915_v17  ;;  %v7526_v17 = vld [vmem:[#allocation84_spill] sm:$0xff] }
 0x24f   :  { %4453 = vmatprep.subr.bf16.mxu0 %v7517_v0  ;;  %4485 = vmatprep.subr.bf16.mxu1 %v7518_v54  ;;  %5732 = vtanh.f32 %v918_v31  ;;  %v7527_v54 = vld [vmem:[#allocation85_spill] sm:$0xff]  ;;  %v7534_v31 = vld [vmem:[#allocation91_spill] sm:$0xff] }
 0x250   :  { %1140 = vmatprep.mubr.f32.mxu0 %v7461_v47  ;;  %1211 = vmatprep.mubr.f32.mxu1 %v7461_v47 }
 0x252   :  { %4455 = vmatpush1.bf16.msra.mxu0 %v7519_v2  ;;  %4487 = vmatpush1.bf16.msra.mxu1 %v7520_v40 }
 0x253   :  { %4457 = vmatprep.subr.bf16.mxu0 %v7521_v41  ;;  %4489 = vmatprep.subr.bf16.mxu1 %v7522_v5 }
 0x256   :  { %v5727_v20 = vpop.eup %5726  ;;  %4459 = vmatpush1.bf16.msra.mxu0 %v7523_v55  ;;  %4491 = vmatpush1.bf16.msra.mxu1 %v7524_v11  ;;  %v7530_v55 = vld [vmem:[#allocation88_spill] sm:$0xff] }
 0x257   :  { %v922_v19 = vmul.f32 0.5, %v5727_v20  ;;  %v5729_v38 = vpop.eup %5728  ;;  %4461 = vmatprep.subr.bf16.mxu0 %v7525_v4  ;;  %4493 = vmatprep.subr.bf16.mxu1 %v7526_v17  ;;  %v7529_v20 = vld [vmem:[#allocation87_spill] sm:$0xff]  ;;  %v7532_v4 = vld [vmem:[#allocation89_spill] sm:$0xff] }
 0x258   :  { %v923_v3 = vmul.f32 0.5, %v5729_v38  ;;  %v5731_v40 = vpop.eup %5730  ;;  %v7535_v38 = vld [vmem:[#allocation92_spill] sm:$0xff] }
 0x259   :  { %v925_v28 = vadd.f32 0.5, %v922_v19  ;;  %v7533_v19 = vld [vmem:[#allocation90_spill] sm:$0xff] }
 0x25a   :  { %v926_v2 = vadd.f32 0.5, %v923_v3  ;;  %4463 = vmatpush1.bf16.msra.mxu0 %v7527_v54  ;;  %4495 = vmatpush1.bf16.msra.mxu1 %v7528_v33  ;;  %v7537_v3 = vld [vmem:[#allocation94_spill] sm:$0xff] }
 0x25b   :  { %v930_v41 = vmul.f32 %v5731_v40, %v925_v28  ;;  %4465 = vmatprep.subr.bf16.mxu0 %v7529_v20  ;;  %4497 = vmatprep.subr.bf16.mxu1 %v7530_v55  ;;  %v5733_v40 = vpop.eup %5732  ;;  %v7536_v28 = vld [vmem:[#allocation93_spill] sm:$0xff]  ;;  %v7538_v55 = vld [vmem:[#allocation95_spill] sm:$0xff] }
 0x25c   :  { %v929_v11 = vmul.f32 %v926_v2, %v6376_v37  ;;  %v7539_v37 = vld [vmem:[#allocation96_spill] sm:$0xff]  ;;  %v924_v2 = vmul.f32 0.5, %v5733_v40  ;;  %v7546_v20 = vld [vmem:[#allocation15_spill] sm:$0xff] }
 0x25d   :  { %v7550_v40 = vld [vmem:[#allocation52_spill] sm:$0xff] }
 0x25e   :  { %v6484_v5 = vadd.f32 %v930_v41, %v929_v11  ;;  %4467 = vmatpush1.bf16.msra.mxu0 %v7532_v4  ;;  %4499 = vmatpush1.bf16.msra.mxu1 %v7533_v19  ;;  %v7540_v41 = vld [vmem:[#allocation97_spill] sm:$0xff]  ;;  %v7541_v11 = vld [vmem:[#allocation98_spill] sm:$0xff]  ;;  %v7542_v19 = vld [vmem:[#allocation99_spill] sm:$0xff] }
 0x25f   :  { %4469 = vmatprep.subr.bf16.mxu0 %v7534_v31  ;;  %4501 = vmatprep.subr.bf16.mxu1 %v7535_v38  ;;  %v7543_v31 = vld [vmem:[#allocation100_spill] sm:$0xff]  ;;  %v927_v38 = vadd.f32 0.5, %v924_v2  ;;  %v7552_v2 = vld [vmem:[#allocation55_spill] sm:$0xff] }
 0x260   :  { %7531 = vst [vmem:[#allocation73_spill] sm:$0xff] %v6484_v5  ;;  %5734 = vtanh.f32 %v6484_v5  ;;  %v7544_v5 = vld [vmem:[#allocation101_spill] sm:$0xff] }
 0x262   :  { %4471 = vmatpush1.bf16.msra.mxu0 %v7536_v28  ;;  %4503 = vmatpush1.bf16.msra.mxu1 %v7537_v3  ;;  %v7545_v28 = vld [vmem:[#allocation102_spill] sm:$0xff] }
 0x263   :  { %4473 = vmatprep.subr.bf16.mxu0 %v7538_v55  ;;  %4505 = vmatprep.subr.bf16.mxu1 %v7539_v37  ;;  %v7547_v55 = vld [vmem:[#allocation16_spill] sm:$0xff] }
 0x266   :  { %4475 = vmatpush1.bf16.msra.mxu0 %v7540_v41  ;;  %4507 = vmatpush1.bf16.msra.mxu1 %v7541_v11 }
 0x267   :  { %4477 = vmatprep.subr.bf16.mxu0 %v7542_v19  ;;  %4509 = vmatprep.subr.bf16.mxu1 %v7543_v31 }
 0x26a   :  { %v5735_v4 = vpop.eup %5734  ;;  %4479 = vmatpush1.bf16.msra.mxu0 %v7544_v5  ;;  %4511 = vmatpush1.bf16.msra.mxu1 %v7545_v28 }
 0x26b   :  { %v933_v3 = vmul.f32 %v5735_v4, %v927_v38  ;;  %4513 = vmatprep.subr.bf16.mxu0 %v7546_v20  ;;  %4545 = vmatprep.subr.bf16.mxu1 %v7547_v55  ;;  %v7548_v4 = vld [vmem:[#allocation51_spill] sm:$0xff]  ;;  %v7549_v38 = vld [vmem:[#allocation50_spill] sm:$0xff] }
 0x26d   :  { %1141 = vmatmul.mubr.f32.vlgmr.msra.gmra.mrb[6].mxu0 %v933_v3  ;;  %1212 = vmatmul.mubr.f32.vlgmr.msra.gmra.mrb[6].mxu1 %v933_v3 }
 0x26e   :  { %4515 = vmatpush1.bf16.msra.mxu0 %v6080_v8  ;;  %4547 = vmatpush1.bf16.msra.mxu1 %v6090_v18 }
 0x26f   :  { %4517 = vmatprep.subr.bf16.mxu0 %v6082_v9  ;;  %4549 = vmatprep.subr.bf16.mxu1 %v6096_v26 }
 0x270   :  { %1309 = vmatprep.mubr.f32.mxu0 %v7461_v47  ;;  %1380 = vmatprep.mubr.f32.mxu1 %v7461_v47 }
 0x272   :  { %4519 = vmatpush1.bf16.msra.mxu0 %v6086_v16  ;;  %4551 = vmatpush1.bf16.msra.mxu1 %v6099_v30 }
 0x273   :  { %4521 = vmatprep.subr.bf16.mxu0 %v6093_v22  ;;  %4553 = vmatprep.subr.bf16.mxu1 %v6108_v39 }
 0x276   :  { %4523 = vmatpush1.bf16.msra.mxu0 %v6102_v32  ;;  %4555 = vmatpush1.bf16.msra.mxu1 %v6111_v44 }
 0x277   :  { %4525 = vmatprep.subr.bf16.mxu0 %v6106_v36  ;;  %4557 = vmatprep.subr.bf16.mxu1 %v6117_v48 }
 0x27a   :  { %4527 = vmatpush1.bf16.msra.mxu0 %v6114_v46  ;;  %4559 = vmatpush1.bf16.msra.mxu1 %v6123_v57 }
 0x27b   :  { %4529 = vmatprep.subr.bf16.mxu0 %v6120_v51  ;;  %4561 = vmatprep.subr.bf16.mxu1 %v6129_v60 }
 0x27e   :  { %4531 = vmatpush1.bf16.msra.mxu0 %v6126_v58  ;;  %4563 = vmatpush1.bf16.msra.mxu1 %v6135_v7 }
 0x27f   :  { %4533 = vmatprep.subr.bf16.mxu0 %v6132_v63  ;;  %4565 = vmatprep.subr.bf16.mxu1 %v6141_v12 }
 0x282   :  { %4535 = vmatpush1.bf16.msra.mxu0 %v6138_v10  ;;  %4567 = vmatpush1.bf16.msra.mxu1 %v6147_v25 }
 0x283   :  { %4537 = vmatprep.subr.bf16.mxu0 %v6144_v15  ;;  %4569 = vmatprep.subr.bf16.mxu1 %v6153_v29 }
 0x286   :  { %4539 = vmatpush1.bf16.msra.mxu0 %v6150_v27  ;;  %4571 = vmatpush1.bf16.msra.mxu1 %v6159_v42 }
 0x287   :  { %4541 = vmatprep.subr.bf16.mxu0 %v6156_v34  ;;  %4573 = vmatprep.subr.bf16.mxu1 %v6165_v45 }
 0x28a   :  { %4543 = vmatpush1.bf16.msra.mxu0 %v6162_v43  ;;  %4575 = vmatpush1.bf16.msra.mxu1 %v6171_v61 }
 0x28b   :  { %4577 = vmatprep.subr.bf16.mxu0 %v6168_v52  ;;  %4609 = vmatprep.subr.bf16.mxu1 %v6175_v62 }
 0x28d   :  { %1310 = vmatmul.mubr.f32.vlgmr.msra.gmra.mrb[8].mxu0 %v933_v3  ;;  %1381 = vmatmul.mubr.f32.vlgmr.msra.gmra.mrb[8].mxu1 %v933_v3  ;;  %v7551_v3 = vld [vmem:[#allocation53_spill] sm:$0xff] }
 0x28e   :  { %4579 = vmatpush1.bf16.msra.mxu0 %v6177_v1  ;;  %4611 = vmatpush1.bf16.msra.mxu1 %v6184_v21 }
 0x28f   :  { %4581 = vmatprep.subr.bf16.mxu0 %v6180_v6  ;;  %4613 = vmatprep.subr.bf16.mxu1 %v6188_v23  ;;  %v7553_v23 = vld [vmem:[#allocation54_spill] sm:$0xff]  ;;  %v7571_v6 = vld [vmem:[#allocation103_spill] sm:$0xff] }
 0x290   :  { %1473 = vmatprep.mubr.f32.mxu0 %v7461_v47  ;;  %1544 = vmatprep.mubr.f32.mxu1 %v7461_v47 }
 0x292   :  { %4583 = vmatpush1.bf16.msra.mxu0 %v6190_v24  ;;  %4615 = vmatpush1.bf16.msra.mxu1 %v6198_v49  ;;  %v7554_v24 = vld [vmem:[#allocation56_spill] sm:$0xff]  ;;  %v7555_v49 = vld [vmem:[#allocation57_spill] sm:$0xff] }
 0x293   :  { %4585 = vmatprep.subr.bf16.mxu0 %v6193_v35  ;;  %4617 = vmatprep.subr.bf16.mxu1 %v6203_v50  ;;  %v7556_v35 = vld [vmem:[#allocation59_spill] sm:$0xff]  ;;  %v7557_v50 = vld [vmem:[#allocation58_spill] sm:$0xff] }
 0x296   :  { %4587 = vmatpush1.bf16.msra.mxu0 %v6205_v53  ;;  %4619 = vmatpush1.bf16.msra.mxu1 %v7548_v4  ;;  %v7558_v53 = vld [vmem:[#allocation60_spill] sm:$0xff]  ;;  %v7559_v4 = vld [vmem:[#allocation61_spill] sm:$0xff] }
 0x297   :  { %4589 = vmatprep.subr.bf16.mxu0 %v7549_v38  ;;  %4621 = vmatprep.subr.bf16.mxu1 %v7550_v40  ;;  %v7560_v38 = vld [vmem:[#allocation63_spill] sm:$0xff]  ;;  %v7561_v40 = vld [vmem:[#allocation62_spill] sm:$0xff] }
 0x29a   :  { %4591 = vmatpush1.bf16.msra.mxu0 %v7551_v3  ;;  %4623 = vmatpush1.bf16.msra.mxu1 %v7552_v2  ;;  %v7562_v3 = vld [vmem:[#allocation64_spill] sm:$0xff]  ;;  %v7563_v2 = vld [vmem:[#allocation65_spill] sm:$0xff] }
 0x29b   :  { %4593 = vmatprep.subr.bf16.mxu0 %v7553_v23  ;;  %4625 = vmatprep.subr.bf16.mxu1 %v7554_v24  ;;  %v7564_v23 = vld [vmem:[#allocation66_spill] sm:$0xff]  ;;  %v7565_v24 = vld [vmem:[#allocation67_spill] sm:$0xff] }
 0x29e   :  { %4595 = vmatpush1.bf16.msra.mxu0 %v7555_v49  ;;  %4627 = vmatpush1.bf16.msra.mxu1 %v7556_v35  ;;  %v7566_v49 = vld [vmem:[#allocation68_spill] sm:$0xff]  ;;  %v7567_v35 = vld [vmem:[#allocation69_spill] sm:$0xff] }
 0x29f   :  { %4597 = vmatprep.subr.bf16.mxu0 %v7557_v50  ;;  %4629 = vmatprep.subr.bf16.mxu1 %v7558_v53  ;;  %v7568_v50 = vld [vmem:[#allocation70_spill] sm:$0xff]  ;;  %v7569_v53 = vld [vmem:[#allocation71_spill] sm:$0xff] }
 0x2a2   :  { %4599 = vmatpush1.bf16.msra.mxu0 %v7559_v4  ;;  %4631 = vmatpush1.bf16.msra.mxu1 %v7560_v38  ;;  %v7570_v4 = vld [vmem:[#allocation72_spill] sm:$0xff] }
 0x2a3   :  { %4601 = vmatprep.subr.bf16.mxu0 %v7561_v40  ;;  %4633 = vmatprep.subr.bf16.mxu1 %v7562_v3 }
 0x2a6   :  { %4603 = vmatpush1.bf16.msra.mxu0 %v7563_v2  ;;  %4635 = vmatpush1.bf16.msra.mxu1 %v7564_v23 }
 0x2a7   :  { %4605 = vmatprep.subr.bf16.mxu0 %v7565_v24  ;;  %4637 = vmatprep.subr.bf16.mxu1 %v7566_v49  ;;  %v7572_v49 = vld [vmem:[#allocation104_spill] sm:$0xff] }
 0x2aa   :  { %4607 = vmatpush1.bf16.msra.mxu0 %v7567_v35  ;;  %4639 = vmatpush1.bf16.msra.mxu1 %v7568_v50  ;;  %v7573_v50 = vld [vmem:[#allocation105_spill] sm:$0xff] }
 0x2ab   :  { %4641 = vmatprep.subr.bf16.mxu0 %v7569_v53  ;;  %4673 = vmatprep.subr.bf16.mxu1 %v7570_v4 }
 0x340   :  { %v1142_v38 = vpop.f32.mrb[6].mxu0  ;;  %v1213_v40 = vpop.f32.mrb[6].mxu1 }
 0x341   :  { %v1218_v3 = vadd.f32 %v1142_v38, %v7571_v6  ;;  %v1144_v21 = vpop.f32.mrb[7].mxu0  ;;  %v1215_v2 = vpop.f32.mrb[7].mxu1  ;;  %v1220_v35 = vadd.f32 %v1213_v40, %v7573_v50  ;;  %v1242_v40 = vld [vmem:[#allocation2 + $0x48] sm:$0xff] }
 0x342   :  { %v1219_v23 = vadd.f32 %v1144_v21, %v6452_v13  ;;  %v1221_v62 = vadd.f32 %v1215_v2, %v7572_v49 }
 0x343   :  { %v1222_v1 = vmul.f32 0.5, %v1218_v3  ;;  %v1224_v53 = vmul.f32 0.5, %v1220_v35 }
 0x344   :  { %v1223_v24 = vmul.f32 0.5, %v1219_v23 }
 0x345   :  { %5736 = vtanh.f32 %v1222_v1 }
 0x346   :  { %5738 = vtanh.f32 %v1223_v24 }
 0x347   :  { %5740 = vtanh.f32 %v1221_v62  ;;  %v1241_v62 = vld [vmem:[#allocation2 + $0x40] sm:$0xff] }
 0x348   :  { %5742 = vtanh.f32 %v1224_v53 }
 0x34f   :  { %v5737_v52 = vpop.eup %5736 }
 0x350   :  { %v1228_v4 = vmul.f32 0.5, %v5737_v52  ;;  %v5739_v61 = vpop.eup %5738 }
 0x351   :  { %v1229_v38 = vmul.f32 0.5, %v5739_v61  ;;  %v5741_v6 = vpop.eup %5740  ;;  %v1244_v61 = vld [vmem:[#allocation2 + $0x58] sm:$0xff] }
 0x352   :  { %v1231_v43 = vadd.f32 0.5, %v1228_v4  ;;  %v5743_v1 = vpop.eup %5742 }
 0x353   :  { %v1232_v45 = vadd.f32 0.5, %v1229_v38  ;;  %v1230_v24 = vmul.f32 0.5, %v5743_v1 }
 0x354   :  { %v1236_v34 = vmul.f32 %v5741_v6, %v1231_v43 }
 0x355   :  { %v1235_v21 = vmul.f32 %v1232_v45, %v6462_v14  ;;  %v1233_v50 = vadd.f32 0.5, %v1230_v24  ;;  %v1243_v14 = vld [vmem:[#allocation2 + $0x50] sm:$0xff]  ;;  %v7577_v24 = vld [vmem:[#allocation79_spill] sm:$0xff] }
 0x357   :  { %v6576_v23 = vadd.f32 %v1236_v34, %v1235_v21  ;;  %v7574_v21 = vld [vmem:[#allocation76_spill] sm:$0xff] }
 0x359   :  { %5744 = vtanh.f32 %v6576_v23 }
 0x360   :  { %v1311_v35 = vpop.f32.mrb[8].mxu0  ;;  %v1382_v3 = vpop.f32.mrb[8].mxu1 }
 0x361   :  { %v1387_v52 = vadd.f32 %v1311_v35, %v1241_v62  ;;  %v1313_v2 = vpop.f32.mrb[9].mxu0  ;;  %v1384_v4 = vpop.f32.mrb[9].mxu1  ;;  %v1389_v1 = vadd.f32 %v1382_v3, %v1243_v14  ;;  %v7575_v62 = vld [vmem:[#allocation77_spill] sm:$0xff]  ;;  %v7582_v14 = vld [vmem:[#allocation87_spill] sm:$0xff] }
 0x362   :  { %v1388_v53 = vadd.f32 %v1313_v2, %v1242_v40  ;;  %v1390_v34 = vadd.f32 %v1384_v4, %v1244_v61  ;;  %v7578_v40 = vld [vmem:[#allocation80_spill] sm:$0xff]  ;;  %v7579_v4 = vld [vmem:[#allocation81_spill] sm:$0xff]  ;;  %v7581_v61 = vld [vmem:[#allocation83_spill] sm:$0xff] }
 0x363   :  { %v1391_v38 = vmul.f32 0.5, %v1387_v52  ;;  %v5745_v43 = vpop.eup %5744  ;;  %v1393_v35 = vmul.f32 0.5, %v1389_v1  ;;  %v7583_v1 = vld [vmem:[#allocation88_spill] sm:$0xff] }
 0x364   :  { %v1392_v6 = vmul.f32 0.5, %v1388_v53  ;;  %v1239_v45 = vmul.f32 %v5745_v43, %v1233_v50  ;;  %v7576_v50 = vld [vmem:[#allocation78_spill] sm:$0xff] }
 0x365   :  { %5746 = vtanh.f32 %v1391_v38  ;;  %v7580_v53 = vld [vmem:[#allocation82_spill] sm:$0xff] }
 0x366   :  { %5748 = vtanh.f32 %v1392_v6  ;;  %1474 = vmatmul.mubr.f32.vlgmr.msra.gmra.mrb[10].mxu0 %v1239_v45  ;;  %1545 = vmatmul.mubr.f32.vlgmr.msra.gmra.mrb[10].mxu1 %v1239_v45 }
 0x367   :  { %4643 = vmatpush1.bf16.msra.mxu0 %v7515_v56  ;;  %4675 = vmatpush1.bf16.msra.mxu1 %v7516_v59  ;;  %5750 = vtanh.f32 %v1390_v34 }
 0x368   :  { %4645 = vmatprep.subr.bf16.mxu0 %v7517_v0  ;;  %4677 = vmatprep.subr.bf16.mxu1 %v7574_v21  ;;  %5752 = vtanh.f32 %v1393_v35  ;;  %v7587_v35 = vld [vmem:[#allocation91_spill] sm:$0xff] }
 0x369   :  { %1615 = vmatprep.mubr.f32.mxu0 %v7461_v47  ;;  %1686 = vmatprep.mubr.f32.mxu1 %v7461_v47 }
 0x36b   :  { %4647 = vmatpush1.bf16.msra.mxu0 %v7575_v62  ;;  %4679 = vmatpush1.bf16.msra.mxu1 %v7576_v50 }
 0x36c   :  { %4649 = vmatprep.subr.bf16.mxu0 %v7577_v24  ;;  %4681 = vmatprep.subr.bf16.mxu1 %v7578_v40 }
 0x36f   :  { %v5747_v52 = vpop.eup %5746  ;;  %4651 = vmatpush1.bf16.msra.mxu0 %v7579_v4  ;;  %4683 = vmatpush1.bf16.msra.mxu1 %v7580_v53 }
 0x370   :  { %v1397_v2 = vmul.f32 0.5, %v5747_v52  ;;  %v5749_v3 = vpop.eup %5748  ;;  %4653 = vmatprep.subr.bf16.mxu0 %v7581_v61  ;;  %4685 = vmatprep.subr.bf16.mxu1 %v7526_v17  ;;  %v7584_v52 = vld [vmem:[#allocation73_spill] sm:$0xff] }
 0x371   :  { %v1398_v43 = vmul.f32 0.5, %v5749_v3  ;;  %v5751_v6 = vpop.eup %5750  ;;  %v7585_v61 = vld [vmem:[#allocation89_spill] sm:$0xff]  ;;  %v7588_v3 = vld [vmem:[#allocation92_spill] sm:$0xff] }
 0x372   :  { %v1400_v38 = vadd.f32 0.5, %v1397_v2  ;;  %v7586_v2 = vld [vmem:[#allocation90_spill] sm:$0xff] }
 0x373   :  { %v1401_v34 = vadd.f32 0.5, %v1398_v43  ;;  %4655 = vmatpush1.bf16.msra.mxu0 %v7527_v54  ;;  %4687 = vmatpush1.bf16.msra.mxu1 %v7528_v33  ;;  %v7589_v43 = vld [vmem:[#allocation93_spill] sm:$0xff] }
 0x374   :  { %v1405_v45 = vmul.f32 %v5751_v6, %v1400_v38  ;;  %4657 = vmatprep.subr.bf16.mxu0 %v7582_v14  ;;  %4689 = vmatprep.subr.bf16.mxu1 %v7583_v1  ;;  %v5753_v38 = vpop.eup %5752  ;;  %v7590_v6 = vld [vmem:[#allocation94_spill] sm:$0xff]  ;;  %v7591_v1 = vld [vmem:[#allocation95_spill] sm:$0xff] }
 0x375   :  { %v1404_v53 = vmul.f32 %v1401_v34, %v7584_v52 }
 0x377   :  { %v6598_v4 = vadd.f32 %v1405_v45, %v1404_v53  ;;  %4659 = vmatpush1.bf16.msra.mxu0 %v7585_v61  ;;  %4691 = vmatpush1.bf16.msra.mxu1 %v7586_v2  ;;  %v1399_v53 = vmul.f32 0.5, %v5753_v38  ;;  %v7592_v38 = vld [vmem:[#allocation34_spill] sm:$0xff] }
 0x378   :  { %4661 = vmatprep.subr.bf16.mxu0 %v7587_v35  ;;  %4693 = vmatprep.subr.bf16.mxu1 %v7588_v3 }
 0x379   :  { %5754 = vtanh.f32 %v6598_v4  ;;  %v1402_v34 = vadd.f32 0.5, %v1399_v53  ;;  %v7593_v53 = vld [vmem:[#allocation37_spill] sm:$0xff] }
 0x37b   :  { %4663 = vmatpush1.bf16.msra.mxu0 %v7589_v43  ;;  %4695 = vmatpush1.bf16.msra.mxu1 %v7590_v6 }
 0x37c   :  { %4665 = vmatprep.subr.bf16.mxu0 %v7591_v1  ;;  %4697 = vmatprep.subr.bf16.mxu1 %v7539_v37 }
 0x37f   :  { %4667 = vmatpush1.bf16.msra.mxu0 %v7540_v41  ;;  %4699 = vmatpush1.bf16.msra.mxu1 %v7541_v11 }
 0x380   :  { %4669 = vmatprep.subr.bf16.mxu0 %v7542_v19  ;;  %4701 = vmatprep.subr.bf16.mxu1 %v7543_v31 }
 0x383   :  { %v5755_v45 = vpop.eup %5754  ;;  %4671 = vmatpush1.bf16.msra.mxu0 %v7544_v5  ;;  %4703 = vmatpush1.bf16.msra.mxu1 %v7545_v28 }
 0x384   :  { %4705 = vmatprep.subr.bf16.mxu0 %v7546_v20  ;;  %4737 = vmatprep.subr.bf16.mxu1 %v7547_v55  ;;  %v1408_v52 = vmul.f32 %v5755_v45, %v1402_v34  ;;  %v7594_v34 = vld [vmem:[#allocation36_spill] sm:$0xff]  ;;  %v7595_v45 = vld [vmem:[#allocation39_spill] sm:$0xff] }
 0x386   :  { %1616 = vmatmul.mubr.f32.vlgmr.msra.gmra.mrb[10].mxu0 %v1408_v52  ;;  %1687 = vmatmul.mubr.f32.vlgmr.msra.gmra.mrb[10].mxu1 %v1408_v52 }
 0x387   :  { %4707 = vmatpush1.bf16.msra.mxu0 %v6080_v8  ;;  %4739 = vmatpush1.bf16.msra.mxu1 %v6090_v18 }
 0x388   :  { %4709 = vmatprep.subr.bf16.mxu0 %v6082_v9  ;;  %4741 = vmatprep.subr.bf16.mxu1 %v6096_v26 }
 0x389   :  { %1784 = vmatprep.mubr.f32.mxu0 %v7461_v47  ;;  %1855 = vmatprep.mubr.f32.mxu1 %v7461_v47 }
 0x38b   :  { %4711 = vmatpush1.bf16.msra.mxu0 %v6086_v16  ;;  %4743 = vmatpush1.bf16.msra.mxu1 %v6099_v30 }
 0x38c   :  { %4713 = vmatprep.subr.bf16.mxu0 %v6093_v22  ;;  %4745 = vmatprep.subr.bf16.mxu1 %v6108_v39 }
 0x38f   :  { %4715 = vmatpush1.bf16.msra.mxu0 %v6102_v32  ;;  %4747 = vmatpush1.bf16.msra.mxu1 %v6111_v44 }
 0x390   :  { %4717 = vmatprep.subr.bf16.mxu0 %v6106_v36  ;;  %4749 = vmatprep.subr.bf16.mxu1 %v6117_v48 }
 0x393   :  { %4719 = vmatpush1.bf16.msra.mxu0 %v6114_v46  ;;  %4751 = vmatpush1.bf16.msra.mxu1 %v6123_v57 }
 0x394   :  { %4721 = vmatprep.subr.bf16.mxu0 %v6120_v51  ;;  %4753 = vmatprep.subr.bf16.mxu1 %v6129_v60 }
 0x397   :  { %4723 = vmatpush1.bf16.msra.mxu0 %v6126_v58  ;;  %4755 = vmatpush1.bf16.msra.mxu1 %v6135_v7 }
 0x398   :  { %4725 = vmatprep.subr.bf16.mxu0 %v6132_v63  ;;  %4757 = vmatprep.subr.bf16.mxu1 %v6141_v12  ;;  %v7596_v12 = vld [vmem:[#allocation38_spill] sm:$0xff] }
 0x39b   :  { %4727 = vmatpush1.bf16.msra.mxu0 %v6138_v10  ;;  %4759 = vmatpush1.bf16.msra.mxu1 %v6147_v25  ;;  %v7597_v10 = vld [vmem:[#allocation40_spill] sm:$0xff]  ;;  %v7630_v25 = vld [vmem:[#allocation103_spill] sm:$0xff] }
 0x39c   :  { %4729 = vmatprep.subr.bf16.mxu0 %v6144_v15  ;;  %4761 = vmatprep.subr.bf16.mxu1 %v6153_v29  ;;  %v7598_v15 = vld [vmem:[#allocation41_spill] sm:$0xff]  ;;  %v7599_v29 = vld [vmem:[#allocation43_spill] sm:$0xff] }
 0x39f   :  { %4731 = vmatpush1.bf16.msra.mxu0 %v6150_v27  ;;  %4763 = vmatpush1.bf16.msra.mxu1 %v6159_v42  ;;  %v7600_v27 = vld [vmem:[#allocation42_spill] sm:$0xff]  ;;  %v7601_v42 = vld [vmem:[#allocation44_spill] sm:$0xff] }
 0x3a0   :  { %4733 = vmatprep.subr.bf16.mxu0 %v7592_v38  ;;  %4765 = vmatprep.subr.bf16.mxu1 %v7593_v53  ;;  %v7611_v53 = vld [vmem:[#allocation55_spill] sm:$0xff]  ;;  %v7612_v38 = vld [vmem:[#allocation54_spill] sm:$0xff] }
 0x3a3   :  { %4735 = vmatpush1.bf16.msra.mxu0 %v7594_v34  ;;  %4767 = vmatpush1.bf16.msra.mxu1 %v7595_v45  ;;  %v7602_v34 = vld [vmem:[#allocation45_spill] sm:$0xff]  ;;  %v7603_v45 = vld [vmem:[#allocation47_spill] sm:$0xff] }
 0x3a4   :  { %4769 = vmatprep.subr.bf16.mxu0 %v7596_v12  ;;  %4801 = vmatprep.subr.bf16.mxu1 %v7597_v10  ;;  %v7604_v12 = vld [vmem:[#allocation46_spill] sm:$0xff]  ;;  %v7605_v10 = vld [vmem:[#allocation48_spill] sm:$0xff] }
 0x3a6   :  { %1785 = vmatmul.mubr.f32.vlgmr.msra.gmra.mrb[12].mxu0 %v1408_v52  ;;  %1856 = vmatmul.mubr.f32.vlgmr.msra.gmra.mrb[12].mxu1 %v1408_v52  ;;  %v7606_v52 = vld [vmem:[#allocation49_spill] sm:$0xff] }
 0x3a7   :  { %4771 = vmatpush1.bf16.msra.mxu0 %v7598_v15  ;;  %4803 = vmatpush1.bf16.msra.mxu1 %v7599_v29  ;;  %v7607_v15 = vld [vmem:[#allocation51_spill] sm:$0xff]  ;;  %v7608_v29 = vld [vmem:[#allocation50_spill] sm:$0xff] }
 0x3a8   :  { %4773 = vmatprep.subr.bf16.mxu0 %v7600_v27  ;;  %4805 = vmatprep.subr.bf16.mxu1 %v7601_v42  ;;  %v7609_v27 = vld [vmem:[#allocation52_spill] sm:$0xff]  ;;  %v7610_v42 = vld [vmem:[#allocation53_spill] sm:$0xff] }
 0x3a9   :  { %1948 = vmatprep.mubr.f32.mxu0 %v7461_v47  ;;  %2019 = vmatprep.mubr.f32.mxu1 %v7461_v47 }
 0x3ab   :  { %4775 = vmatpush1.bf16.msra.mxu0 %v7602_v34  ;;  %4807 = vmatpush1.bf16.msra.mxu1 %v7603_v45  ;;  %v7613_v34 = vld [vmem:[#allocation56_spill] sm:$0xff]  ;;  %v7614_v45 = vld [vmem:[#allocation57_spill] sm:$0xff] }
 0x3ac   :  { %4777 = vmatprep.subr.bf16.mxu0 %v7604_v12  ;;  %4809 = vmatprep.subr.bf16.mxu1 %v7605_v10  ;;  %v7615_v12 = vld [vmem:[#allocation59_spill] sm:$0xff]  ;;  %v7616_v10 = vld [vmem:[#allocation58_spill] sm:$0xff] }
 0x3af   :  { %4779 = vmatpush1.bf16.msra.mxu0 %v7606_v52  ;;  %4811 = vmatpush1.bf16.msra.mxu1 %v7607_v15  ;;  %v7617_v52 = vld [vmem:[#allocation60_spill] sm:$0xff]  ;;  %v7618_v15 = vld [vmem:[#allocation61_spill] sm:$0xff] }
 0x3b0   :  { %4781 = vmatprep.subr.bf16.mxu0 %v7608_v29  ;;  %4813 = vmatprep.subr.bf16.mxu1 %v7609_v27  ;;  %v7619_v29 = vld [vmem:[#allocation63_spill] sm:$0xff]  ;;  %v7620_v27 = vld [vmem:[#allocation62_spill] sm:$0xff] }
 0x3b3   :  { %4783 = vmatpush1.bf16.msra.mxu0 %v7610_v42  ;;  %4815 = vmatpush1.bf16.msra.mxu1 %v7611_v53  ;;  %v7621_v42 = vld [vmem:[#allocation64_spill] sm:$0xff]  ;;  %v7622_v53 = vld [vmem:[#allocation65_spill] sm:$0xff] }
 0x3b4   :  { %4785 = vmatprep.subr.bf16.mxu0 %v7612_v38  ;;  %4817 = vmatprep.subr.bf16.mxu1 %v7613_v34  ;;  %v7623_v38 = vld [vmem:[#allocation66_spill] sm:$0xff]  ;;  %v7624_v34 = vld [vmem:[#allocation67_spill] sm:$0xff] }
 0x3b7   :  { %4787 = vmatpush1.bf16.msra.mxu0 %v7614_v45  ;;  %4819 = vmatpush1.bf16.msra.mxu1 %v7615_v12  ;;  %v7625_v45 = vld [vmem:[#allocation68_spill] sm:$0xff]  ;;  %v7626_v12 = vld [vmem:[#allocation69_spill] sm:$0xff] }
 0x3b8   :  { %4789 = vmatprep.subr.bf16.mxu0 %v7616_v10  ;;  %4821 = vmatprep.subr.bf16.mxu1 %v7617_v52  ;;  %v7627_v10 = vld [vmem:[#allocation70_spill] sm:$0xff]  ;;  %v7628_v52 = vld [vmem:[#allocation71_spill] sm:$0xff] }
 0x3bb   :  { %4791 = vmatpush1.bf16.msra.mxu0 %v7618_v15  ;;  %4823 = vmatpush1.bf16.msra.mxu1 %v7619_v29  ;;  %v7629_v15 = vld [vmem:[#allocation72_spill] sm:$0xff] }
 0x3bc   :  { %4793 = vmatprep.subr.bf16.mxu0 %v7620_v27  ;;  %4825 = vmatprep.subr.bf16.mxu1 %v7621_v42 }
 0x3bf   :  { %4795 = vmatpush1.bf16.msra.mxu0 %v7622_v53  ;;  %4827 = vmatpush1.bf16.msra.mxu1 %v7623_v38 }
 0x3c0   :  { %4797 = vmatprep.subr.bf16.mxu0 %v7624_v34  ;;  %4829 = vmatprep.subr.bf16.mxu1 %v7625_v45 }
 0x3c3   :  { %4799 = vmatpush1.bf16.msra.mxu0 %v7626_v12  ;;  %4831 = vmatpush1.bf16.msra.mxu1 %v7627_v10  ;;  %v7631_v10 = vld [vmem:[#allocation105_spill] sm:$0xff] }
 0x3c4   :  { %4833 = vmatprep.subr.bf16.mxu0 %v7628_v52  ;;  %4865 = vmatprep.subr.bf16.mxu1 %v7629_v15 }
 0x459   :  { %v1617_v29 = vpop.f32.mrb[10].mxu0  ;;  %v1688_v27 = vpop.f32.mrb[10].mxu1 }
 0x45a   :  { %v1693_v42 = vadd.f32 %v1617_v29, %v7630_v25  ;;  %v1619_v63 = vpop.f32.mrb[11].mxu0  ;;  %v1690_v53 = vpop.f32.mrb[11].mxu1  ;;  %v1695_v12 = vadd.f32 %v1688_v27, %v7631_v10  ;;  %v1717_v27 = vld [vmem:[#allocation2 + $0x68] sm:$0xff] }
 0x45b   :  { %v1694_v38 = vadd.f32 %v1619_v63, %v6452_v13  ;;  %v1696_v45 = vadd.f32 %v1690_v53, %v7572_v49 }
 0x45c   :  { %v1697_v7 = vmul.f32 0.5, %v1693_v42  ;;  %v1699_v52 = vmul.f32 0.5, %v1695_v12 }
 0x45d   :  { %v1698_v34 = vmul.f32 0.5, %v1694_v38  ;;  %v1716_v38 = vld [vmem:[#allocation2 + $0x60] sm:$0xff] }
 0x45e   :  { %5756 = vtanh.f32 %v1697_v7 }
 0x45f   :  { %5758 = vtanh.f32 %v1698_v34 }
 0x460   :  { %5760 = vtanh.f32 %v1696_v45 }
 0x461   :  { %5762 = vtanh.f32 %v1699_v52 }
 0x468   :  { %v5757_v58 = vpop.eup %5756 }
 0x469   :  { %v1703_v15 = vmul.f32 0.5, %v5757_v58  ;;  %v5759_v60 = vpop.eup %5758 }
 0x46a   :  { %v1704_v29 = vmul.f32 0.5, %v5759_v60  ;;  %v5761_v25 = vpop.eup %5760  ;;  %v1719_v60 = vld [vmem:[#allocation2 + $0x78] sm:$0xff] }
 0x46b   :  { %v1706_v51 = vadd.f32 0.5, %v1703_v15  ;;  %v5763_v7 = vpop.eup %5762 }
 0x46c   :  { %v1707_v57 = vadd.f32 0.5, %v1704_v29  ;;  %v1705_v53 = vmul.f32 0.5, %v5763_v7 }
 0x46d   :  { %v1711_v46 = vmul.f32 %v5761_v25, %v1706_v51 }
 0x46e   :  { %v1710_v63 = vmul.f32 %v1707_v57, %v6576_v23  ;;  %v1708_v10 = vadd.f32 0.5, %v1705_v53  ;;  %v1718_v23 = vld [vmem:[#allocation2 + $0x70] sm:$0xff] }
 0x46f   :  { %v7632_v53 = vld [vmem:[#allocation81_spill] sm:$0xff] }
 0x470   :  { %v6690_v42 = vadd.f32 %v1711_v46, %v1710_v63 }
 0x472   :  { %5764 = vtanh.f32 %v6690_v42 }
 0x479   :  { %v1786_v12 = vpop.f32.mrb[12].mxu0  ;;  %v1857_v34 = vpop.f32.mrb[12].mxu1 }
 0x47a   :  { %v1862_v58 = vadd.f32 %v1786_v12, %v1716_v38  ;;  %v1788_v45 = vpop.f32.mrb[13].mxu0  ;;  %v1859_v15 = vpop.f32.mrb[13].mxu1  ;;  %v1864_v63 = vadd.f32 %v1857_v34, %v1718_v23  ;;  %v7634_v34 = vld [vmem:[#allocation83_spill] sm:$0xff] }
 0x47b   :  { %v1863_v52 = vadd.f32 %v1788_v45, %v1717_v27  ;;  %v1865_v46 = vadd.f32 %v1859_v15, %v1719_v60  ;;  %v7633_v27 = vld [vmem:[#allocation82_spill] sm:$0xff] }
 0x47c   :  { %v1866_v29 = vmul.f32 0.5, %v1862_v58  ;;  %v5765_v51 = vpop.eup %5764 }
 0x47d   :  { %v1867_v25 = vmul.f32 0.5, %v1863_v52  ;;  %v1714_v57 = vmul.f32 %v5765_v51, %v1708_v10  ;;  %v1868_v10 = vmul.f32 0.5, %v1864_v63 }
 0x47e   :  { %5766 = vtanh.f32 %v1866_v29  ;;  %v7635_v29 = vld [vmem:[#allocation88_spill] sm:$0xff] }
 0x47f   :  { %5768 = vtanh.f32 %v1867_v25  ;;  %1949 = vmatmul.mubr.f32.vlgmr.msra.gmra.mrb[14].mxu0 %v1714_v57  ;;  %2020 = vmatmul.mubr.f32.vlgmr.msra.gmra.mrb[14].mxu1 %v1714_v57 }
 0x480   :  { %4835 = vmatpush1.bf16.msra.mxu0 %v7515_v56  ;;  %4867 = vmatpush1.bf16.msra.mxu1 %v7516_v59  ;;  %5770 = vtanh.f32 %v1865_v46 }
 0x481   :  { %4837 = vmatprep.subr.bf16.mxu0 %v7517_v0  ;;  %4869 = vmatprep.subr.bf16.mxu1 %v7574_v21  ;;  %5772 = vtanh.f32 %v1868_v10  ;;  %v7636_v10 = vld [vmem:[#allocation20_spill] sm:$0xff] }
 0x482   :  { %2090 = vmatprep.mubr.f32.mxu0 %v7461_v47  ;;  %2161 = vmatprep.mubr.f32.mxu1 %v7461_v47 }
 0x484   :  { %4839 = vmatpush1.bf16.msra.mxu0 %v7575_v62  ;;  %4871 = vmatpush1.bf16.msra.mxu1 %v7576_v50 }
 0x485   :  { %4841 = vmatprep.subr.bf16.mxu0 %v7577_v24  ;;  %4873 = vmatprep.subr.bf16.mxu1 %v7578_v40 }
 0x488   :  { %v5767_v7 = vpop.eup %5766  ;;  %4843 = vmatpush1.bf16.msra.mxu0 %v7632_v53  ;;  %4875 = vmatpush1.bf16.msra.mxu1 %v7633_v27 }
 0x489   :  { %v1872_v38 = vmul.f32 0.5, %v5767_v7  ;;  %v5769_v12 = vpop.eup %5768  ;;  %4845 = vmatprep.subr.bf16.mxu0 %v7634_v34  ;;  %4877 = vmatprep.subr.bf16.mxu1 %v7526_v17  ;;  %v7637_v7 = vld [vmem:[#allocation23_spill] sm:$0xff] }
 0x48a   :  { %v1873_v45 = vmul.f32 0.5, %v5769_v12  ;;  %v5771_v15 = vpop.eup %5770  ;;  %v7639_v12 = vld [vmem:[#allocation25_spill] sm:$0xff] }
 0x48b   :  { %v1875_v58 = vadd.f32 0.5, %v1872_v38  ;;  %v5773_v46 = vpop.eup %5772  ;;  %v7638_v38 = vld [vmem:[#allocation22_spill] sm:$0xff] }
 0x48c   :  { %v1876_v52 = vadd.f32 0.5, %v1873_v45  ;;  %4847 = vmatpush1.bf16.msra.mxu0 %v7527_v54  ;;  %4879 = vmatpush1.bf16.msra.mxu1 %v7528_v33  ;;  %v7641_v45 = vld [vmem:[#allocation27_spill] sm:$0xff] }
 0x48d   :  { %v1880_v60 = vmul.f32 %v5771_v15, %v1875_v58  ;;  %4849 = vmatprep.subr.bf16.mxu0 %v7582_v14  ;;  %4881 = vmatprep.subr.bf16.mxu1 %v7635_v29  ;;  %v7640_v58 = vld [vmem:[#allocation24_spill] sm:$0xff]  ;;  %v7642_v15 = vld [vmem:[#allocation26_spill] sm:$0xff] }
 0x48e   :  { %v1879_v51 = vmul.f32 %v1876_v52, %v6598_v4  ;;  %v1874_v4 = vmul.f32 0.5, %v5773_v46  ;;  %v7643_v52 = vld [vmem:[#allocation29_spill] sm:$0xff]  ;;  %v7646_v46 = vld [vmem:[#allocation30_spill] sm:$0xff] }
 0x490   :  { %v6712_v25 = vadd.f32 %v1880_v60, %v1879_v51  ;;  %4851 = vmatpush1.bf16.msra.mxu0 %v7585_v61  ;;  %4883 = vmatpush1.bf16.msra.mxu1 %v7586_v2  ;;  %v1877_v57 = vadd.f32 0.5, %v1874_v4  ;;  %v7644_v60 = vld [vmem:[#allocation28_spill] sm:$0xff]  ;;  %v7645_v51 = vld [vmem:[#allocation31_spill] sm:$0xff]  ;;  %v7647_v4 = vld [vmem:[#allocation33_spill] sm:$0xff] }
 0x491   :  { %4853 = vmatprep.subr.bf16.mxu0 %v7587_v35  ;;  %4885 = vmatprep.subr.bf16.mxu1 %v7588_v3 }
 0x492   :  { %5774 = vtanh.f32 %v6712_v25 }
 0x494   :  { %4855 = vmatpush1.bf16.msra.mxu0 %v7589_v43  ;;  %4887 = vmatpush1.bf16.msra.mxu1 %v7590_v6 }
 0x495   :  { %4857 = vmatprep.subr.bf16.mxu0 %v7591_v1  ;;  %4889 = vmatprep.subr.bf16.mxu1 %v7539_v37 }
 0x498   :  { %4859 = vmatpush1.bf16.msra.mxu0 %v7540_v41  ;;  %4891 = vmatpush1.bf16.msra.mxu1 %v7541_v11 }
 0x499   :  { %4861 = vmatprep.subr.bf16.mxu0 %v7542_v19  ;;  %4893 = vmatprep.subr.bf16.mxu1 %v7543_v31 }
 0x49c   :  { %v5775_v23 = vpop.eup %5774  ;;  %4863 = vmatpush1.bf16.msra.mxu0 %v7544_v5  ;;  %4895 = vmatpush1.bf16.msra.mxu1 %v7545_v28 }
 0x49d   :  { %v1883_v63 = vmul.f32 %v5775_v23, %v1877_v57  ;;  %4897 = vmatprep.subr.bf16.mxu0 %v7546_v20  ;;  %4929 = vmatprep.subr.bf16.mxu1 %v7547_v55  ;;  %v7648_v57 = vld [vmem:[#allocation32_spill] sm:$0xff]  ;;  %v7649_v23 = vld [vmem:[#allocation35_spill] sm:$0xff] }
 0x49f   :  { %2091 = vmatmul.mubr.f32.vlgmr.msra.gmra.mrb[14].mxu0 %v1883_v63  ;;  %2162 = vmatmul.mubr.f32.vlgmr.msra.gmra.mrb[14].mxu1 %v1883_v63 }
 0x4a0   :  { %4899 = vmatpush1.bf16.msra.mxu0 %v6080_v8  ;;  %4931 = vmatpush1.bf16.msra.mxu1 %v6090_v18 }
 0x4a1   :  { %4901 = vmatprep.subr.bf16.mxu0 %v6082_v9  ;;  %4933 = vmatprep.subr.bf16.mxu1 %v6096_v26 }
 0x4a2   :  { %2259 = vmatprep.mubr.f32.mxu0 %v7461_v47  ;;  %2330 = vmatprep.mubr.f32.mxu1 %v7461_v47 }
 0x4a4   :  { %4903 = vmatpush1.bf16.msra.mxu0 %v6086_v16  ;;  %4935 = vmatpush1.bf16.msra.mxu1 %v6099_v30 }
 0x4a5   :  { %4905 = vmatprep.subr.bf16.mxu0 %v6093_v22  ;;  %4937 = vmatprep.subr.bf16.mxu1 %v6108_v39 }
 0x4a8   :  { %4907 = vmatpush1.bf16.msra.mxu0 %v6102_v32  ;;  %4939 = vmatpush1.bf16.msra.mxu1 %v6111_v44 }
 0x4a9   :  { %4909 = vmatprep.subr.bf16.mxu0 %v6106_v36  ;;  %4941 = vmatprep.subr.bf16.mxu1 %v6117_v48 }
 0x4ac   :  { %4911 = vmatpush1.bf16.msra.mxu0 %v7636_v10  ;;  %4943 = vmatpush1.bf16.msra.mxu1 %v7637_v7 }
 0x4ad   :  { %4913 = vmatprep.subr.bf16.mxu0 %v7638_v38  ;;  %4945 = vmatprep.subr.bf16.mxu1 %v7639_v12  ;;  %v7650_v12 = vld [vmem:[#allocation34_spill] sm:$0xff] }
 0x4b0   :  { %4915 = vmatpush1.bf16.msra.mxu0 %v7640_v58  ;;  %4947 = vmatpush1.bf16.msra.mxu1 %v7641_v45  ;;  %v7651_v58 = vld [vmem:[#allocation37_spill] sm:$0xff]  ;;  %v7652_v45 = vld [vmem:[#allocation36_spill] sm:$0xff] }
 0x4b1   :  { %4917 = vmatprep.subr.bf16.mxu0 %v7642_v15  ;;  %4949 = vmatprep.subr.bf16.mxu1 %v7643_v52  ;;  %v7653_v15 = vld [vmem:[#allocation39_spill] sm:$0xff]  ;;  %v7654_v52 = vld [vmem:[#allocation38_spill] sm:$0xff] }
 0x4b4   :  { %4919 = vmatpush1.bf16.msra.mxu0 %v7644_v60  ;;  %4951 = vmatpush1.bf16.msra.mxu1 %v7645_v51  ;;  %v7655_v60 = vld [vmem:[#allocation40_spill] sm:$0xff]  ;;  %v7688_v51 = vld [vmem:[#allocation103_spill] sm:$0xff] }
 0x4b5   :  { %4921 = vmatprep.subr.bf16.mxu0 %v7646_v46  ;;  %4953 = vmatprep.subr.bf16.mxu1 %v7647_v4  ;;  %v7656_v46 = vld [vmem:[#allocation41_spill] sm:$0xff]  ;;  %v7657_v4 = vld [vmem:[#allocation43_spill] sm:$0xff] }
 0x4b8   :  { %4923 = vmatpush1.bf16.msra.mxu0 %v7648_v57  ;;  %4955 = vmatpush1.bf16.msra.mxu1 %v7649_v23  ;;  %v7658_v57 = vld [vmem:[#allocation42_spill] sm:$0xff]  ;;  %v7659_v23 = vld [vmem:[#allocation44_spill] sm:$0xff] }
 0x4b9   :  { %4925 = vmatprep.subr.bf16.mxu0 %v7650_v12  ;;  %4957 = vmatprep.subr.bf16.mxu1 %v7651_v58  ;;  %v7669_v58 = vld [vmem:[#allocation55_spill] sm:$0xff]  ;;  %v7670_v12 = vld [vmem:[#allocation54_spill] sm:$0xff] }
 0x4bc   :  { %4927 = vmatpush1.bf16.msra.mxu0 %v7652_v45  ;;  %4959 = vmatpush1.bf16.msra.mxu1 %v7653_v15  ;;  %v7660_v45 = vld [vmem:[#allocation45_spill] sm:$0xff]  ;;  %v7661_v15 = vld [vmem:[#allocation47_spill] sm:$0xff] }
 0x4bd   :  { %4961 = vmatprep.subr.bf16.mxu0 %v7654_v52  ;;  %4993 = vmatprep.subr.bf16.mxu1 %v7655_v60  ;;  %v7662_v52 = vld [vmem:[#allocation46_spill] sm:$0xff]  ;;  %v7663_v60 = vld [vmem:[#allocation48_spill] sm:$0xff] }
 0x4bf   :  { %2260 = vmatmul.mubr.f32.vlgmr.msra.gmra.mrb[16].mxu0 %v1883_v63  ;;  %2331 = vmatmul.mubr.f32.vlgmr.msra.gmra.mrb[16].mxu1 %v1883_v63  ;;  %v7664_v63 = vld [vmem:[#allocation49_spill] sm:$0xff] }
 0x4c0   :  { %4963 = vmatpush1.bf16.msra.mxu0 %v7656_v46  ;;  %4995 = vmatpush1.bf16.msra.mxu1 %v7657_v4  ;;  %v7665_v46 = vld [vmem:[#allocation51_spill] sm:$0xff]  ;;  %v7666_v4 = vld [vmem:[#allocation50_spill] sm:$0xff] }
 0x4c1   :  { %4965 = vmatprep.subr.bf16.mxu0 %v7658_v57  ;;  %4997 = vmatprep.subr.bf16.mxu1 %v7659_v23  ;;  %v7667_v57 = vld [vmem:[#allocation52_spill] sm:$0xff]  ;;  %v7668_v23 = vld [vmem:[#allocation53_spill] sm:$0xff] }
 0x4c2   :  { %2423 = vmatprep.mubr.f32.mxu0 %v7461_v47  ;;  %2494 = vmatprep.mubr.f32.mxu1 %v7461_v47 }
 0x4c4   :  { %4967 = vmatpush1.bf16.msra.mxu0 %v7660_v45  ;;  %4999 = vmatpush1.bf16.msra.mxu1 %v7661_v15  ;;  %v7671_v45 = vld [vmem:[#allocation56_spill] sm:$0xff]  ;;  %v7672_v15 = vld [vmem:[#allocation57_spill] sm:$0xff] }
 0x4c5   :  { %4969 = vmatprep.subr.bf16.mxu0 %v7662_v52  ;;  %5001 = vmatprep.subr.bf16.mxu1 %v7663_v60  ;;  %v7673_v52 = vld [vmem:[#allocation59_spill] sm:$0xff]  ;;  %v7674_v60 = vld [vmem:[#allocation58_spill] sm:$0xff] }
 0x4c8   :  { %4971 = vmatpush1.bf16.msra.mxu0 %v7664_v63  ;;  %5003 = vmatpush1.bf16.msra.mxu1 %v7665_v46  ;;  %v7675_v63 = vld [vmem:[#allocation60_spill] sm:$0xff]  ;;  %v7676_v46 = vld [vmem:[#allocation61_spill] sm:$0xff] }
 0x4c9   :  { %4973 = vmatprep.subr.bf16.mxu0 %v7666_v4  ;;  %5005 = vmatprep.subr.bf16.mxu1 %v7667_v57  ;;  %v7677_v4 = vld [vmem:[#allocation63_spill] sm:$0xff]  ;;  %v7678_v57 = vld [vmem:[#allocation62_spill] sm:$0xff] }
 0x4cc   :  { %4975 = vmatpush1.bf16.msra.mxu0 %v7668_v23  ;;  %5007 = vmatpush1.bf16.msra.mxu1 %v7669_v58  ;;  %v7679_v23 = vld [vmem:[#allocation64_spill] sm:$0xff]  ;;  %v7680_v58 = vld [vmem:[#allocation65_spill] sm:$0xff] }
 0x4cd   :  { %4977 = vmatprep.subr.bf16.mxu0 %v7670_v12  ;;  %5009 = vmatprep.subr.bf16.mxu1 %v7671_v45  ;;  %v7681_v12 = vld [vmem:[#allocation66_spill] sm:$0xff]  ;;  %v7682_v45 = vld [vmem:[#allocation67_spill] sm:$0xff] }
 0x4d0   :  { %4979 = vmatpush1.bf16.msra.mxu0 %v7672_v15  ;;  %5011 = vmatpush1.bf16.msra.mxu1 %v7673_v52  ;;  %v7683_v15 = vld [vmem:[#allocation68_spill] sm:$0xff]  ;;  %v7684_v52 = vld [vmem:[#allocation69_spill] sm:$0xff] }
 0x4d1   :  { %4981 = vmatprep.subr.bf16.mxu0 %v7674_v60  ;;  %5013 = vmatprep.subr.bf16.mxu1 %v7675_v63  ;;  %v7685_v60 = vld [vmem:[#allocation70_spill] sm:$0xff]  ;;  %v7686_v63 = vld [vmem:[#allocation71_spill] sm:$0xff] }
 0x4d4   :  { %4983 = vmatpush1.bf16.msra.mxu0 %v7676_v46  ;;  %5015 = vmatpush1.bf16.msra.mxu1 %v7677_v4  ;;  %v7687_v46 = vld [vmem:[#allocation72_spill] sm:$0xff] }
 0x4d5   :  { %4985 = vmatprep.subr.bf16.mxu0 %v7678_v57  ;;  %5017 = vmatprep.subr.bf16.mxu1 %v7679_v23 }
 0x4d8   :  { %4987 = vmatpush1.bf16.msra.mxu0 %v7680_v58  ;;  %5019 = vmatpush1.bf16.msra.mxu1 %v7681_v12 }
 0x4d9   :  { %4989 = vmatprep.subr.bf16.mxu0 %v7682_v45  ;;  %5021 = vmatprep.subr.bf16.mxu1 %v7683_v15 }
 0x4dc   :  { %4991 = vmatpush1.bf16.msra.mxu0 %v7684_v52  ;;  %5023 = vmatpush1.bf16.msra.mxu1 %v7685_v60  ;;  %v7689_v60 = vld [vmem:[#allocation105_spill] sm:$0xff] }
 0x4dd   :  { %5025 = vmatprep.subr.bf16.mxu0 %v7686_v63  ;;  %5057 = vmatprep.subr.bf16.mxu1 %v7687_v46 }
 0x572   :  { %v2092_v4 = vpop.f32.mrb[14].mxu0  ;;  %v2163_v57 = vpop.f32.mrb[14].mxu1 }
 0x573   :  { %v2168_v23 = vadd.f32 %v2092_v4, %v7688_v51  ;;  %v2094_v38 = vpop.f32.mrb[15].mxu0  ;;  %v2165_v58 = vpop.f32.mrb[15].mxu1  ;;  %v2170_v52 = vadd.f32 %v2163_v57, %v7689_v60 }
 0x574   :  { %v2169_v12 = vadd.f32 %v2094_v38, %v6452_v13  ;;  %v2171_v15 = vadd.f32 %v2165_v58, %v7572_v49  ;;  %v2191_v58 = vld [vmem:[#allocation2 + $0x80] sm:$0xff] }
 0x575   :  { %v2172_v7 = vmul.f32 0.5, %v2168_v23  ;;  %v2174_v63 = vmul.f32 0.5, %v2170_v52 }
 0x576   :  { %v2173_v45 = vmul.f32 0.5, %v2169_v12 }
 0x577   :  { %5776 = vtanh.f32 %v2172_v7 }
 0x578   :  { %5778 = vtanh.f32 %v2173_v45 }
 0x579   :  { %5780 = vtanh.f32 %v2171_v15  ;;  %v2192_v15 = vld [vmem:[#allocation2 + $0x88] sm:$0xff] }
 0x57a   :  { %5782 = vtanh.f32 %v2174_v63 }
 0x581   :  { %v5777_v10 = vpop.eup %5776 }
 0x582   :  { %v2178_v46 = vmul.f32 0.5, %v5777_v10  ;;  %v5779_v48 = vpop.eup %5778 }
 0x583   :  { %v2179_v4 = vmul.f32 0.5, %v5779_v48  ;;  %v5781_v51 = vpop.eup %5780  ;;  %v2194_v48 = vld [vmem:[#allocation2 + $0x98] sm:$0xff] }
 0x584   :  { %v2181_v36 = vadd.f32 0.5, %v2178_v46  ;;  %v5783_v7 = vpop.eup %5782 }
 0x585   :  { %v2182_v44 = vadd.f32 0.5, %v2179_v4  ;;  %v2180_v45 = vmul.f32 0.5, %v5783_v7 }
 0x586   :  { %v2186_v32 = vmul.f32 %v5781_v51, %v2181_v36 }
 0x587   :  { %v2185_v38 = vmul.f32 %v2182_v44, %v6690_v42  ;;  %v2183_v60 = vadd.f32 0.5, %v2180_v45  ;;  %v2193_v42 = vld [vmem:[#allocation2 + $0x90] sm:$0xff] }
 0x589   :  { %v6804_v12 = vadd.f32 %v2186_v32, %v2185_v38 }
 0x58b   :  { %5784 = vtanh.f32 %v6804_v12 }
 0x592   :  { %v2261_v52 = vpop.f32.mrb[16].mxu0  ;;  %v2332_v57 = vpop.f32.mrb[16].mxu1 }
 0x593   :  { %v2337_v10 = vadd.f32 %v2261_v52, %v2191_v58  ;;  %v2263_v23 = vpop.f32.mrb[17].mxu0  ;;  %v2334_v46 = vpop.f32.mrb[17].mxu1  ;;  %v2339_v38 = vadd.f32 %v2332_v57, %v2193_v42  ;;  %v7692_v42 = vld [vmem:[#allocation18_spill] sm:$0xff] }
 0x594   :  { %v2338_v63 = vadd.f32 %v2263_v23, %v2192_v15  ;;  %v2340_v32 = vadd.f32 %v2334_v46, %v2194_v48 }
 0x595   :  { %v2341_v4 = vmul.f32 0.5, %v2337_v10  ;;  %v5785_v36 = vpop.eup %5784 }
 0x596   :  { %v2342_v51 = vmul.f32 0.5, %v2338_v63  ;;  %v2189_v44 = vmul.f32 %v5785_v36, %v2183_v60  ;;  %v2343_v60 = vmul.f32 0.5, %v2339_v38  ;;  %v7693_v38 = vld [vmem:[#allocation21_spill] sm:$0xff] }
 0x597   :  { %5786 = vtanh.f32 %v2341_v4 }
 0x598   :  { %5788 = vtanh.f32 %v2342_v51  ;;  %2424 = vmatmul.mubr.f32.vlgmr.msra.gmra.mrb[18].mxu0 %v2189_v44  ;;  %2495 = vmatmul.mubr.f32.vlgmr.msra.gmra.mrb[18].mxu1 %v2189_v44  ;;  %v7691_v44 = vld [vmem:[#allocation19_spill] sm:$0xff] }
 0x599   :  { %5027 = vmatpush1.bf16.msra.mxu0 %v7515_v56  ;;  %5059 = vmatpush1.bf16.msra.mxu1 %v7516_v59  ;;  %5790 = vtanh.f32 %v2340_v32  ;;  %v7690_v32 = vld [vmem:[#allocation17_spill] sm:$0xff] }
 0x59a   :  { %5029 = vmatprep.subr.bf16.mxu0 %v7517_v0  ;;  %5061 = vmatprep.subr.bf16.mxu1 %v7574_v21  ;;  %5792 = vtanh.f32 %v2343_v60  ;;  %v7694_v60 = vld [vmem:[#allocation20_spill] sm:$0xff] }
 0x59b   :  { %2565 = vmatprep.mubr.f32.mxu0 %v7461_v47  ;;  %2636 = vmatprep.mubr.f32.mxu1 %v7461_v47 }
 0x59d   :  { %5031 = vmatpush1.bf16.msra.mxu0 %v7575_v62  ;;  %5063 = vmatpush1.bf16.msra.mxu1 %v7576_v50 }
 0x59e   :  { %5033 = vmatprep.subr.bf16.mxu0 %v7577_v24  ;;  %5065 = vmatprep.subr.bf16.mxu1 %v7578_v40 }
 0x5a1   :  { %v5787_v7 = vpop.eup %5786  ;;  %5035 = vmatpush1.bf16.msra.mxu0 %v7632_v53  ;;  %5067 = vmatpush1.bf16.msra.mxu1 %v7633_v27 }
 0x5a2   :  { %v2347_v58 = vmul.f32 0.5, %v5787_v7  ;;  %v5789_v45 = vpop.eup %5788  ;;  %5037 = vmatprep.subr.bf16.mxu0 %v7634_v34  ;;  %5069 = vmatprep.subr.bf16.mxu1 %v7526_v17  ;;  %v7695_v7 = vld [vmem:[#allocation23_spill] sm:$0xff] }
 0x5a3   :  { %v2348_v52 = vmul.f32 0.5, %v5789_v45  ;;  %v5791_v57 = vpop.eup %5790  ;;  %v7697_v45 = vld [vmem:[#allocation25_spill] sm:$0xff] }
 0x5a4   :  { %v2350_v15 = vadd.f32 0.5, %v2347_v58  ;;  %v5793_v48 = vpop.eup %5792  ;;  %v7696_v58 = vld [vmem:[#allocation22_spill] sm:$0xff] }
 0x5a5   :  { %v2351_v10 = vadd.f32 0.5, %v2348_v52  ;;  %5039 = vmatpush1.bf16.msra.mxu0 %v7527_v54  ;;  %5071 = vmatpush1.bf16.msra.mxu1 %v7528_v33  ;;  %v7699_v52 = vld [vmem:[#allocation27_spill] sm:$0xff] }
 0x5a6   :  { %v2355_v23 = vmul.f32 %v5791_v57, %v2350_v15  ;;  %5041 = vmatprep.subr.bf16.mxu0 %v7582_v14  ;;  %5073 = vmatprep.subr.bf16.mxu1 %v7635_v29  ;;  %v7698_v15 = vld [vmem:[#allocation24_spill] sm:$0xff]  ;;  %v7700_v57 = vld [vmem:[#allocation26_spill] sm:$0xff] }
 0x5a7   :  { %v2354_v46 = vmul.f32 %v2351_v10, %v6712_v25  ;;  %v2349_v25 = vmul.f32 0.5, %v5793_v48  ;;  %v7701_v10 = vld [vmem:[#allocation29_spill] sm:$0xff]  ;;  %v7704_v48 = vld [vmem:[#allocation30_spill] sm:$0xff] }
 0x5a9   :  { %v6826_v63 = vadd.f32 %v2355_v23, %v2354_v46  ;;  %5043 = vmatpush1.bf16.msra.mxu0 %v7585_v61  ;;  %5075 = vmatpush1.bf16.msra.mxu1 %v7586_v2  ;;  %v2352_v4 = vadd.f32 0.5, %v2349_v25  ;;  %v7702_v23 = vld [vmem:[#allocation28_spill] sm:$0xff]  ;;  %v7703_v46 = vld [vmem:[#allocation31_spill] sm:$0xff]  ;;  %v7705_v25 = vld [vmem:[#allocation33_spill] sm:$0xff] }
 0x5aa   :  { %5045 = vmatprep.subr.bf16.mxu0 %v7587_v35  ;;  %5077 = vmatprep.subr.bf16.mxu1 %v7588_v3 }
 0x5ab   :  { %5794 = vtanh.f32 %v6826_v63 }
 0x5ad   :  { %5047 = vmatpush1.bf16.msra.mxu0 %v7589_v43  ;;  %5079 = vmatpush1.bf16.msra.mxu1 %v7590_v6 }
 0x5ae   :  { %5049 = vmatprep.subr.bf16.mxu0 %v7591_v1  ;;  %5081 = vmatprep.subr.bf16.mxu1 %v7539_v37 }
 0x5b1   :  { %5051 = vmatpush1.bf16.msra.mxu0 %v7540_v41  ;;  %5083 = vmatpush1.bf16.msra.mxu1 %v7541_v11 }
 0x5b2   :  { %5053 = vmatprep.subr.bf16.mxu0 %v7542_v19  ;;  %5085 = vmatprep.subr.bf16.mxu1 %v7543_v31 }
 0x5b5   :  { %v5795_v36 = vpop.eup %5794  ;;  %5055 = vmatpush1.bf16.msra.mxu0 %v7544_v5  ;;  %5087 = vmatpush1.bf16.msra.mxu1 %v7545_v28 }
 0x5b6   :  { %5089 = vmatprep.subr.bf16.mxu0 %v7546_v20  ;;  %5121 = vmatprep.subr.bf16.mxu1 %v7547_v55  ;;  %v2358_v51 = vmul.f32 %v5795_v36, %v2352_v4  ;;  %v7706_v4 = vld [vmem:[#allocation32_spill] sm:$0xff]  ;;  %v7707_v36 = vld [vmem:[#allocation35_spill] sm:$0xff] }
 0x5b8   :  { %2566 = vmatmul.mubr.f32.vlgmr.msra.gmra.mrb[18].mxu0 %v2358_v51  ;;  %2637 = vmatmul.mubr.f32.vlgmr.msra.gmra.mrb[18].mxu1 %v2358_v51 }
 0x5b9   :  { %5091 = vmatpush1.bf16.msra.mxu0 %v6080_v8  ;;  %5123 = vmatpush1.bf16.msra.mxu1 %v6090_v18 }
 0x5ba   :  { %5093 = vmatprep.subr.bf16.mxu0 %v6082_v9  ;;  %5125 = vmatprep.subr.bf16.mxu1 %v6096_v26 }
 0x5bb   :  { %2734 = vmatprep.mubr.f32.mxu0 %v7461_v47  ;;  %2805 = vmatprep.mubr.f32.mxu1 %v7461_v47 }
 0x5bd   :  { %5095 = vmatpush1.bf16.msra.mxu0 %v6086_v16  ;;  %5127 = vmatpush1.bf16.msra.mxu1 %v6099_v30 }
 0x5be   :  { %5097 = vmatprep.subr.bf16.mxu0 %v6093_v22  ;;  %5129 = vmatprep.subr.bf16.mxu1 %v6108_v39 }
 0x5c1   :  { %5099 = vmatpush1.bf16.msra.mxu0 %v7690_v32  ;;  %5131 = vmatpush1.bf16.msra.mxu1 %v7691_v44 }
 0x5c2   :  { %5101 = vmatprep.subr.bf16.mxu0 %v7692_v42  ;;  %5133 = vmatprep.subr.bf16.mxu1 %v7693_v38 }
 0x5c5   :  { %5103 = vmatpush1.bf16.msra.mxu0 %v7694_v60  ;;  %5135 = vmatpush1.bf16.msra.mxu1 %v7695_v7 }
 0x5c6   :  { %5105 = vmatprep.subr.bf16.mxu0 %v7696_v58  ;;  %5137 = vmatprep.subr.bf16.mxu1 %v7697_v45  ;;  %v7708_v45 = vld [vmem:[#allocation34_spill] sm:$0xff] }
 0x5c9   :  { %5107 = vmatpush1.bf16.msra.mxu0 %v7698_v15  ;;  %5139 = vmatpush1.bf16.msra.mxu1 %v7699_v52  ;;  %v7709_v15 = vld [vmem:[#allocation37_spill] sm:$0xff]  ;;  %v7710_v52 = vld [vmem:[#allocation36_spill] sm:$0xff] }
 0x5ca   :  { %5109 = vmatprep.subr.bf16.mxu0 %v7700_v57  ;;  %5141 = vmatprep.subr.bf16.mxu1 %v7701_v10  ;;  %v7711_v57 = vld [vmem:[#allocation39_spill] sm:$0xff]  ;;  %v7712_v10 = vld [vmem:[#allocation38_spill] sm:$0xff] }
 0x5cd   :  { %5111 = vmatpush1.bf16.msra.mxu0 %v7702_v23  ;;  %5143 = vmatpush1.bf16.msra.mxu1 %v7703_v46  ;;  %v7713_v23 = vld [vmem:[#allocation40_spill] sm:$0xff]  ;;  %v7746_v46 = vld [vmem:[#allocation103_spill] sm:$0xff] }
 0x5ce   :  { %5113 = vmatprep.subr.bf16.mxu0 %v7704_v48  ;;  %5145 = vmatprep.subr.bf16.mxu1 %v7705_v25  ;;  %v7714_v48 = vld [vmem:[#allocation41_spill] sm:$0xff]  ;;  %v7715_v25 = vld [vmem:[#allocation43_spill] sm:$0xff] }
 0x5d1   :  { %5115 = vmatpush1.bf16.msra.mxu0 %v7706_v4  ;;  %5147 = vmatpush1.bf16.msra.mxu1 %v7707_v36  ;;  %v7716_v4 = vld [vmem:[#allocation42_spill] sm:$0xff]  ;;  %v7717_v36 = vld [vmem:[#allocation44_spill] sm:$0xff] }
 0x5d2   :  { %5117 = vmatprep.subr.bf16.mxu0 %v7708_v45  ;;  %5149 = vmatprep.subr.bf16.mxu1 %v7709_v15  ;;  %v7727_v15 = vld [vmem:[#allocation55_spill] sm:$0xff]  ;;  %v7728_v45 = vld [vmem:[#allocation54_spill] sm:$0xff] }
 0x5d5   :  { %5119 = vmatpush1.bf16.msra.mxu0 %v7710_v52  ;;  %5151 = vmatpush1.bf16.msra.mxu1 %v7711_v57  ;;  %v7718_v52 = vld [vmem:[#allocation45_spill] sm:$0xff]  ;;  %v7719_v57 = vld [vmem:[#allocation47_spill] sm:$0xff] }
 0x5d6   :  { %5153 = vmatprep.subr.bf16.mxu0 %v7712_v10  ;;  %5185 = vmatprep.subr.bf16.mxu1 %v7713_v23  ;;  %v7720_v10 = vld [vmem:[#allocation46_spill] sm:$0xff]  ;;  %v7721_v23 = vld [vmem:[#allocation48_spill] sm:$0xff] }
 0x5d8   :  { %2735 = vmatmul.mubr.f32.vlgmr.msra.gmra.mrb[20].mxu0 %v2358_v51  ;;  %2806 = vmatmul.mubr.f32.vlgmr.msra.gmra.mrb[20].mxu1 %v2358_v51  ;;  %v7722_v51 = vld [vmem:[#allocation49_spill] sm:$0xff] }
 0x5d9   :  { %5155 = vmatpush1.bf16.msra.mxu0 %v7714_v48  ;;  %5187 = vmatpush1.bf16.msra.mxu1 %v7715_v25  ;;  %v7723_v48 = vld [vmem:[#allocation51_spill] sm:$0xff]  ;;  %v7724_v25 = vld [vmem:[#allocation50_spill] sm:$0xff] }
 0x5da   :  { %5157 = vmatprep.subr.bf16.mxu0 %v7716_v4  ;;  %5189 = vmatprep.subr.bf16.mxu1 %v7717_v36  ;;  %v7725_v4 = vld [vmem:[#allocation52_spill] sm:$0xff]  ;;  %v7726_v36 = vld [vmem:[#allocation53_spill] sm:$0xff] }
 0x5db   :  { %2898 = vmatprep.mubr.f32.mxu0 %v7461_v47  ;;  %2969 = vmatprep.mubr.f32.mxu1 %v7461_v47 }
 0x5dd   :  { %5159 = vmatpush1.bf16.msra.mxu0 %v7718_v52  ;;  %5191 = vmatpush1.bf16.msra.mxu1 %v7719_v57  ;;  %v7729_v52 = vld [vmem:[#allocation56_spill] sm:$0xff]  ;;  %v7730_v57 = vld [vmem:[#allocation57_spill] sm:$0xff] }
 0x5de   :  { %5161 = vmatprep.subr.bf16.mxu0 %v7720_v10  ;;  %5193 = vmatprep.subr.bf16.mxu1 %v7721_v23  ;;  %v7731_v10 = vld [vmem:[#allocation59_spill] sm:$0xff]  ;;  %v7732_v23 = vld [vmem:[#allocation58_spill] sm:$0xff] }
 0x5e1   :  { %5163 = vmatpush1.bf16.msra.mxu0 %v7722_v51  ;;  %5195 = vmatpush1.bf16.msra.mxu1 %v7723_v48  ;;  %v7733_v51 = vld [vmem:[#allocation60_spill] sm:$0xff]  ;;  %v7734_v48 = vld [vmem:[#allocation61_spill] sm:$0xff] }
 0x5e2   :  { %5165 = vmatprep.subr.bf16.mxu0 %v7724_v25  ;;  %5197 = vmatprep.subr.bf16.mxu1 %v7725_v4  ;;  %v7735_v25 = vld [vmem:[#allocation63_spill] sm:$0xff]  ;;  %v7736_v4 = vld [vmem:[#allocation62_spill] sm:$0xff] }
 0x5e5   :  { %5167 = vmatpush1.bf16.msra.mxu0 %v7726_v36  ;;  %5199 = vmatpush1.bf16.msra.mxu1 %v7727_v15  ;;  %v7737_v36 = vld [vmem:[#allocation64_spill] sm:$0xff]  ;;  %v7738_v15 = vld [vmem:[#allocation65_spill] sm:$0xff] }
 0x5e6   :  { %5169 = vmatprep.subr.bf16.mxu0 %v7728_v45  ;;  %5201 = vmatprep.subr.bf16.mxu1 %v7729_v52  ;;  %v7739_v45 = vld [vmem:[#allocation66_spill] sm:$0xff]  ;;  %v7740_v52 = vld [vmem:[#allocation67_spill] sm:$0xff] }
 0x5e9   :  { %5171 = vmatpush1.bf16.msra.mxu0 %v7730_v57  ;;  %5203 = vmatpush1.bf16.msra.mxu1 %v7731_v10  ;;  %v7741_v57 = vld [vmem:[#allocation68_spill] sm:$0xff]  ;;  %v7742_v10 = vld [vmem:[#allocation69_spill] sm:$0xff] }
 0x5ea   :  { %5173 = vmatprep.subr.bf16.mxu0 %v7732_v23  ;;  %5205 = vmatprep.subr.bf16.mxu1 %v7733_v51  ;;  %v7743_v23 = vld [vmem:[#allocation70_spill] sm:$0xff]  ;;  %v7744_v51 = vld [vmem:[#allocation71_spill] sm:$0xff] }
 0x5ed   :  { %5175 = vmatpush1.bf16.msra.mxu0 %v7734_v48  ;;  %5207 = vmatpush1.bf16.msra.mxu1 %v7735_v25  ;;  %v7745_v48 = vld [vmem:[#allocation72_spill] sm:$0xff] }
 0x5ee   :  { %5177 = vmatprep.subr.bf16.mxu0 %v7736_v4  ;;  %5209 = vmatprep.subr.bf16.mxu1 %v7737_v36 }
 0x5f1   :  { %5179 = vmatpush1.bf16.msra.mxu0 %v7738_v15  ;;  %5211 = vmatpush1.bf16.msra.mxu1 %v7739_v45 }
 0x5f2   :  { %5181 = vmatprep.subr.bf16.mxu0 %v7740_v52  ;;  %5213 = vmatprep.subr.bf16.mxu1 %v7741_v57 }
 0x5f5   :  { %5183 = vmatpush1.bf16.msra.mxu0 %v7742_v10  ;;  %5215 = vmatpush1.bf16.msra.mxu1 %v7743_v23  ;;  %v7747_v23 = vld [vmem:[#allocation105_spill] sm:$0xff] }
 0x5f6   :  { %5217 = vmatprep.subr.bf16.mxu0 %v7744_v51  ;;  %5249 = vmatprep.subr.bf16.mxu1 %v7745_v48 }
 0x68b   :  { %v2567_v25 = vpop.f32.mrb[18].mxu0  ;;  %v2638_v4 = vpop.f32.mrb[18].mxu1 }
 0x68c   :  { %v2643_v36 = vadd.f32 %v2567_v25, %v7746_v46  ;;  %v2569_v58 = vpop.f32.mrb[19].mxu0  ;;  %v2640_v15 = vpop.f32.mrb[19].mxu1  ;;  %v2645_v10 = vadd.f32 %v2638_v4, %v7747_v23 }
 0x68d   :  { %v2644_v45 = vadd.f32 %v2569_v58, %v6452_v13  ;;  %v2646_v57 = vadd.f32 %v2640_v15, %v7572_v49  ;;  %v2666_v15 = vld [vmem:[#allocation2 + $0xa0] sm:$0xff] }
 0x68e   :  { %v2647_v7 = vmul.f32 0.5, %v2643_v36  ;;  %v2649_v51 = vmul.f32 0.5, %v2645_v10 }
 0x68f   :  { %v2648_v52 = vmul.f32 0.5, %v2644_v45 }
 0x690   :  { %5796 = vtanh.f32 %v2647_v7 }
 0x691   :  { %5798 = vtanh.f32 %v2648_v52 }
 0x692   :  { %5800 = vtanh.f32 %v2646_v57  ;;  %v2667_v57 = vld [vmem:[#allocation2 + $0xa8] sm:$0xff] }
 0x693   :  { %5802 = vtanh.f32 %v2649_v51 }
 0x69a   :  { %v5797_v60 = vpop.eup %5796 }
 0x69b   :  { %v2653_v48 = vmul.f32 0.5, %v5797_v60  ;;  %v5799_v38 = vpop.eup %5798 }
 0x69c   :  { %v2654_v25 = vmul.f32 0.5, %v5799_v38  ;;  %v5801_v46 = vpop.eup %5800  ;;  %v2669_v38 = vld [vmem:[#allocation2 + $0xb8] sm:$0xff] }
 0x69d   :  { %v2656_v42 = vadd.f32 0.5, %v2653_v48  ;;  %v5803_v7 = vpop.eup %5802 }
 0x69e   :  { %v2657_v44 = vadd.f32 0.5, %v2654_v25  ;;  %v2655_v52 = vmul.f32 0.5, %v5803_v7 }
 0x69f   :  { %v2661_v32 = vmul.f32 %v5801_v46, %v2656_v42 }
 0x6a0   :  { %v2660_v58 = vmul.f32 %v2657_v44, %v6804_v12  ;;  %v2658_v23 = vadd.f32 0.5, %v2655_v52  ;;  %v2668_v44 = vld [vmem:[#allocation2 + $0xb0] sm:$0xff] }
 0x6a2   :  { %v6918_v45 = vadd.f32 %v2661_v32, %v2660_v58 }
 0x6a4   :  { %5804 = vtanh.f32 %v6918_v45 }
 0x6ab   :  { %v2736_v10 = vpop.f32.mrb[20].mxu0  ;;  %v2807_v4 = vpop.f32.mrb[20].mxu1 }
 0x6ac   :  { %v2812_v60 = vadd.f32 %v2736_v10, %v2666_v15  ;;  %v2738_v36 = vpop.f32.mrb[21].mxu0  ;;  %v2809_v48 = vpop.f32.mrb[21].mxu1  ;;  %v2814_v58 = vadd.f32 %v2807_v4, %v2668_v44  ;;  %v7750_v44 = vld [vmem:[#allocation18_spill] sm:$0xff] }
 0x6ad   :  { %v2813_v51 = vadd.f32 %v2738_v36, %v2667_v57  ;;  %v2815_v12 = vadd.f32 %v2809_v48, %v2669_v38 }
 0x6ae   :  { %v2816_v25 = vmul.f32 0.5, %v2812_v60  ;;  %v5805_v42 = vpop.eup %5804 }
 0x6af   :  { %v2817_v46 = vmul.f32 0.5, %v2813_v51  ;;  %v2664_v32 = vmul.f32 %v5805_v42, %v2658_v23  ;;  %v2818_v23 = vmul.f32 0.5, %v2814_v58  ;;  %v7751_v58 = vld [vmem:[#allocation21_spill] sm:$0xff] }
 0x6b0   :  { %5806 = vtanh.f32 %v2816_v25 }
 0x6b1   :  { %5808 = vtanh.f32 %v2817_v46  ;;  %2899 = vmatmul.mubr.f32.vlgmr.msra.gmra.mrb[22].mxu0 %v2664_v32  ;;  %2970 = vmatmul.mubr.f32.vlgmr.msra.gmra.mrb[22].mxu1 %v2664_v32  ;;  %v7749_v32 = vld [vmem:[#allocation19_spill] sm:$0xff] }
 0x6b2   :  { %5219 = vmatpush1.bf16.msra.mxu0 %v7515_v56  ;;  %5251 = vmatpush1.bf16.msra.mxu1 %v7516_v59  ;;  %5810 = vtanh.f32 %v2815_v12  ;;  %v7748_v12 = vld [vmem:[#allocation17_spill] sm:$0xff] }
 0x6b3   :  { %5221 = vmatprep.subr.bf16.mxu0 %v7517_v0  ;;  %5253 = vmatprep.subr.bf16.mxu1 %v7574_v21  ;;  %5812 = vtanh.f32 %v2818_v23  ;;  %v7752_v23 = vld [vmem:[#allocation20_spill] sm:$0xff] }
 0x6b4   :  { %3040 = vmatprep.mubr.f32.mxu0 %v7461_v47  ;;  %3111 = vmatprep.mubr.f32.mxu1 %v7461_v47 }
 0x6b6   :  { %5223 = vmatpush1.bf16.msra.mxu0 %v7575_v62  ;;  %5255 = vmatpush1.bf16.msra.mxu1 %v7576_v50 }
 0x6b7   :  { %5225 = vmatprep.subr.bf16.mxu0 %v7577_v24  ;;  %5257 = vmatprep.subr.bf16.mxu1 %v7578_v40 }
 0x6ba   :  { %v5807_v7 = vpop.eup %5806  ;;  %5227 = vmatpush1.bf16.msra.mxu0 %v7632_v53  ;;  %5259 = vmatpush1.bf16.msra.mxu1 %v7633_v27 }
 0x6bb   :  { %v2822_v15 = vmul.f32 0.5, %v5807_v7  ;;  %v5809_v52 = vpop.eup %5808  ;;  %5229 = vmatprep.subr.bf16.mxu0 %v7634_v34  ;;  %5261 = vmatprep.subr.bf16.mxu1 %v7526_v17  ;;  %v7753_v7 = vld [vmem:[#allocation23_spill] sm:$0xff] }
 0x6bc   :  { %v2823_v10 = vmul.f32 0.5, %v5809_v52  ;;  %v5811_v4 = vpop.eup %5810  ;;  %v7755_v52 = vld [vmem:[#allocation25_spill] sm:$0xff] }
 0x6bd   :  { %v2825_v57 = vadd.f32 0.5, %v2822_v15  ;;  %v5813_v38 = vpop.eup %5812  ;;  %v7754_v15 = vld [vmem:[#allocation22_spill] sm:$0xff] }
 0x6be   :  { %v2826_v60 = vadd.f32 0.5, %v2823_v10  ;;  %5231 = vmatpush1.bf16.msra.mxu0 %v7527_v54  ;;  %5263 = vmatpush1.bf16.msra.mxu1 %v7528_v33  ;;  %v7757_v10 = vld [vmem:[#allocation27_spill] sm:$0xff] }
 0x6bf   :  { %v2830_v36 = vmul.f32 %v5811_v4, %v2825_v57  ;;  %5233 = vmatprep.subr.bf16.mxu0 %v7582_v14  ;;  %5265 = vmatprep.subr.bf16.mxu1 %v7635_v29  ;;  %v7756_v57 = vld [vmem:[#allocation24_spill] sm:$0xff]  ;;  %v7758_v4 = vld [vmem:[#allocation26_spill] sm:$0xff] }
 0x6c0   :  { %v2829_v48 = vmul.f32 %v2826_v60, %v6826_v63  ;;  %v2824_v63 = vmul.f32 0.5, %v5813_v38  ;;  %v7759_v60 = vld [vmem:[#allocation29_spill] sm:$0xff]  ;;  %v7762_v38 = vld [vmem:[#allocation30_spill] sm:$0xff] }
 0x6c2   :  { %v6940_v51 = vadd.f32 %v2830_v36, %v2829_v48  ;;  %5235 = vmatpush1.bf16.msra.mxu0 %v7585_v61  ;;  %5267 = vmatpush1.bf16.msra.mxu1 %v7586_v2  ;;  %v2827_v25 = vadd.f32 0.5, %v2824_v63  ;;  %v7760_v36 = vld [vmem:[#allocation28_spill] sm:$0xff]  ;;  %v7761_v48 = vld [vmem:[#allocation31_spill] sm:$0xff]  ;;  %v7763_v63 = vld [vmem:[#allocation33_spill] sm:$0xff] }
 0x6c3   :  { %5237 = vmatprep.subr.bf16.mxu0 %v7587_v35  ;;  %5269 = vmatprep.subr.bf16.mxu1 %v7588_v3 }
 0x6c4   :  { %5814 = vtanh.f32 %v6940_v51 }
 0x6c6   :  { %5239 = vmatpush1.bf16.msra.mxu0 %v7589_v43  ;;  %5271 = vmatpush1.bf16.msra.mxu1 %v7590_v6 }
 0x6c7   :  { %5241 = vmatprep.subr.bf16.mxu0 %v7591_v1  ;;  %5273 = vmatprep.subr.bf16.mxu1 %v7539_v37 }
 0x6ca   :  { %5243 = vmatpush1.bf16.msra.mxu0 %v7540_v41  ;;  %5275 = vmatpush1.bf16.msra.mxu1 %v7541_v11 }
 0x6cb   :  { %5245 = vmatprep.subr.bf16.mxu0 %v7542_v19  ;;  %5277 = vmatprep.subr.bf16.mxu1 %v7543_v31 }
 0x6ce   :  { %v5815_v42 = vpop.eup %5814  ;;  %5247 = vmatpush1.bf16.msra.mxu0 %v7544_v5  ;;  %5279 = vmatpush1.bf16.msra.mxu1 %v7545_v28 }
 0x6cf   :  { %v2833_v46 = vmul.f32 %v5815_v42, %v2827_v25  ;;  %5281 = vmatprep.subr.bf16.mxu0 %v7546_v20  ;;  %5313 = vmatprep.subr.bf16.mxu1 %v7547_v55  ;;  %v7764_v25 = vld [vmem:[#allocation32_spill] sm:$0xff]  ;;  %v7765_v42 = vld [vmem:[#allocation35_spill] sm:$0xff] }
 0x6d1   :  { %3041 = vmatmul.mubr.f32.vlgmr.msra.gmra.mrb[22].mxu0 %v2833_v46  ;;  %3112 = vmatmul.mubr.f32.vlgmr.msra.gmra.mrb[22].mxu1 %v2833_v46 }
 0x6d2   :  { %5283 = vmatpush1.bf16.msra.mxu0 %v6080_v8  ;;  %5315 = vmatpush1.bf16.msra.mxu1 %v6090_v18 }
 0x6d3   :  { %5285 = vmatprep.subr.bf16.mxu0 %v6082_v9  ;;  %5317 = vmatprep.subr.bf16.mxu1 %v6096_v26 }
 0x6d4   :  { %3209 = vmatprep.mubr.f32.mxu0 %v7461_v47  ;;  %3280 = vmatprep.mubr.f32.mxu1 %v7461_v47 }
 0x6d6   :  { %5287 = vmatpush1.bf16.msra.mxu0 %v6086_v16  ;;  %5319 = vmatpush1.bf16.msra.mxu1 %v6099_v30 }
 0x6d7   :  { %5289 = vmatprep.subr.bf16.mxu0 %v6093_v22  ;;  %5321 = vmatprep.subr.bf16.mxu1 %v6108_v39 }
 0x6da   :  { %5291 = vmatpush1.bf16.msra.mxu0 %v7748_v12  ;;  %5323 = vmatpush1.bf16.msra.mxu1 %v7749_v32 }
 0x6db   :  { %5293 = vmatprep.subr.bf16.mxu0 %v7750_v44  ;;  %5325 = vmatprep.subr.bf16.mxu1 %v7751_v58 }
 0x6de   :  { %5295 = vmatpush1.bf16.msra.mxu0 %v7752_v23  ;;  %5327 = vmatpush1.bf16.msra.mxu1 %v7753_v7 }
 0x6df   :  { %5297 = vmatprep.subr.bf16.mxu0 %v7754_v15  ;;  %5329 = vmatprep.subr.bf16.mxu1 %v7755_v52  ;;  %v7766_v52 = vld [vmem:[#allocation34_spill] sm:$0xff] }
 0x6e2   :  { %5299 = vmatpush1.bf16.msra.mxu0 %v7756_v57  ;;  %5331 = vmatpush1.bf16.msra.mxu1 %v7757_v10  ;;  %v7767_v57 = vld [vmem:[#allocation37_spill] sm:$0xff]  ;;  %v7768_v10 = vld [vmem:[#allocation36_spill] sm:$0xff] }
 0x6e3   :  { %5301 = vmatprep.subr.bf16.mxu0 %v7758_v4  ;;  %5333 = vmatprep.subr.bf16.mxu1 %v7759_v60  ;;  %v7769_v4 = vld [vmem:[#allocation39_spill] sm:$0xff]  ;;  %v7770_v60 = vld [vmem:[#allocation38_spill] sm:$0xff] }
 0x6e6   :  { %5303 = vmatpush1.bf16.msra.mxu0 %v7760_v36  ;;  %5335 = vmatpush1.bf16.msra.mxu1 %v7761_v48  ;;  %v7771_v36 = vld [vmem:[#allocation40_spill] sm:$0xff]  ;;  %v7804_v48 = vld [vmem:[#allocation103_spill] sm:$0xff] }
 0x6e7   :  { %5305 = vmatprep.subr.bf16.mxu0 %v7762_v38  ;;  %5337 = vmatprep.subr.bf16.mxu1 %v7763_v63  ;;  %v7772_v38 = vld [vmem:[#allocation41_spill] sm:$0xff]  ;;  %v7773_v63 = vld [vmem:[#allocation43_spill] sm:$0xff] }
 0x6ea   :  { %5307 = vmatpush1.bf16.msra.mxu0 %v7764_v25  ;;  %5339 = vmatpush1.bf16.msra.mxu1 %v7765_v42  ;;  %v7774_v25 = vld [vmem:[#allocation42_spill] sm:$0xff]  ;;  %v7775_v42 = vld [vmem:[#allocation44_spill] sm:$0xff] }
 0x6eb   :  { %5309 = vmatprep.subr.bf16.mxu0 %v7766_v52  ;;  %5341 = vmatprep.subr.bf16.mxu1 %v7767_v57  ;;  %v7785_v57 = vld [vmem:[#allocation55_spill] sm:$0xff]  ;;  %v7786_v52 = vld [vmem:[#allocation54_spill] sm:$0xff] }
 0x6ee   :  { %5311 = vmatpush1.bf16.msra.mxu0 %v7768_v10  ;;  %5343 = vmatpush1.bf16.msra.mxu1 %v7769_v4  ;;  %v7776_v10 = vld [vmem:[#allocation45_spill] sm:$0xff]  ;;  %v7777_v4 = vld [vmem:[#allocation47_spill] sm:$0xff] }
 0x6ef   :  { %5345 = vmatprep.subr.bf16.mxu0 %v7770_v60  ;;  %5377 = vmatprep.subr.bf16.mxu1 %v7771_v36  ;;  %v7778_v60 = vld [vmem:[#allocation46_spill] sm:$0xff]  ;;  %v7779_v36 = vld [vmem:[#allocation48_spill] sm:$0xff] }
 0x6f1   :  { %3210 = vmatmul.mubr.f32.vlgmr.msra.gmra.mrb[24].mxu0 %v2833_v46  ;;  %3281 = vmatmul.mubr.f32.vlgmr.msra.gmra.mrb[24].mxu1 %v2833_v46  ;;  %v7780_v46 = vld [vmem:[#allocation49_spill] sm:$0xff] }
 0x6f2   :  { %5347 = vmatpush1.bf16.msra.mxu0 %v7772_v38  ;;  %5379 = vmatpush1.bf16.msra.mxu1 %v7773_v63  ;;  %v7781_v38 = vld [vmem:[#allocation51_spill] sm:$0xff]  ;;  %v7782_v63 = vld [vmem:[#allocation50_spill] sm:$0xff] }
 0x6f3   :  { %5349 = vmatprep.subr.bf16.mxu0 %v7774_v25  ;;  %5381 = vmatprep.subr.bf16.mxu1 %v7775_v42  ;;  %v7783_v25 = vld [vmem:[#allocation52_spill] sm:$0xff]  ;;  %v7784_v42 = vld [vmem:[#allocation53_spill] sm:$0xff] }
 0x6f4   :  { %3373 = vmatprep.mubr.f32.mxu0 %v7461_v47  ;;  %3444 = vmatprep.mubr.f32.mxu1 %v7461_v47 }
 0x6f6   :  { %5351 = vmatpush1.bf16.msra.mxu0 %v7776_v10  ;;  %5383 = vmatpush1.bf16.msra.mxu1 %v7777_v4  ;;  %v7787_v10 = vld [vmem:[#allocation56_spill] sm:$0xff]  ;;  %v7788_v4 = vld [vmem:[#allocation57_spill] sm:$0xff] }
 0x6f7   :  { %5353 = vmatprep.subr.bf16.mxu0 %v7778_v60  ;;  %5385 = vmatprep.subr.bf16.mxu1 %v7779_v36  ;;  %v7789_v60 = vld [vmem:[#allocation59_spill] sm:$0xff]  ;;  %v7790_v36 = vld [vmem:[#allocation58_spill] sm:$0xff] }
 0x6fa   :  { %5355 = vmatpush1.bf16.msra.mxu0 %v7780_v46  ;;  %5387 = vmatpush1.bf16.msra.mxu1 %v7781_v38  ;;  %v7791_v46 = vld [vmem:[#allocation60_spill] sm:$0xff]  ;;  %v7792_v38 = vld [vmem:[#allocation61_spill] sm:$0xff] }
 0x6fb   :  { %5357 = vmatprep.subr.bf16.mxu0 %v7782_v63  ;;  %5389 = vmatprep.subr.bf16.mxu1 %v7783_v25  ;;  %v7793_v63 = vld [vmem:[#allocation63_spill] sm:$0xff]  ;;  %v7794_v25 = vld [vmem:[#allocation62_spill] sm:$0xff] }
 0x6fe   :  { %5359 = vmatpush1.bf16.msra.mxu0 %v7784_v42  ;;  %5391 = vmatpush1.bf16.msra.mxu1 %v7785_v57  ;;  %v7795_v42 = vld [vmem:[#allocation64_spill] sm:$0xff]  ;;  %v7796_v57 = vld [vmem:[#allocation65_spill] sm:$0xff] }
 0x6ff   :  { %5361 = vmatprep.subr.bf16.mxu0 %v7786_v52  ;;  %5393 = vmatprep.subr.bf16.mxu1 %v7787_v10  ;;  %v7797_v52 = vld [vmem:[#allocation66_spill] sm:$0xff]  ;;  %v7798_v10 = vld [vmem:[#allocation67_spill] sm:$0xff] }
 0x702   :  { %5363 = vmatpush1.bf16.msra.mxu0 %v7788_v4  ;;  %5395 = vmatpush1.bf16.msra.mxu1 %v7789_v60  ;;  %v7799_v4 = vld [vmem:[#allocation68_spill] sm:$0xff]  ;;  %v7800_v60 = vld [vmem:[#allocation69_spill] sm:$0xff] }
 0x703   :  { %5365 = vmatprep.subr.bf16.mxu0 %v7790_v36  ;;  %5397 = vmatprep.subr.bf16.mxu1 %v7791_v46  ;;  %v7801_v36 = vld [vmem:[#allocation70_spill] sm:$0xff]  ;;  %v7802_v46 = vld [vmem:[#allocation71_spill] sm:$0xff] }
 0x706   :  { %5367 = vmatpush1.bf16.msra.mxu0 %v7792_v38  ;;  %5399 = vmatpush1.bf16.msra.mxu1 %v7793_v63  ;;  %v7803_v38 = vld [vmem:[#allocation72_spill] sm:$0xff] }
 0x707   :  { %5369 = vmatprep.subr.bf16.mxu0 %v7794_v25  ;;  %5401 = vmatprep.subr.bf16.mxu1 %v7795_v42 }
 0x70a   :  { %5371 = vmatpush1.bf16.msra.mxu0 %v7796_v57  ;;  %5403 = vmatpush1.bf16.msra.mxu1 %v7797_v52 }
 0x70b   :  { %5373 = vmatprep.subr.bf16.mxu0 %v7798_v10  ;;  %5405 = vmatprep.subr.bf16.mxu1 %v7799_v4 }
 0x70e   :  { %5375 = vmatpush1.bf16.msra.mxu0 %v7800_v60  ;;  %5407 = vmatpush1.bf16.msra.mxu1 %v7801_v36  ;;  %v7805_v36 = vld [vmem:[#allocation105_spill] sm:$0xff] }
 0x70f   :  { %5409 = vmatprep.subr.bf16.mxu0 %v7802_v46  ;;  %5441 = vmatprep.subr.bf16.mxu1 %v7803_v38 }
 0x7a4   :  { %v3042_v63 = vpop.f32.mrb[22].mxu0  ;;  %v3113_v25 = vpop.f32.mrb[22].mxu1 }
 0x7a5   :  { %v3118_v42 = vadd.f32 %v3042_v63, %v7804_v48  ;;  %v3044_v15 = vpop.f32.mrb[23].mxu0  ;;  %v3115_v57 = vpop.f32.mrb[23].mxu1  ;;  %v3120_v60 = vadd.f32 %v3113_v25, %v7805_v36 }
 0x7a6   :  { %v3119_v52 = vadd.f32 %v3044_v15, %v6452_v13  ;;  %v3121_v4 = vadd.f32 %v3115_v57, %v7572_v49  ;;  %v3141_v57 = vld [vmem:[#allocation2 + $0xc0] sm:$0xff] }
 0x7a7   :  { %v3122_v7 = vmul.f32 0.5, %v3118_v42  ;;  %v3124_v46 = vmul.f32 0.5, %v3120_v60 }
 0x7a8   :  { %v3123_v10 = vmul.f32 0.5, %v3119_v52 }
 0x7a9   :  { %5816 = vtanh.f32 %v3122_v7 }
 0x7aa   :  { %5818 = vtanh.f32 %v3123_v10 }
 0x7ab   :  { %5820 = vtanh.f32 %v3121_v4  ;;  %v3142_v4 = vld [vmem:[#allocation2 + $0xc8] sm:$0xff] }
 0x7ac   :  { %5822 = vtanh.f32 %v3124_v46 }
 0x7b3   :  { %v5817_v23 = vpop.eup %5816 }
 0x7b4   :  { %v3128_v38 = vmul.f32 0.5, %v5817_v23  ;;  %v5819_v58 = vpop.eup %5818 }
 0x7b5   :  { %v3129_v63 = vmul.f32 0.5, %v5819_v58  ;;  %v5821_v48 = vpop.eup %5820  ;;  %v3144_v58 = vld [vmem:[#allocation2 + $0xd8] sm:$0xff] }
 0x7b6   :  { %v3131_v44 = vadd.f32 0.5, %v3128_v38  ;;  %v5823_v7 = vpop.eup %5822 }
 0x7b7   :  { %v3132_v32 = vadd.f32 0.5, %v3129_v63  ;;  %v3130_v10 = vmul.f32 0.5, %v5823_v7 }
 0x7b8   :  { %v3136_v12 = vmul.f32 %v5821_v48, %v3131_v44 }
 0x7b9   :  { %v3135_v15 = vmul.f32 %v3132_v32, %v6918_v45  ;;  %v3133_v36 = vadd.f32 0.5, %v3130_v10  ;;  %v3143_v32 = vld [vmem:[#allocation2 + $0xd0] sm:$0xff] }
 0x7bb   :  { %v7032_v52 = vadd.f32 %v3136_v12, %v3135_v15 }
 0x7bd   :  { %5824 = vtanh.f32 %v7032_v52 }
 0x7c4   :  { %v3211_v60 = vpop.f32.mrb[24].mxu0  ;;  %v3282_v25 = vpop.f32.mrb[24].mxu1 }
 0x7c5   :  { %v3287_v23 = vadd.f32 %v3211_v60, %v3141_v57  ;;  %v3213_v42 = vpop.f32.mrb[25].mxu0  ;;  %v3284_v38 = vpop.f32.mrb[25].mxu1  ;;  %v3289_v15 = vadd.f32 %v3282_v25, %v3143_v32  ;;  %v7818_v32 = vld [vmem:[#allocation28_spill] sm:$0xff] }
 0x7c6   :  { %v3288_v46 = vadd.f32 %v3213_v42, %v3142_v4  ;;  %v3290_v45 = vadd.f32 %v3284_v38, %v3144_v58 }
 0x7c7   :  { %v3291_v63 = vmul.f32 0.5, %v3287_v23  ;;  %v5825_v44 = vpop.eup %5824 }
 0x7c8   :  { %v3292_v48 = vmul.f32 0.5, %v3288_v46  ;;  %v3139_v12 = vmul.f32 %v5825_v44, %v3133_v36  ;;  %v3293_v36 = vmul.f32 0.5, %v3289_v15  ;;  %v7819_v15 = vld [vmem:[#allocation31_spill] sm:$0xff] }
 0x7c9   :  { %5826 = vtanh.f32 %v3291_v63 }
 0x7ca   :  { %5828 = vtanh.f32 %v3292_v48  ;;  %3374 = vmatmul.mubr.f32.vlgmr.msra.gmra.mrb[26].mxu0 %v3139_v12  ;;  %3445 = vmatmul.mubr.f32.vlgmr.msra.gmra.mrb[26].mxu1 %v3139_v12  ;;  %v7817_v12 = vld [vmem:[#allocation29_spill] sm:$0xff] }
 0x7cb   :  { %5411 = vmatpush1.bf16.msra.mxu0 %v7515_v56  ;;  %5443 = vmatpush1.bf16.msra.mxu1 %v7516_v59  ;;  %5830 = vtanh.f32 %v3290_v45  ;;  %v7812_v45 = vld [vmem:[#allocation22_spill] sm:$0xff] }
 0x7cc   :  { %5413 = vmatprep.subr.bf16.mxu0 %v7517_v0  ;;  %5445 = vmatprep.subr.bf16.mxu1 %v7574_v21  ;;  %5832 = vtanh.f32 %v3293_v36  ;;  %v7820_v36 = vld [vmem:[#allocation30_spill] sm:$0xff] }
 0x7cd   :  { %3515 = vmatprep.mubr.f32.mxu0 %v7461_v47  ;;  %3586 = vmatprep.mubr.f32.mxu1 %v7461_v47 }
 0x7cf   :  { %5415 = vmatpush1.bf16.msra.mxu0 %v7575_v62  ;;  %5447 = vmatpush1.bf16.msra.mxu1 %v7576_v50 }
 0x7d0   :  { %5417 = vmatprep.subr.bf16.mxu0 %v7577_v24  ;;  %5449 = vmatprep.subr.bf16.mxu1 %v7578_v40 }
 0x7d3   :  { %v5827_v7 = vpop.eup %5826  ;;  %5419 = vmatpush1.bf16.msra.mxu0 %v7632_v53  ;;  %5451 = vmatpush1.bf16.msra.mxu1 %v7633_v27 }
 0x7d4   :  { %v3297_v57 = vmul.f32 0.5, %v5827_v7  ;;  %v5829_v10 = vpop.eup %5828  ;;  %5421 = vmatprep.subr.bf16.mxu0 %v7634_v34  ;;  %5453 = vmatprep.subr.bf16.mxu1 %v7526_v17  ;;  %v7821_v7 = vld [vmem:[#allocation33_spill] sm:$0xff] }
 0x7d5   :  { %v3298_v60 = vmul.f32 0.5, %v5829_v10  ;;  %v5831_v25 = vpop.eup %5830  ;;  %v7823_v10 = vld [vmem:[#allocation35_spill] sm:$0xff] }
 0x7d6   :  { %v3300_v4 = vadd.f32 0.5, %v3297_v57  ;;  %v5833_v58 = vpop.eup %5832  ;;  %v7822_v57 = vld [vmem:[#allocation32_spill] sm:$0xff] }
 0x7d7   :  { %v3301_v23 = vadd.f32 0.5, %v3298_v60  ;;  %5423 = vmatpush1.bf16.msra.mxu0 %v7527_v54  ;;  %5455 = vmatpush1.bf16.msra.mxu1 %v7528_v33  ;;  %v7825_v60 = vld [vmem:[#allocation37_spill] sm:$0xff] }
 0x7d8   :  { %v3305_v42 = vmul.f32 %v5831_v25, %v3300_v4  ;;  %5425 = vmatprep.subr.bf16.mxu0 %v7582_v14  ;;  %5457 = vmatprep.subr.bf16.mxu1 %v7635_v29  ;;  %v7824_v4 = vld [vmem:[#allocation34_spill] sm:$0xff]  ;;  %v7826_v25 = vld [vmem:[#allocation36_spill] sm:$0xff] }
 0x7d9   :  { %v3304_v38 = vmul.f32 %v3301_v23, %v6940_v51  ;;  %v3299_v51 = vmul.f32 0.5, %v5833_v58  ;;  %v7827_v23 = vld [vmem:[#allocation39_spill] sm:$0xff]  ;;  %v7830_v58 = vld [vmem:[#allocation41_spill] sm:$0xff] }
 0x7db   :  { %v7054_v46 = vadd.f32 %v3305_v42, %v3304_v38  ;;  %5427 = vmatpush1.bf16.msra.mxu0 %v7585_v61  ;;  %5459 = vmatpush1.bf16.msra.mxu1 %v7586_v2  ;;  %v3302_v63 = vadd.f32 0.5, %v3299_v51  ;;  %v7828_v42 = vld [vmem:[#allocation38_spill] sm:$0xff]  ;;  %v7829_v38 = vld [vmem:[#allocation40_spill] sm:$0xff]  ;;  %v7831_v51 = vld [vmem:[#allocation43_spill] sm:$0xff] }
 0x7dc   :  { %5429 = vmatprep.subr.bf16.mxu0 %v7587_v35  ;;  %5461 = vmatprep.subr.bf16.mxu1 %v7588_v3 }
 0x7dd   :  { %5834 = vtanh.f32 %v7054_v46 }
 0x7df   :  { %5431 = vmatpush1.bf16.msra.mxu0 %v7589_v43  ;;  %5463 = vmatpush1.bf16.msra.mxu1 %v7590_v6 }
 0x7e0   :  { %5433 = vmatprep.subr.bf16.mxu0 %v7591_v1  ;;  %5465 = vmatprep.subr.bf16.mxu1 %v7539_v37 }
 0x7e3   :  { %5435 = vmatpush1.bf16.msra.mxu0 %v7540_v41  ;;  %5467 = vmatpush1.bf16.msra.mxu1 %v7541_v11 }
 0x7e4   :  { %5437 = vmatprep.subr.bf16.mxu0 %v7542_v19  ;;  %5469 = vmatprep.subr.bf16.mxu1 %v7543_v31 }
 0x7e7   :  { %v5835_v44 = vpop.eup %5834  ;;  %5439 = vmatpush1.bf16.msra.mxu0 %v7544_v5  ;;  %5471 = vmatpush1.bf16.msra.mxu1 %v7545_v28 }
 0x7e8   :  { %5473 = vmatprep.subr.bf16.mxu0 %v7546_v20  ;;  %5505 = vmatprep.subr.bf16.mxu1 %v7547_v55  ;;  %v3308_v48 = vmul.f32 %v5835_v44, %v3302_v63  ;;  %v7806_v55 = vld [vmem:[#allocation17_spill] sm:$0xff]  ;;  %v7811_v20 = vld [vmem:[#allocation23_spill] sm:$0xff]  ;;  %v7832_v63 = vld [vmem:[#allocation42_spill] sm:$0xff] }
 0x7e9   :  { %v7833_v44 = vld [vmem:[#allocation44_spill] sm:$0xff] }
 0x7ea   :  { %3516 = vmatmul.mubr.f32.vlgmr.msra.gmra.mrb[26].mxu0 %v3308_v48  ;;  %3587 = vmatmul.mubr.f32.vlgmr.msra.gmra.mrb[26].mxu1 %v3308_v48 }
 0x7eb   :  { %5475 = vmatpush1.bf16.msra.mxu0 %v6080_v8  ;;  %5507 = vmatpush1.bf16.msra.mxu1 %v6090_v18  ;;  %v7807_v8 = vld [vmem:[#allocation19_spill] sm:$0xff]  ;;  %v7808_v18 = vld [vmem:[#allocation18_spill] sm:$0xff] }
 0x7ec   :  { %5477 = vmatprep.subr.bf16.mxu0 %v6082_v9  ;;  %5509 = vmatprep.subr.bf16.mxu1 %v6096_v26  ;;  %v7809_v9 = vld [vmem:[#allocation21_spill] sm:$0xff]  ;;  %v7810_v26 = vld [vmem:[#allocation20_spill] sm:$0xff] }
 0x7ed   :  { %3684 = vmatprep.mubr.f32.mxu0 %v7461_v47  ;;  %3755 = vmatprep.mubr.f32.mxu1 %v7461_v47 }
 0x7ef   :  { %5479 = vmatpush1.bf16.msra.mxu0 %v6086_v16  ;;  %5511 = vmatpush1.bf16.msra.mxu1 %v6099_v30  ;;  %v7813_v16 = vld [vmem:[#allocation25_spill] sm:$0xff]  ;;  %v7814_v30 = vld [vmem:[#allocation24_spill] sm:$0xff] }
 0x7f0   :  { %5481 = vmatprep.subr.bf16.mxu0 %v6093_v22  ;;  %5513 = vmatprep.subr.bf16.mxu1 %v6108_v39  ;;  %v7815_v22 = vld [vmem:[#allocation27_spill] sm:$0xff]  ;;  %v7816_v39 = vld [vmem:[#allocation26_spill] sm:$0xff] }
 0x7f3   :  { %5483 = vmatpush1.bf16.msra.mxu0 %v7806_v55  ;;  %5515 = vmatpush1.bf16.msra.mxu1 %v7807_v8  ;;  %v7834_v55 = vld [vmem:[#allocation45_spill] sm:$0xff]  ;;  %v7835_v8 = vld [vmem:[#allocation47_spill] sm:$0xff] }
 0x7f4   :  { %5485 = vmatprep.subr.bf16.mxu0 %v7808_v18  ;;  %5517 = vmatprep.subr.bf16.mxu1 %v7809_v9  ;;  %v7836_v18 = vld [vmem:[#allocation46_spill] sm:$0xff]  ;;  %v7837_v9 = vld [vmem:[#allocation48_spill] sm:$0xff] }
 0x7f7   :  { %5487 = vmatpush1.bf16.msra.mxu0 %v7810_v26  ;;  %5519 = vmatpush1.bf16.msra.mxu1 %v7811_v20  ;;  %v7839_v26 = vld [vmem:[#allocation51_spill] sm:$0xff]  ;;  %v7840_v20 = vld [vmem:[#allocation50_spill] sm:$0xff] }
 0x7f8   :  { %5489 = vmatprep.subr.bf16.mxu0 %v7812_v45  ;;  %5521 = vmatprep.subr.bf16.mxu1 %v7813_v16  ;;  %v7841_v45 = vld [vmem:[#allocation52_spill] sm:$0xff]  ;;  %v7842_v16 = vld [vmem:[#allocation53_spill] sm:$0xff] }
 0x7fb   :  { %5491 = vmatpush1.bf16.msra.mxu0 %v7814_v30  ;;  %5523 = vmatpush1.bf16.msra.mxu1 %v7815_v22  ;;  %v7843_v30 = vld [vmem:[#allocation55_spill] sm:$0xff]  ;;  %v7844_v22 = vld [vmem:[#allocation54_spill] sm:$0xff] }
 0x7fc   :  { %5493 = vmatprep.subr.bf16.mxu0 %v7816_v39  ;;  %5525 = vmatprep.subr.bf16.mxu1 %v7817_v12  ;;  %v7845_v39 = vld [vmem:[#allocation56_spill] sm:$0xff]  ;;  %v7846_v12 = vld [vmem:[#allocation57_spill] sm:$0xff] }
 0x7ff   :  { %5495 = vmatpush1.bf16.msra.mxu0 %v7818_v32  ;;  %5527 = vmatpush1.bf16.msra.mxu1 %v7819_v15  ;;  %v7847_v32 = vld [vmem:[#allocation59_spill] sm:$0xff]  ;;  %v7848_v15 = vld [vmem:[#allocation58_spill] sm:$0xff] }
 0x800   :  { %5497 = vmatprep.subr.bf16.mxu0 %v7820_v36  ;;  %5529 = vmatprep.subr.bf16.mxu1 %v7821_v7  ;;  %v7849_v36 = vld [vmem:[#allocation60_spill] sm:$0xff]  ;;  %v7850_v7 = vld [vmem:[#allocation61_spill] sm:$0xff] }
 0x803   :  { %5499 = vmatpush1.bf16.msra.mxu0 %v7822_v57  ;;  %5531 = vmatpush1.bf16.msra.mxu1 %v7823_v10  ;;  %v7851_v57 = vld [vmem:[#allocation63_spill] sm:$0xff]  ;;  %v7852_v10 = vld [vmem:[#allocation62_spill] sm:$0xff] }
 0x804   :  { %5501 = vmatprep.subr.bf16.mxu0 %v7824_v4  ;;  %5533 = vmatprep.subr.bf16.mxu1 %v7825_v60  ;;  %v7853_v4 = vld [vmem:[#allocation64_spill] sm:$0xff]  ;;  %v7854_v60 = vld [vmem:[#allocation65_spill] sm:$0xff] }
 0x807   :  { %5503 = vmatpush1.bf16.msra.mxu0 %v7826_v25  ;;  %5535 = vmatpush1.bf16.msra.mxu1 %v7827_v23  ;;  %v7855_v25 = vld [vmem:[#allocation66_spill] sm:$0xff]  ;;  %v7856_v23 = vld [vmem:[#allocation67_spill] sm:$0xff] }
 0x808   :  { %5537 = vmatprep.subr.bf16.mxu0 %v7828_v42  ;;  %5569 = vmatprep.subr.bf16.mxu1 %v7829_v38  ;;  %v7857_v42 = vld [vmem:[#allocation68_spill] sm:$0xff]  ;;  %v7858_v38 = vld [vmem:[#allocation69_spill] sm:$0xff] }
 0x80a   :  { %3685 = vmatmul.mubr.f32.vlgmr.msra.gmra.mrb[28].mxu0 %v3308_v48  ;;  %3756 = vmatmul.mubr.f32.vlgmr.msra.gmra.mrb[28].mxu1 %v3308_v48  ;;  %v7838_v48 = vld [vmem:[#allocation49_spill] sm:$0xff] }
 0x80b   :  { %5539 = vmatpush1.bf16.msra.mxu0 %v7830_v58  ;;  %5571 = vmatpush1.bf16.msra.mxu1 %v7831_v51  ;;  %v7859_v58 = vld [vmem:[#allocation70_spill] sm:$0xff]  ;;  %v7860_v51 = vld [vmem:[#allocation71_spill] sm:$0xff] }
 0x80c   :  { %5541 = vmatprep.subr.bf16.mxu0 %v7832_v63  ;;  %5573 = vmatprep.subr.bf16.mxu1 %v7833_v44  ;;  %v7861_v63 = vld [vmem:[#allocation72_spill] sm:$0xff] }
 0x80d   :  { %3848 = vmatprep.mubr.f32.mxu0 %v7461_v47  ;;  %3919 = vmatprep.mubr.f32.mxu1 %v7461_v47 }
 0x80f   :  { %5543 = vmatpush1.bf16.msra.mxu0 %v7834_v55  ;;  %5575 = vmatpush1.bf16.msra.mxu1 %v7835_v8  ;;  %v7862_v8 = vld [vmem:[#allocation103_spill] sm:$0xff] }
 0x810   :  { %5545 = vmatprep.subr.bf16.mxu0 %v7836_v18  ;;  %5577 = vmatprep.subr.bf16.mxu1 %v7837_v9 }
 0x813   :  { %5547 = vmatpush1.bf16.msra.mxu0 %v7838_v48  ;;  %5579 = vmatpush1.bf16.msra.mxu1 %v7839_v26 }
 0x814   :  { %5549 = vmatprep.subr.bf16.mxu0 %v7840_v20  ;;  %5581 = vmatprep.subr.bf16.mxu1 %v7841_v45 }
 0x817   :  { %5551 = vmatpush1.bf16.msra.mxu0 %v7842_v16  ;;  %5583 = vmatpush1.bf16.msra.mxu1 %v7843_v30  ;;  %v7863_v30 = vld [vmem:[#allocation105_spill] sm:$0xff] }
 0x818   :  { %5553 = vmatprep.subr.bf16.mxu0 %v7844_v22  ;;  %5585 = vmatprep.subr.bf16.mxu1 %v7845_v39 }
 0x81b   :  { %5555 = vmatpush1.bf16.msra.mxu0 %v7846_v12  ;;  %5587 = vmatpush1.bf16.msra.mxu1 %v7847_v32 }
 0x81c   :  { %5557 = vmatprep.subr.bf16.mxu0 %v7848_v15  ;;  %5589 = vmatprep.subr.bf16.mxu1 %v7849_v36 }
 0x81f   :  { %5559 = vmatpush1.bf16.msra.mxu0 %v7850_v7  ;;  %5591 = vmatpush1.bf16.msra.mxu1 %v7851_v57 }
 0x820   :  { %5561 = vmatprep.subr.bf16.mxu0 %v7852_v10  ;;  %5593 = vmatprep.subr.bf16.mxu1 %v7853_v4 }
 0x823   :  { %5563 = vmatpush1.bf16.msra.mxu0 %v7854_v60  ;;  %5595 = vmatpush1.bf16.msra.mxu1 %v7855_v25 }
 0x824   :  { %5565 = vmatprep.subr.bf16.mxu0 %v7856_v23  ;;  %5597 = vmatprep.subr.bf16.mxu1 %v7857_v42  ;;  %v3616_v42 = vld [vmem:[#allocation2 + $0xe0] sm:$0xff] }
 0x827   :  { %5567 = vmatpush1.bf16.msra.mxu0 %v7858_v38  ;;  %5599 = vmatpush1.bf16.msra.mxu1 %v7859_v58  ;;  %v3617_v58 = vld [vmem:[#allocation2 + $0xe8] sm:$0xff] }
 0x828   :  { %5601 = vmatprep.subr.bf16.mxu0 %v7860_v51  ;;  %5633 = vmatprep.subr.bf16.mxu1 %v7861_v63 }
 0x8bd   :  { %v3517_v44 = vpop.f32.mrb[26].mxu0  ;;  %v3588_v55 = vpop.f32.mrb[26].mxu1 }
 0x8be   :  { %v3593_v18 = vadd.f32 %v3517_v44, %v7862_v8  ;;  %v3519_v9 = vpop.f32.mrb[27].mxu0  ;;  %v3590_v48 = vpop.f32.mrb[27].mxu1  ;;  %v3595_v22 = vadd.f32 %v3588_v55, %v7863_v30 }
 0x8bf   :  { %v3594_v26 = vadd.f32 %v3519_v9, %v6452_v13  ;;  %v3596_v16 = vadd.f32 %v3590_v48, %v7572_v49  ;;  %v3619_v48 = vld [vmem:[#allocation2 + $0xf8] sm:$0xff] }
 0x8c0   :  { %v3597_v20 = vmul.f32 0.5, %v3593_v18  ;;  %v3599_v39 = vmul.f32 0.5, %v3595_v22 }
 0x8c1   :  { %v3598_v45 = vmul.f32 0.5, %v3594_v26 }
 0x8c2   :  { %5836 = vtanh.f32 %v3597_v20 }
 0x8c3   :  { %5838 = vtanh.f32 %v3598_v45 }
 0x8c4   :  { %5840 = vtanh.f32 %v3596_v16 }
 0x8c5   :  { %5842 = vtanh.f32 %v3599_v39  ;;  %v3618_v39 = vld [vmem:[#allocation2 + $0xf0] sm:$0xff] }
 0x8cc   :  { %v5837_v12 = vpop.eup %5836 }
 0x8cd   :  { %v3603_v32 = vmul.f32 0.5, %v5837_v12  ;;  %v5839_v15 = vpop.eup %5838 }
 0x8ce   :  { %v3604_v7 = vmul.f32 0.5, %v5839_v15  ;;  %v5841_v57 = vpop.eup %5840 }
 0x8cf   :  { %v3606_v36 = vadd.f32 0.5, %v3603_v32  ;;  %v5843_v23 = vpop.eup %5842 }
 0x8d0   :  { %v3607_v10 = vadd.f32 0.5, %v3604_v7  ;;  %v3605_v38 = vmul.f32 0.5, %v5843_v23 }
 0x8d1   :  { %v3611_v4 = vmul.f32 %v5841_v57, %v3606_v36 }
 0x8d2   :  { %v3610_v60 = vmul.f32 %v3607_v10, %v7032_v52  ;;  %v3608_v26 = vadd.f32 0.5, %v3605_v38 }
 0x8d4   :  { %v7146_v25 = vadd.f32 %v3611_v4, %v3610_v60 }
 0x8d6   :  { %5844 = vtanh.f32 %v7146_v25 }
 0x8dd   :  { %v3686_v51 = vpop.f32.mrb[28].mxu0  ;;  %v3757_v63 = vpop.f32.mrb[28].mxu1 }
 0x8de   :  { %v3762_v44 = vadd.f32 %v3686_v51, %v3616_v42  ;;  %v3688_v55 = vpop.f32.mrb[29].mxu0  ;;  %v3759_v18 = vpop.f32.mrb[29].mxu1  ;;  %v3764_v12 = vadd.f32 %v3757_v63, %v3618_v39 }
 0x8df   :  { %v3763_v9 = vadd.f32 %v3688_v55, %v3617_v58  ;;  %v3765_v52 = vadd.f32 %v3759_v18, %v3619_v48 }
 0x8e0   :  { %v3766_v20 = vmul.f32 0.5, %v3762_v44  ;;  %v5845_v45 = vpop.eup %5844 }
 0x8e1   :  { %v3767_v16 = vmul.f32 0.5, %v3763_v9  ;;  %v3614_v22 = vmul.f32 %v5845_v45, %v3608_v26 }
 0x8e2   :  { %5846 = vtanh.f32 %v3766_v20 }
 0x8e3   :  { %5848 = vtanh.f32 %v3767_v16  ;;  %3849 = vmatmul.mubr.f32.vlgmr.msra.gmra.mrb[30].mxu0 %v3614_v22  ;;  %3920 = vmatmul.mubr.f32.vlgmr.msra.gmra.mrb[30].mxu1 %v3614_v22 }
 0x8e4   :  { %5603 = vmatpush1.bf16.msra.mxu0 %v7515_v56  ;;  %5635 = vmatpush1.bf16.msra.mxu1 %v7516_v59  ;;  %5850 = vtanh.f32 %v3765_v52  ;;  %v3768_v56 = vmul.f32 0.5, %v3764_v12 }
 0x8e5   :  { %5605 = vmatprep.subr.bf16.mxu0 %v7517_v0  ;;  %5637 = vmatprep.subr.bf16.mxu1 %v7574_v21 }
 0x8e6   :  { %3990 = vmatprep.mubr.f32.mxu0 %v7461_v47  ;;  %4061 = vmatprep.mubr.f32.mxu1 %v7461_v47  ;;  %5852 = vtanh.f32 %v3768_v56 }
 0x8e8   :  { %5607 = vmatpush1.bf16.msra.mxu0 %v7575_v62  ;;  %5639 = vmatpush1.bf16.msra.mxu1 %v7576_v50 }
 0x8e9   :  { %5609 = vmatprep.subr.bf16.mxu0 %v7577_v24  ;;  %5641 = vmatprep.subr.bf16.mxu1 %v7578_v40 }
 0x8ec   :  { %v5847_v59 = vpop.eup %5846  ;;  %5611 = vmatpush1.bf16.msra.mxu0 %v7632_v53  ;;  %5643 = vmatpush1.bf16.msra.mxu1 %v7633_v27 }
 0x8ed   :  { %v3772_v32 = vmul.f32 0.5, %v5847_v59  ;;  %v5849_v0 = vpop.eup %5848  ;;  %5613 = vmatprep.subr.bf16.mxu0 %v7634_v34  ;;  %5645 = vmatprep.subr.bf16.mxu1 %v7526_v17 }
 0x8ee   :  { %v3773_v21 = vmul.f32 0.5, %v5849_v0  ;;  %v5851_v62 = vpop.eup %5850 }
 0x8ef   :  { %v3775_v47 = vadd.f32 0.5, %v3772_v32 }
 0x8f0   :  { %v3776_v50 = vadd.f32 0.5, %v3773_v21  ;;  %5615 = vmatpush1.bf16.msra.mxu0 %v7527_v54  ;;  %5647 = vmatpush1.bf16.msra.mxu1 %v7528_v33  ;;  %v5853_v54 = vpop.eup %5852 }
 0x8f1   :  { %v3780_v24 = vmul.f32 %v5851_v62, %v3775_v47  ;;  %5617 = vmatprep.subr.bf16.mxu0 %v7582_v14  ;;  %5649 = vmatprep.subr.bf16.mxu1 %v7635_v29  ;;  %v3774_v17 = vmul.f32 0.5, %v5853_v54 }
 0x8f2   :  { %v3779_v40 = vmul.f32 %v3776_v50, %v7054_v46 }
 0x8f3   :  { %v3777_v33 = vadd.f32 0.5, %v3774_v17 }
 0x8f4   :  { %v3781_v53 = vadd.f32 %v3780_v24, %v3779_v40  ;;  %5619 = vmatpush1.bf16.msra.mxu0 %v7585_v61  ;;  %5651 = vmatpush1.bf16.msra.mxu1 %v7586_v2 }
 0x8f5   :  { %5621 = vmatprep.subr.bf16.mxu0 %v7587_v35  ;;  %5653 = vmatprep.subr.bf16.mxu1 %v7588_v3 }
 0x8f6   :  { %5854 = vtanh.f32 %v3781_v53  ;;  %4091 = vst [vmem:[#allocation9] sm:$0xff] %v3781_v53 }
 0x8f8   :  { %5623 = vmatpush1.bf16.msra.mxu0 %v7589_v43  ;;  %5655 = vmatpush1.bf16.msra.mxu1 %v7590_v6 }
 0x8f9   :  { %5625 = vmatprep.subr.bf16.mxu0 %v7591_v1  ;;  %5657 = vmatprep.subr.bf16.mxu1 %v7539_v37 }
 0x8fc   :  { %5627 = vmatpush1.bf16.msra.mxu0 %v7540_v41  ;;  %5659 = vmatpush1.bf16.msra.mxu1 %v7541_v11 }
 0x8fd   :  { %5629 = vmatprep.subr.bf16.mxu0 %v7542_v19  ;;  %5661 = vmatprep.subr.bf16.mxu1 %v7543_v31 }
 0x900   :  { %v5855_v61 = vpop.eup %5854  ;;  %5631 = vmatpush1.bf16.msra.mxu0 %v7544_v5  ;;  %5663 = vmatpush1.bf16.msra.mxu1 %v7545_v28 }
 0x901   :  { %v3783_v14 = vmul.f32 %v5855_v61, %v3777_v33 }
 0x903   :  { %3991 = vmatmul.mubr.f32.vlgmr.msra.gmra.mrb[30].mxu0 %v3783_v14  ;;  %4090 = vst [vmem:[#allocation8] sm:$0xff] %v3783_v14  ;;  %4062 = vmatmul.mubr.f32.vlgmr.msra.gmra.mrb[30].mxu1 %v3783_v14 }
 0x9d6   :  { %v3992_v37 = vpop.f32.mrb[30].mxu0  ;;  %v4063_v1 = vpop.f32.mrb[30].mxu1 }
 0x9d7   :  { %v4068_v41 = vadd.f32 %v3992_v37, %v7862_v8  ;;  %v3994_v2 = vpop.f32.mrb[31].mxu0  ;;  %v4065_v11 = vpop.f32.mrb[31].mxu1  ;;  %v4070_v5 = vadd.f32 %v4063_v1, %v7863_v30 }
 0x9d8   :  { %v4069_v19 = vadd.f32 %v3994_v2, %v6452_v13  ;;  %v4071_v3 = vadd.f32 %v4065_v11, %v7572_v49 }
 0x9d9   :  { %v4072_v35 = vmul.f32 0.5, %v4068_v41  ;;  %v4074_v28 = vmul.f32 0.5, %v4070_v5 }
 0x9da   :  { %v4073_v31 = vmul.f32 0.5, %v4069_v19 }
 0x9db   :  { %5856 = vtanh.f32 %v4072_v35 }
 0x9dc   :  { %5858 = vtanh.f32 %v4073_v31 }
 0x9dd   :  { %5860 = vtanh.f32 %v4071_v3 }
 0x9de   :  { %5862 = vtanh.f32 %v4074_v28 }
 0x9e5   :  { %v5857_v43 = vpop.eup %5856 }
 0x9e6   :  { %v4078_v6 = vmul.f32 0.5, %v5857_v43  ;;  %v5859_v27 = vpop.eup %5858 }
 0x9e7   :  { %v4079_v29 = vmul.f32 0.5, %v5859_v27  ;;  %v5861_v46 = vpop.eup %5860 }
 0x9e8   :  { %v4081_v34 = vadd.f32 0.5, %v4078_v6 }
 0x9e9   :  { %v4082_v8 = vadd.f32 0.5, %v4079_v29 }
 0x9ea   :  { %v4086_v15 = vmul.f32 %v5861_v46, %v4081_v34 }
 0x9eb   :  { %v4085_v13 = vmul.f32 %v4082_v8, %v7146_v25 }
 0x9ed   :  { %v4087_v36 = vadd.f32 %v4086_v15, %v4085_v13 }
 0x9ef   :  { %5864 = vtanh.f32 %v4087_v36  ;;  %4093 = vst [vmem:[#allocation9 + $0x8] sm:$0xff] %v4087_v36 }
 0x9f0   :  { %5943 = shalt.err (!%p5940_p0)
}
 0x9f1   :  { %s5944_s9 = scalar_lea.hbm %s7216_s5, 256 }
 0x9f2   :  { %p5945_p1 = scmp.ne.s32.totalorder %s7216_s5, %s5944_s9  ;;  %p5948_p2 = scmp.lt.u32.totalorder %s5944_s9, %s7216_s5 }
 0x9f4   :  { %p5950_p3 = pnand %p5948_p2, %p5945_p1 }
 0x9f6   :  { %5953 = shalt.err (!%p5950_p3)
}
 0x9f7   :  { %s5991_s14 = smov 128   ;;  %s5992_s15 = smov 8   ;;  %v5863_v49 = vpop.eup %5862 }
 0x9f8   :  { %4117 = dma.vmem_to_hbm [thread:$0]  %s4112_s30, 256, %s7216_s5, [#allocation10], %s5991_s14, %s5991_s14, %s5992_s15   ;;  %v4080_v30 = vmul.f32 0.5, %v5863_v49 }
 0x9f9   :  { %s5993_s17 = smov [#allocation8]   ;;  %v5865_v57 = vpop.eup %5864 }
 0x9fa   :  { %s4099_s18 = sshll.u32 %s5993_s17, 4  ;;  %v4083_v7 = vadd.f32 0.5, %v4080_v30  ;;  %s4100_s18 = int_to_ptr.vmem [resolvable:$true] %s4099_s18 }
 0x9fb   :  { %s5954_s19 = scalar_lea.vmem %s4100_s18, 256  ;;  %p5959_p5 = scmp.lt.s32.totalorder %s4100_s18, %s4100_s18 }
 0x9fc   :  { %v4089_v10 = vmul.f32 %v5865_v57, %v4083_v7  ;;  %p5955_p4 = scmp.ne.s32.totalorder %s4100_s18, %s5954_s19  ;;  %p5960_p6 = scmp.lt.s32.totalorder %s5954_s19, %s5954_s19 }
 0x9fe   :  { %4092 = vst [vmem:[#allocation8 + $0x8] sm:$0xff] %v4089_v10  ;;  %p5961_p7 = por %p5960_p6, %p5959_p5 }
 0xa00   :  { %p5962_p8 = pnand %p5961_p7, %p5955_p4 }
 0xa02   :  { %5965 = shalt.err (!%p5962_p8)
}
 0xa03   :  { %s5966_s5 = scalar_lea.hbm %s7215_s4, 256 }
 0xa04   :  { %p5967_p9 = scmp.ne.s32.totalorder %s7215_s4, %s5966_s5  ;;  %p5970_p10 = scmp.lt.u32.totalorder %s5966_s5, %s7215_s4 }
 0xa06   :  { %p5972_p11 = pnand %p5970_p10, %p5967_p9 }
 0xa08   :  { %5975 = shalt.err (!%p5972_p11)
}
 0xa09   :  { %4105 = dma.vmem_to_hbm [thread:$0]  %s4100_s18, 256, %s7215_s4, [#allocation4], %s5991_s14, %s5991_s14, %s5992_s15  }
 0xa0a   :  { %5980 = dma.done.wait [#allocation4], 256  }
 0xa0b   :  { %5981 = vsyncadd [#allocation4], 4294967040 }
 0xa0c   :  { %5982 = dma.done.wait [#allocation10], 256  }
 0xa0d   :  { %5983 = vsyncadd [#allocation10], 4294967040 }
 0xa0e   :  { %4124 = vsyncpa [#allocation3], 1 }
 0xa0f   :  { %4125 = vsyncpa [#allocation6], 1 }
 0xa10   :  { %4126 = vsyncpa [#allocation4], 1 }
 0xa11   :  { %4127 = vsyncpa [#allocation10], 1 }

</bundles_post_ra>
